<compile_context>
chip_gen: v5e
topology: v5e:2x2
jax: 0.10.0
libtpu: 0.0.40
codegen_flags: <defaults>
</compile_context>

<pallas_src>
import numpy as np

import jax
import jax.numpy as jnp
from jax.experimental import pallas as pl
from jax.experimental.pallas import tpu as pltpu


# ----------------------------------------------------------------------------
# Fused kernel
# ----------------------------------------------------------------------------
def _conv_tap(q_ref, x, m_ref, di):
    """(Q_di @ x) @ M_di with f32 accumulation, bf16 MXU operands."""
    t = jnp.dot(q_ref[di], x, preferred_element_type=jnp.float32)
    return jnp.dot(t.astype(jnp.bfloat16), m_ref[di],
                   preferred_element_type=jnp.float32)


def _mnist_fused_kernel(x_ref, q1_ref, m1_ref, b1_ref,
                        q2_ref, m2_ref, b2_ref,
                        wfc1_ref, bfc1_ref, wfc2_ref, bfc2_ref,
                        o_ref, acc1_ref, acc2_ref):
    f32 = jnp.float32
    bf16 = jnp.bfloat16
    Bt = x_ref.shape[0] // 28          # batch block size

    x = x_ref[...]                      # (Bt*28, 28) bf16, rows b-major (b,h)

    # --- conv1 (5x5, 1->16) + 2x2 avg-pool + ReLU ---------------------------
    # rows: b*12 + hp ; lanes: wp*16 + co  (192 lanes)
    acc1_ref[...] = _conv_tap(q1_ref, x, m1_ref, 0)
    for di in range(1, 5):
        acc1_ref[...] += _conv_tap(q1_ref, x, m1_ref, di)
    a1 = jnp.maximum(acc1_ref[...] + b1_ref[...], 0.0).astype(bf16)   # (Bt*12, 192)

    # --- conv2 (5x5, 16->32) + 2x2 avg-pool + ReLU --------------------------
    # rows: hp*Bt + b (hp-major) ; lanes: wp*32 + co  (128 lanes)
    acc2_ref[...] = _conv_tap(q2_ref, a1, m2_ref, 0)
    for di in range(1, 5):
        acc2_ref[...] += _conv_tap(q2_ref, a1, m2_ref, di)
    a2 = jnp.maximum(acc2_ref[...] + b2_ref[...], 0.0)                # (Bt*4, 128) f32

    # --- flatten to (Bt, 512): lane = hp*128 + wp*32 + co -------------------
    a2w = jnp.concatenate([a2[hp * Bt:(hp + 1) * Bt, :] for hp in range(4)],
                          axis=-1).astype(bf16)                        # (Bt, 512)

    # --- fc1 (512 -> 512), single K=512 matmul, + ReLU ----------------------
    h = jnp.dot(a2w, wfc1_ref[...], preferred_element_type=f32) + bfc1_ref[...]
    h = jnp.maximum(h, 0.0).astype(bf16)                               # (Bt, 512)

    # --- fc2 (512 -> 10), output padded to 128 lanes ------------------------
    o_ref[...] = (jnp.dot(h, wfc2_ref[...], preferred_element_type=f32)
                  + bfc2_ref[...]).astype(o_ref.dtype)                 # (Bt, 128)


def _const_spec(shape):
    nd = len(shape)
    return pl.BlockSpec(shape, lambda i, _nd=nd: (0,) * _nd)


# ----------------------------------------------------------------------------
# One-time host-side parameter preparation (layout plumbing, outside hot path)
# ----------------------------------------------------------------------------
def prepare_params(params, block_batch=8):
    Bt = int(block_batch)
    w1 = np.asarray(params["w1"], np.float32)      # (16, 1, 5, 5)  OIHW
    b1 = np.asarray(params["b1"], np.float32)      # (16,)
    w2 = np.asarray(params["w2"], np.float32)      # (32, 16, 5, 5) OIHW
    b2 = np.asarray(params["b2"], np.float32)      # (32,)
    wfc1 = np.asarray(params["wfc1"], np.float32)  # (512, 512)
    bfc1 = np.asarray(params["bfc1"], np.float32)  # (512,)
    wfc2 = np.asarray(params["wfc2"], np.float32)  # (10, 512)
    bfc2 = np.asarray(params["bfc2"], np.float32)  # (10,)

    # conv1 right matrices: W-taps + W-direction avg-pool + 0.25 scale.
    # m1[di, w, wp*16 + co]
    m1 = np.zeros((5, 28, 12 * 16), np.float32)
    for di in range(5):
        for wp in range(12):
            for wo in (2 * wp, 2 * wp + 1):
                for dj in range(5):
                    m1[di, wo + dj, wp * 16:(wp + 1) * 16] += 0.25 * w1[:, 0, di, dj]

    # conv1 left matrices: H-tap selection + H-direction avg-pool (0/1).
    # Per batch-block, independent of global batch.  Rows b*12 + hp (b-major).
    q1 = np.zeros((5, Bt * 12, Bt * 28), np.float32)
    for di in range(5):
        for b in range(Bt):
            for hp in range(12):
                q1[di, b * 12 + hp, b * 28 + 2 * hp + di] = 1.0
                q1[di, b * 12 + hp, b * 28 + 2 * hp + 1 + di] = 1.0

    # conv2 right matrices.  m2[di, w*16 + ci, wp*32 + co]
    m2 = np.zeros((5, 12 * 16, 4 * 32), np.float32)
    for di in range(5):
        for wp in range(4):
            for wo in (2 * wp, 2 * wp + 1):
                for dj in range(5):
                    w = wo + dj
                    m2[di, w * 16:(w + 1) * 16, wp * 32:(wp + 1) * 32] += \
                        0.25 * w2[:, :, di, dj].T

    # conv2 left matrices.  Rows hp*Bt + b (hp-major, so fc1 lane-concat of the
    # four hp chunks is a plain contiguous slice).
    q2 = np.zeros((5, Bt * 4, Bt * 12), np.float32)
    for di in range(5):
        for hp in range(4):
            for b in range(Bt):
                q2[di, hp * Bt + b, b * 12 + 2 * hp + di] = 1.0
                q2[di, hp * Bt + b, b * 12 + 2 * hp + 1 + di] = 1.0

    # fc1: fold PyTorch's NCHW flatten (co*16 + hp*4 + wp) and the transpose.
    # Our kernel lane layout is hp*128 + wp*32 + co.
    wr = wfc1.reshape(512, 32, 4, 4).transpose(2, 3, 1, 0)   # (hp, wp, co, o)
    wfc1p = np.ascontiguousarray(wr.reshape(512, 512))

    # fc2: pad output dim to 128 lanes.
    wfc2p = np.zeros((512, 128), np.float32)
    wfc2p[:, :10] = wfc2.T
    bfc2p = np.zeros((1, 128), np.float32)
    bfc2p[0, :10] = bfc2

    return dict(
        q1=jnp.asarray(q1, jnp.bfloat16),                 # 0/1: exact in bf16
        m1=jnp.asarray(m1, jnp.bfloat16),
        b1=jnp.asarray(np.tile(b1, 12)[None, :], jnp.float32),    # (1, 192)
        q2=jnp.asarray(q2, jnp.bfloat16),
        m2=jnp.asarray(m2, jnp.bfloat16),
        b2=jnp.asarray(np.tile(b2, 4)[None, :], jnp.float32),     # (1, 128)
        wfc1=jnp.asarray(wfc1p, jnp.bfloat16),                    # (512, 512)
        bfc1=jnp.asarray(bfc1[None, :], jnp.float32),             # (1, 512)
        wfc2=jnp.asarray(wfc2p, jnp.bfloat16),                    # (512, 128)
        bfc2=jnp.asarray(bfc2p, jnp.float32),                     # (1, 128)
    )


# ----------------------------------------------------------------------------
# Forward pass: a single pallas_call, batch tiled over a parallel grid axis
# ----------------------------------------------------------------------------
def mnist_cnn_forward(x_nchw, p):
    B = x_nchw.shape[0]
    Bt = p["q1"].shape[1] // 12            # batch block baked into the Q matrices
    assert p["q2"].shape[1] == 4 * Bt, "prepared params / block size mismatch"

    Bp = ((B + Bt - 1) // Bt) * Bt         # pad batch to a multiple of Bt
    x = x_nchw.astype(jnp.bfloat16).reshape(B * 28, 28)
    if Bp != B:
        x = jnp.pad(x, ((0, (Bp - B) * 28), (0, 0)))

    out = pl.pallas_call(
        _mnist_fused_kernel,
        out_shape=jax.ShapeDtypeStruct((Bp, 128), jnp.float32),
        grid=(Bp // Bt,),
        in_specs=[
            pl.BlockSpec((Bt * 28, 28), lambda i: (i, 0)),   # activations move
            _const_spec(p["q1"].shape),                      # weights stay put
            _const_spec(p["m1"].shape),
            _const_spec(p["b1"].shape),
            _const_spec(p["q2"].shape),
            _const_spec(p["m2"].shape),
            _const_spec(p["b2"].shape),
            _const_spec(p["wfc1"].shape),
            _const_spec(p["bfc1"].shape),
            _const_spec(p["wfc2"].shape),
            _const_spec(p["bfc2"].shape),
        ],
        out_specs=pl.BlockSpec((Bt, 128), lambda i: (i, 0)),
        scratch_shapes=[
            pltpu.VMEM((Bt * 12, 12 * 16), jnp.float32),     # conv1 accumulator
            pltpu.VMEM((Bt * 4, 4 * 32), jnp.float32),       # conv2 accumulator
        ],
        compiler_params=pltpu.CompilerParams(
            dimension_semantics=("parallel",)),              # v7x megacore
    )(x, p["q1"], p["m1"], p["b1"], p["q2"], p["m2"], p["b2"],
      p["wfc1"], p["bfc1"], p["wfc2"], p["bfc2"])

    return out[:B, :10]


# ----------------------------------------------------------------------------
# Pure-JAX reference for validation
# ----------------------------------------------------------------------------
def _avgpool2_relu_ref_nchw(x):
    B, C, H, W = x.shape
    x = x.reshape(B, C, H // 2, 2, W // 2, 2).mean(axis=(3, 5))
    return jax.nn.relu(x)


def reference_forward(x, p):
    dn = jax.lax.conv_dimension_numbers(x.shape, p["w1"].shape, ("NCHW", "OIHW", "NCHW"))
    y = jax.lax.conv_general_dilated(x, p["w1"], (1, 1), "VALID",
                                     dimension_numbers=dn, precision="highest")
    y = y + p["b1"][None, :, None, None]
    y = _avgpool2_relu_ref_nchw(y)
    dn2 = jax.lax.conv_dimension_numbers(y.shape, p["w2"].shape, ("NCHW", "OIHW", "NCHW"))
    y = jax.lax.conv_general_dilated(y, p["w2"], (1, 1), "VALID",
                                     dimension_numbers=dn2, precision="highest")
    y = y + p["b2"][None, :, None, None]
    y = _avgpool2_relu_ref_nchw(y)
    y = y.reshape(y.shape[0], -1)
    y = jax.nn.relu(jnp.dot(y, p["wfc1"].T, precision="highest") + p["bfc1"])
    y = jnp.dot(y, p["wfc2"].T, precision="highest") + p["bfc2"]
    return y


# ----------------------------------------------------------------------------
# Main
# ----------------------------------------------------------------------------
if __name__ == "__main__":
    key = jax.random.PRNGKey(0)
    ks = jax.random.split(key, 10)

    def init(k, shape, scale=0.05):
        return scale * jax.random.normal(k, shape, dtype=jnp.float32)

    params = {
        "w1": init(ks[0], (16, 1, 5, 5)),
        "b1": init(ks[1], (16,)),
        "w2": init(ks[2], (32, 16, 5, 5)),
        "b2": init(ks[3], (32,)),
        "wfc1": init(ks[4], (512, 512)),
        "bfc1": init(ks[5], (512,)),
        "wfc2": init(ks[6], (10, 512)),
        "bfc2": init(ks[7], (10,)),
    }

    # Spatial 28x28 is required so the flattened feature size is 512
    # (32 channels * 4 * 4) as fc1 demands.
    prepped = prepare_params(params, block_batch=8)       # one-time host prep
    fwd = jax.jit(mnist_cnn_forward)

    # Batch = 16 -> two grid steps of Bt=8 (exercises the batch grid).
    x = jax.random.normal(ks[8], (16, 1, 28, 28), dtype=jnp.float32)
    out = jax.block_until_ready(fwd(x, prepped))
    assert out.shape == (16, 10) and out.dtype == jnp.float32
    ref = jax.block_until_ready(reference_forward(x, params))
    assert jnp.allclose(out, ref, atol=3e-2, rtol=3e-2), "mismatch vs reference (B=16)"

    # Batch = 2 -> exercises the ragged-batch padding path.
    x2 = jax.random.normal(ks[9], (2, 1, 28, 28), dtype=jnp.float32)
    out2 = jax.block_until_ready(fwd(x2, prepped))
    ref2 = jax.block_until_ready(reference_forward(x2, params))
    assert out2.shape == (2, 10)
    assert jnp.allclose(out2, ref2, atol=3e-2, rtol=3e-2), "mismatch vs reference (B=2)"

    print("KERNEL_OK")
</pallas_src>

<mosaic_0001>
module attributes {stable_mosaic.version = 11 : i64} {
  func.func @_mnist_fused_kernel(%arg0: i32, %arg1: memref<224x28xbf16, #tpu.memory_space<vmem>>, %arg2: memref<5x96x224xbf16, #tpu.memory_space<vmem>>, %arg3: memref<5x28x192xbf16, #tpu.memory_space<vmem>>, %arg4: memref<1x192xf32, #tpu.memory_space<vmem>>, %arg5: memref<5x32x96xbf16, #tpu.memory_space<vmem>>, %arg6: memref<5x192x128xbf16, #tpu.memory_space<vmem>>, %arg7: memref<1x128xf32, #tpu.memory_space<vmem>>, %arg8: memref<512x512xbf16, #tpu.memory_space<vmem>>, %arg9: memref<1x512xf32, #tpu.memory_space<vmem>>, %arg10: memref<512x128xbf16, #tpu.memory_space<vmem>>, %arg11: memref<1x128xf32, #tpu.memory_space<vmem>>, %arg12: memref<8x128xf32, #tpu.memory_space<vmem>>, %arg13: memref<96x192xf32, #tpu.memory_space<vmem>>, %arg14: memref<32x128xf32, #tpu.memory_space<vmem>>) attributes {dimension_semantics = [#tpu.dimension_semantics<parallel>], iteration_bounds = array<i64: 2>, scalar_prefetch = 0 : i64, scratch_operands = 2 : i64, tpu.core_type = #tpu.core_type<tc>, window_params = [{transform_indices = @transform_0, window_bounds = array<i64: 224, 28>}, {pipeline_mode = #tpu.pipeline_mode<synchronous>, transform_indices = @transform_1, window_bounds = array<i64: 5, 96, 224>}, {pipeline_mode = #tpu.pipeline_mode<synchronous>, transform_indices = @transform_2, window_bounds = array<i64: 5, 28, 192>}, {pipeline_mode = #tpu.pipeline_mode<synchronous>, transform_indices = @transform_3, window_bounds = array<i64: 1, 192>}, {pipeline_mode = #tpu.pipeline_mode<synchronous>, transform_indices = @transform_4, window_bounds = array<i64: 5, 32, 96>}, {pipeline_mode = #tpu.pipeline_mode<synchronous>, transform_indices = @transform_5, window_bounds = array<i64: 5, 192, 128>}, {pipeline_mode = #tpu.pipeline_mode<synchronous>, transform_indices = @transform_6, window_bounds = array<i64: 1, 128>}, {pipeline_mode = #tpu.pipeline_mode<synchronous>, transform_indices = @transform_7, window_bounds = array<i64: 512, 512>}, {pipeline_mode = #tpu.pipeline_mode<synchronous>, transform_indices = @transform_8, window_bounds = array<i64: 1, 512>}, {pipeline_mode = #tpu.pipeline_mode<synchronous>, transform_indices = @transform_9, window_bounds = array<i64: 512, 128>}, {pipeline_mode = #tpu.pipeline_mode<synchronous>, transform_indices = @transform_10, window_bounds = array<i64: 1, 128>}, {transform_indices = @transform_11, window_bounds = array<i64: 8, 128>}]} {
    %c0 = arith.constant 0 : index
    %c0_0 = arith.constant 0 : index
    %0 = vector.load %arg1[%c0, %c0_0] : memref<224x28xbf16, #tpu.memory_space<vmem>>, vector<224x28xbf16>
    %c0_1 = arith.constant 0 : index
    %c0_2 = arith.constant 0 : index
    %c0_3 = arith.constant 0 : index
    %1 = vector.load %arg2[%c0_1, %c0_2, %c0_3] : memref<5x96x224xbf16, #tpu.memory_space<vmem>>, vector<1x96x224xbf16>
    %2 = vector.shape_cast %1 : vector<1x96x224xbf16> to vector<96x224xbf16>
    %cst = arith.constant dense<0.000000e+00> : vector<96x28xf32>
    %3 = tpu.matmul %2, %0, %cst {dimension_numbers = #tpu.dot_dimension_numbers<[1], [0], [0], [1], [0, 0, 1, 1], [], []>} : vector<96x224xbf16>, vector<224x28xbf16>, vector<96x28xf32> -> vector<96x28xf32>
    %4 = arith.truncf %3 : vector<96x28xf32> to vector<96x28xbf16>
    %c0_4 = arith.constant 0 : index
    %c0_5 = arith.constant 0 : index
    %c0_6 = arith.constant 0 : index
    %5 = vector.load %arg3[%c0_4, %c0_5, %c0_6] : memref<5x28x192xbf16, #tpu.memory_space<vmem>>, vector<1x28x192xbf16>
    %6 = vector.shape_cast %5 : vector<1x28x192xbf16> to vector<28x192xbf16>
    %cst_7 = arith.constant dense<0.000000e+00> : vector<96x192xf32>
    %7 = tpu.matmul %4, %6, %cst_7 {dimension_numbers = #tpu.dot_dimension_numbers<[1], [0], [0], [1], [0, 0, 1, 1], [], []>} : vector<96x28xbf16>, vector<28x192xbf16>, vector<96x192xf32> -> vector<96x192xf32>
    %c0_8 = arith.constant 0 : index
    %c0_9 = arith.constant 0 : index
    %8 = vector.load %arg13[%c0_8, %c0_9] : memref<96x192xf32, #tpu.memory_space<vmem>>, vector<96x192xf32>
    tpu.vector_store %arg13[%c0_8, %c0_9], %7 {strides = array<i32>} : memref<96x192xf32, #tpu.memory_space<vmem>>, vector<96x192xf32>,
    %c0_10 = arith.constant 0 : index
    %c0_11 = arith.constant 0 : index
    %9 = vector.load %arg13[%c0_10, %c0_11] : memref<96x192xf32, #tpu.memory_space<vmem>>, vector<96x192xf32>
    %c1 = arith.constant 1 : index
    %c0_12 = arith.constant 0 : index
    %c0_13 = arith.constant 0 : index
    %10 = vector.load %arg2[%c1, %c0_12, %c0_13] : memref<5x96x224xbf16, #tpu.memory_space<vmem>>, vector<1x96x224xbf16>
    %11 = vector.shape_cast %10 : vector<1x96x224xbf16> to vector<96x224xbf16>
    %cst_14 = arith.constant dense<0.000000e+00> : vector<96x28xf32>
    %12 = tpu.matmul %11, %0, %cst_14 {dimension_numbers = #tpu.dot_dimension_numbers<[1], [0], [0], [1], [0, 0, 1, 1], [], []>} : vector<96x224xbf16>, vector<224x28xbf16>, vector<96x28xf32> -> vector<96x28xf32>
    %13 = arith.truncf %12 : vector<96x28xf32> to vector<96x28xbf16>
    %c1_15 = arith.constant 1 : index
    %c0_16 = arith.constant 0 : index
    %c0_17 = arith.constant 0 : index
    %14 = vector.load %arg3[%c1_15, %c0_16, %c0_17] : memref<5x28x192xbf16, #tpu.memory_space<vmem>>, vector<1x28x192xbf16>
    %15 = vector.shape_cast %14 : vector<1x28x192xbf16> to vector<28x192xbf16>
    %cst_18 = arith.constant dense<0.000000e+00> : vector<96x192xf32>
    %16 = tpu.matmul %13, %15, %cst_18 {dimension_numbers = #tpu.dot_dimension_numbers<[1], [0], [0], [1], [0, 0, 1, 1], [], []>} : vector<96x28xbf16>, vector<28x192xbf16>, vector<96x192xf32> -> vector<96x192xf32>
    %17 = arith.addf %9, %16 : vector<96x192xf32>
    %c0_19 = arith.constant 0 : index
    %c0_20 = arith.constant 0 : index
    %18 = vector.load %arg13[%c0_19, %c0_20] : memref<96x192xf32, #tpu.memory_space<vmem>>, vector<96x192xf32>
    tpu.vector_store %arg13[%c0_19, %c0_20], %17 {strides = array<i32>} : memref<96x192xf32, #tpu.memory_space<vmem>>, vector<96x192xf32>,
    %c0_21 = arith.constant 0 : index
    %c0_22 = arith.constant 0 : index
    %19 = vector.load %arg13[%c0_21, %c0_22] : memref<96x192xf32, #tpu.memory_space<vmem>>, vector<96x192xf32>
    %c2 = arith.constant 2 : index
    %c0_23 = arith.constant 0 : index
    %c0_24 = arith.constant 0 : index
    %20 = vector.load %arg2[%c2, %c0_23, %c0_24] : memref<5x96x224xbf16, #tpu.memory_space<vmem>>, vector<1x96x224xbf16>
    %21 = vector.shape_cast %20 : vector<1x96x224xbf16> to vector<96x224xbf16>
    %cst_25 = arith.constant dense<0.000000e+00> : vector<96x28xf32>
    %22 = tpu.matmul %21, %0, %cst_25 {dimension_numbers = #tpu.dot_dimension_numbers<[1], [0], [0], [1], [0, 0, 1, 1], [], []>} : vector<96x224xbf16>, vector<224x28xbf16>, vector<96x28xf32> -> vector<96x28xf32>
    %23 = arith.truncf %22 : vector<96x28xf32> to vector<96x28xbf16>
    %c2_26 = arith.constant 2 : index
    %c0_27 = arith.constant 0 : index
    %c0_28 = arith.constant 0 : index
    %24 = vector.load %arg3[%c2_26, %c0_27, %c0_28] : memref<5x28x192xbf16, #tpu.memory_space<vmem>>, vector<1x28x192xbf16>
    %25 = vector.shape_cast %24 : vector<1x28x192xbf16> to vector<28x192xbf16>
    %cst_29 = arith.constant dense<0.000000e+00> : vector<96x192xf32>
    %26 = tpu.matmul %23, %25, %cst_29 {dimension_numbers = #tpu.dot_dimension_numbers<[1], [0], [0], [1], [0, 0, 1, 1], [], []>} : vector<96x28xbf16>, vector<28x192xbf16>, vector<96x192xf32> -> vector<96x192xf32>
    %27 = arith.addf %19, %26 : vector<96x192xf32>
    %c0_30 = arith.constant 0 : index
    %c0_31 = arith.constant 0 : index
    %28 = vector.load %arg13[%c0_30, %c0_31] : memref<96x192xf32, #tpu.memory_space<vmem>>, vector<96x192xf32>
    tpu.vector_store %arg13[%c0_30, %c0_31], %27 {strides = array<i32>} : memref<96x192xf32, #tpu.memory_space<vmem>>, vector<96x192xf32>,
    %c0_32 = arith.constant 0 : index
    %c0_33 = arith.constant 0 : index
    %29 = vector.load %arg13[%c0_32, %c0_33] : memref<96x192xf32, #tpu.memory_space<vmem>>, vector<96x192xf32>
    %c3 = arith.constant 3 : index
    %c0_34 = arith.constant 0 : index
    %c0_35 = arith.constant 0 : index
    %30 = vector.load %arg2[%c3, %c0_34, %c0_35] : memref<5x96x224xbf16, #tpu.memory_space<vmem>>, vector<1x96x224xbf16>
    %31 = vector.shape_cast %30 : vector<1x96x224xbf16> to vector<96x224xbf16>
    %cst_36 = arith.constant dense<0.000000e+00> : vector<96x28xf32>
    %32 = tpu.matmul %31, %0, %cst_36 {dimension_numbers = #tpu.dot_dimension_numbers<[1], [0], [0], [1], [0, 0, 1, 1], [], []>} : vector<96x224xbf16>, vector<224x28xbf16>, vector<96x28xf32> -> vector<96x28xf32>
    %33 = arith.truncf %32 : vector<96x28xf32> to vector<96x28xbf16>
    %c3_37 = arith.constant 3 : index
    %c0_38 = arith.constant 0 : index
    %c0_39 = arith.constant 0 : index
    %34 = vector.load %arg3[%c3_37, %c0_38, %c0_39] : memref<5x28x192xbf16, #tpu.memory_space<vmem>>, vector<1x28x192xbf16>
    %35 = vector.shape_cast %34 : vector<1x28x192xbf16> to vector<28x192xbf16>
    %cst_40 = arith.constant dense<0.000000e+00> : vector<96x192xf32>
    %36 = tpu.matmul %33, %35, %cst_40 {dimension_numbers = #tpu.dot_dimension_numbers<[1], [0], [0], [1], [0, 0, 1, 1], [], []>} : vector<96x28xbf16>, vector<28x192xbf16>, vector<96x192xf32> -> vector<96x192xf32>
    %37 = arith.addf %29, %36 : vector<96x192xf32>
    %c0_41 = arith.constant 0 : index
    %c0_42 = arith.constant 0 : index
    %38 = vector.load %arg13[%c0_41, %c0_42] : memref<96x192xf32, #tpu.memory_space<vmem>>, vector<96x192xf32>
    tpu.vector_store %arg13[%c0_41, %c0_42], %37 {strides = array<i32>} : memref<96x192xf32, #tpu.memory_space<vmem>>, vector<96x192xf32>,
    %c0_43 = arith.constant 0 : index
    %c0_44 = arith.constant 0 : index
    %39 = vector.load %arg13[%c0_43, %c0_44] : memref<96x192xf32, #tpu.memory_space<vmem>>, vector<96x192xf32>
    %c4 = arith.constant 4 : index
    %c0_45 = arith.constant 0 : index
    %c0_46 = arith.constant 0 : index
    %40 = vector.load %arg2[%c4, %c0_45, %c0_46] : memref<5x96x224xbf16, #tpu.memory_space<vmem>>, vector<1x96x224xbf16>
    %41 = vector.shape_cast %40 : vector<1x96x224xbf16> to vector<96x224xbf16>
    %cst_47 = arith.constant dense<0.000000e+00> : vector<96x28xf32>
    %42 = tpu.matmul %41, %0, %cst_47 {dimension_numbers = #tpu.dot_dimension_numbers<[1], [0], [0], [1], [0, 0, 1, 1], [], []>} : vector<96x224xbf16>, vector<224x28xbf16>, vector<96x28xf32> -> vector<96x28xf32>
    %43 = arith.truncf %42 : vector<96x28xf32> to vector<96x28xbf16>
    %c4_48 = arith.constant 4 : index
    %c0_49 = arith.constant 0 : index
    %c0_50 = arith.constant 0 : index
    %44 = vector.load %arg3[%c4_48, %c0_49, %c0_50] : memref<5x28x192xbf16, #tpu.memory_space<vmem>>, vector<1x28x192xbf16>
    %45 = vector.shape_cast %44 : vector<1x28x192xbf16> to vector<28x192xbf16>
    %cst_51 = arith.constant dense<0.000000e+00> : vector<96x192xf32>
    %46 = tpu.matmul %43, %45, %cst_51 {dimension_numbers = #tpu.dot_dimension_numbers<[1], [0], [0], [1], [0, 0, 1, 1], [], []>} : vector<96x28xbf16>, vector<28x192xbf16>, vector<96x192xf32> -> vector<96x192xf32>
    %47 = arith.addf %39, %46 : vector<96x192xf32>
    %c0_52 = arith.constant 0 : index
    %c0_53 = arith.constant 0 : index
    %48 = vector.load %arg13[%c0_52, %c0_53] : memref<96x192xf32, #tpu.memory_space<vmem>>, vector<96x192xf32>
    tpu.vector_store %arg13[%c0_52, %c0_53], %47 {strides = array<i32>} : memref<96x192xf32, #tpu.memory_space<vmem>>, vector<96x192xf32>,
    %c0_54 = arith.constant 0 : index
    %c0_55 = arith.constant 0 : index
    %49 = vector.load %arg13[%c0_54, %c0_55] : memref<96x192xf32, #tpu.memory_space<vmem>>, vector<96x192xf32>
    %c0_56 = arith.constant 0 : index
    %c0_57 = arith.constant 0 : index
    %50 = vector.load %arg4[%c0_56, %c0_57] : memref<1x192xf32, #tpu.memory_space<vmem>>, vector<1x192xf32>
    %51 = vector.broadcast %50 : vector<1x192xf32> to vector<96x192xf32>
    %52 = arith.addf %49, %51 : vector<96x192xf32>
    %cst_58 = arith.constant 0.000000e+00 : f32
    %53 = vector.broadcast %cst_58 : f32 to vector<96x192xf32>
    %54 = arith.maximumf %52, %53 : vector<96x192xf32>
    %55 = arith.truncf %54 : vector<96x192xf32> to vector<96x192xbf16>
    %c0_59 = arith.constant 0 : index
    %c0_60 = arith.constant 0 : index
    %c0_61 = arith.constant 0 : index
    %56 = vector.load %arg5[%c0_59, %c0_60, %c0_61] : memref<5x32x96xbf16, #tpu.memory_space<vmem>>, vector<1x32x96xbf16>
    %57 = vector.shape_cast %56 : vector<1x32x96xbf16> to vector<32x96xbf16>
    %cst_62 = arith.constant dense<0.000000e+00> : vector<32x192xf32>
    %58 = tpu.matmul %57, %55, %cst_62 {dimension_numbers = #tpu.dot_dimension_numbers<[1], [0], [0], [1], [0, 0, 1, 1], [], []>} : vector<32x96xbf16>, vector<96x192xbf16>, vector<32x192xf32> -> vector<32x192xf32>
    %59 = arith.truncf %58 : vector<32x192xf32> to vector<32x192xbf16>
    %c0_63 = arith.constant 0 : index
    %c0_64 = arith.constant 0 : index
    %c0_65 = arith.constant 0 : index
    %60 = vector.load %arg6[%c0_63, %c0_64, %c0_65] : memref<5x192x128xbf16, #tpu.memory_space<vmem>>, vector<1x192x128xbf16>
    %61 = vector.shape_cast %60 : vector<1x192x128xbf16> to vector<192x128xbf16>
    %cst_66 = arith.constant dense<0.000000e+00> : vector<32x128xf32>
    %62 = tpu.matmul %59, %61, %cst_66 {dimension_numbers = #tpu.dot_dimension_numbers<[1], [0], [0], [1], [0, 0, 1, 1], [], []>} : vector<32x192xbf16>, vector<192x128xbf16>, vector<32x128xf32> -> vector<32x128xf32>
    %c0_67 = arith.constant 0 : index
    %c0_68 = arith.constant 0 : index
    %63 = vector.load %arg14[%c0_67, %c0_68] : memref<32x128xf32, #tpu.memory_space<vmem>>, vector<32x128xf32>
    tpu.vector_store %arg14[%c0_67, %c0_68], %62 {strides = array<i32>} : memref<32x128xf32, #tpu.memory_space<vmem>>, vector<32x128xf32>,
    %c0_69 = arith.constant 0 : index
    %c0_70 = arith.constant 0 : index
    %64 = vector.load %arg14[%c0_69, %c0_70] : memref<32x128xf32, #tpu.memory_space<vmem>>, vector<32x128xf32>
    %c1_71 = arith.constant 1 : index
    %c0_72 = arith.constant 0 : index
    %c0_73 = arith.constant 0 : index
    %65 = vector.load %arg5[%c1_71, %c0_72, %c0_73] : memref<5x32x96xbf16, #tpu.memory_space<vmem>>, vector<1x32x96xbf16>
    %66 = vector.shape_cast %65 : vector<1x32x96xbf16> to vector<32x96xbf16>
    %cst_74 = arith.constant dense<0.000000e+00> : vector<32x192xf32>
    %67 = tpu.matmul %66, %55, %cst_74 {dimension_numbers = #tpu.dot_dimension_numbers<[1], [0], [0], [1], [0, 0, 1, 1], [], []>} : vector<32x96xbf16>, vector<96x192xbf16>, vector<32x192xf32> -> vector<32x192xf32>
    %68 = arith.truncf %67 : vector<32x192xf32> to vector<32x192xbf16>
    %c1_75 = arith.constant 1 : index
    %c0_76 = arith.constant 0 : index
    %c0_77 = arith.constant 0 : index
    %69 = vector.load %arg6[%c1_75, %c0_76, %c0_77] : memref<5x192x128xbf16, #tpu.memory_space<vmem>>, vector<1x192x128xbf16>
    %70 = vector.shape_cast %69 : vector<1x192x128xbf16> to vector<192x128xbf16>
    %cst_78 = arith.constant dense<0.000000e+00> : vector<32x128xf32>
    %71 = tpu.matmul %68, %70, %cst_78 {dimension_numbers = #tpu.dot_dimension_numbers<[1], [0], [0], [1], [0, 0, 1, 1], [], []>} : vector<32x192xbf16>, vector<192x128xbf16>, vector<32x128xf32> -> vector<32x128xf32>
    %72 = arith.addf %64, %71 : vector<32x128xf32>
    %c0_79 = arith.constant 0 : index
    %c0_80 = arith.constant 0 : index
    %73 = vector.load %arg14[%c0_79, %c0_80] : memref<32x128xf32, #tpu.memory_space<vmem>>, vector<32x128xf32>
    tpu.vector_store %arg14[%c0_79, %c0_80], %72 {strides = array<i32>} : memref<32x128xf32, #tpu.memory_space<vmem>>, vector<32x128xf32>,
    %c0_81 = arith.constant 0 : index
    %c0_82 = arith.constant 0 : index
    %74 = vector.load %arg14[%c0_81, %c0_82] : memref<32x128xf32, #tpu.memory_space<vmem>>, vector<32x128xf32>
    %c2_83 = arith.constant 2 : index
    %c0_84 = arith.constant 0 : index
    %c0_85 = arith.constant 0 : index
    %75 = vector.load %arg5[%c2_83, %c0_84, %c0_85] : memref<5x32x96xbf16, #tpu.memory_space<vmem>>, vector<1x32x96xbf16>
    %76 = vector.shape_cast %75 : vector<1x32x96xbf16> to vector<32x96xbf16>
    %cst_86 = arith.constant dense<0.000000e+00> : vector<32x192xf32>
    %77 = tpu.matmul %76, %55, %cst_86 {dimension_numbers = #tpu.dot_dimension_numbers<[1], [0], [0], [1], [0, 0, 1, 1], [], []>} : vector<32x96xbf16>, vector<96x192xbf16>, vector<32x192xf32> -> vector<32x192xf32>
    %78 = arith.truncf %77 : vector<32x192xf32> to vector<32x192xbf16>
    %c2_87 = arith.constant 2 : index
    %c0_88 = arith.constant 0 : index
    %c0_89 = arith.constant 0 : index
    %79 = vector.load %arg6[%c2_87, %c0_88, %c0_89] : memref<5x192x128xbf16, #tpu.memory_space<vmem>>, vector<1x192x128xbf16>
    %80 = vector.shape_cast %79 : vector<1x192x128xbf16> to vector<192x128xbf16>
    %cst_90 = arith.constant dense<0.000000e+00> : vector<32x128xf32>
    %81 = tpu.matmul %78, %80, %cst_90 {dimension_numbers = #tpu.dot_dimension_numbers<[1], [0], [0], [1], [0, 0, 1, 1], [], []>} : vector<32x192xbf16>, vector<192x128xbf16>, vector<32x128xf32> -> vector<32x128xf32>
    %82 = arith.addf %74, %81 : vector<32x128xf32>
    %c0_91 = arith.constant 0 : index
    %c0_92 = arith.constant 0 : index
    %83 = vector.load %arg14[%c0_91, %c0_92] : memref<32x128xf32, #tpu.memory_space<vmem>>, vector<32x128xf32>
    tpu.vector_store %arg14[%c0_91, %c0_92], %82 {strides = array<i32>} : memref<32x128xf32, #tpu.memory_space<vmem>>, vector<32x128xf32>,
    %c0_93 = arith.constant 0 : index
    %c0_94 = arith.constant 0 : index
    %84 = vector.load %arg14[%c0_93, %c0_94] : memref<32x128xf32, #tpu.memory_space<vmem>>, vector<32x128xf32>
    %c3_95 = arith.constant 3 : index
    %c0_96 = arith.constant 0 : index
    %c0_97 = arith.constant 0 : index
    %85 = vector.load %arg5[%c3_95, %c0_96, %c0_97] : memref<5x32x96xbf16, #tpu.memory_space<vmem>>, vector<1x32x96xbf16>
    %86 = vector.shape_cast %85 : vector<1x32x96xbf16> to vector<32x96xbf16>
    %cst_98 = arith.constant dense<0.000000e+00> : vector<32x192xf32>
    %87 = tpu.matmul %86, %55, %cst_98 {dimension_numbers = #tpu.dot_dimension_numbers<[1], [0], [0], [1], [0, 0, 1, 1], [], []>} : vector<32x96xbf16>, vector<96x192xbf16>, vector<32x192xf32> -> vector<32x192xf32>
    %88 = arith.truncf %87 : vector<32x192xf32> to vector<32x192xbf16>
    %c3_99 = arith.constant 3 : index
    %c0_100 = arith.constant 0 : index
    %c0_101 = arith.constant 0 : index
    %89 = vector.load %arg6[%c3_99, %c0_100, %c0_101] : memref<5x192x128xbf16, #tpu.memory_space<vmem>>, vector<1x192x128xbf16>
    %90 = vector.shape_cast %89 : vector<1x192x128xbf16> to vector<192x128xbf16>
    %cst_102 = arith.constant dense<0.000000e+00> : vector<32x128xf32>
    %91 = tpu.matmul %88, %90, %cst_102 {dimension_numbers = #tpu.dot_dimension_numbers<[1], [0], [0], [1], [0, 0, 1, 1], [], []>} : vector<32x192xbf16>, vector<192x128xbf16>, vector<32x128xf32> -> vector<32x128xf32>
    %92 = arith.addf %84, %91 : vector<32x128xf32>
    %c0_103 = arith.constant 0 : index
    %c0_104 = arith.constant 0 : index
    %93 = vector.load %arg14[%c0_103, %c0_104] : memref<32x128xf32, #tpu.memory_space<vmem>>, vector<32x128xf32>
    tpu.vector_store %arg14[%c0_103, %c0_104], %92 {strides = array<i32>} : memref<32x128xf32, #tpu.memory_space<vmem>>, vector<32x128xf32>,
    %c0_105 = arith.constant 0 : index
    %c0_106 = arith.constant 0 : index
    %94 = vector.load %arg14[%c0_105, %c0_106] : memref<32x128xf32, #tpu.memory_space<vmem>>, vector<32x128xf32>
    %c4_107 = arith.constant 4 : index
    %c0_108 = arith.constant 0 : index
    %c0_109 = arith.constant 0 : index
    %95 = vector.load %arg5[%c4_107, %c0_108, %c0_109] : memref<5x32x96xbf16, #tpu.memory_space<vmem>>, vector<1x32x96xbf16>
    %96 = vector.shape_cast %95 : vector<1x32x96xbf16> to vector<32x96xbf16>
    %cst_110 = arith.constant dense<0.000000e+00> : vector<32x192xf32>
    %97 = tpu.matmul %96, %55, %cst_110 {dimension_numbers = #tpu.dot_dimension_numbers<[1], [0], [0], [1], [0, 0, 1, 1], [], []>} : vector<32x96xbf16>, vector<96x192xbf16>, vector<32x192xf32> -> vector<32x192xf32>
    %98 = arith.truncf %97 : vector<32x192xf32> to vector<32x192xbf16>
    %c4_111 = arith.constant 4 : index
    %c0_112 = arith.constant 0 : index
    %c0_113 = arith.constant 0 : index
    %99 = vector.load %arg6[%c4_111, %c0_112, %c0_113] : memref<5x192x128xbf16, #tpu.memory_space<vmem>>, vector<1x192x128xbf16>
    %100 = vector.shape_cast %99 : vector<1x192x128xbf16> to vector<192x128xbf16>
    %cst_114 = arith.constant dense<0.000000e+00> : vector<32x128xf32>
    %101 = tpu.matmul %98, %100, %cst_114 {dimension_numbers = #tpu.dot_dimension_numbers<[1], [0], [0], [1], [0, 0, 1, 1], [], []>} : vector<32x192xbf16>, vector<192x128xbf16>, vector<32x128xf32> -> vector<32x128xf32>
    %102 = arith.addf %94, %101 : vector<32x128xf32>
    %c0_115 = arith.constant 0 : index
    %c0_116 = arith.constant 0 : index
    %103 = vector.load %arg14[%c0_115, %c0_116] : memref<32x128xf32, #tpu.memory_space<vmem>>, vector<32x128xf32>
    tpu.vector_store %arg14[%c0_115, %c0_116], %102 {strides = array<i32>} : memref<32x128xf32, #tpu.memory_space<vmem>>, vector<32x128xf32>,
    %c0_117 = arith.constant 0 : index
    %c0_118 = arith.constant 0 : index
    %104 = vector.load %arg14[%c0_117, %c0_118] : memref<32x128xf32, #tpu.memory_space<vmem>>, vector<32x128xf32>
    %c0_119 = arith.constant 0 : index
    %c0_120 = arith.constant 0 : index
    %105 = vector.load %arg7[%c0_119, %c0_120] : memref<1x128xf32, #tpu.memory_space<vmem>>, vector<1x128xf32>
    %106 = vector.broadcast %105 : vector<1x128xf32> to vector<32x128xf32>
    %107 = arith.addf %104, %106 : vector<32x128xf32>
    %cst_121 = arith.constant 0.000000e+00 : f32
    %108 = vector.broadcast %cst_121 : f32 to vector<32x128xf32>
    %109 = arith.maximumf %107, %108 : vector<32x128xf32>
    %110 = vector.extract_strided_slice %109 {offsets = [0, 0], sizes = [8, 128], strides = [1, 1]} : vector<32x128xf32> to vector<8x128xf32>
    %111 = vector.extract_strided_slice %109 {offsets = [8, 0], sizes = [8, 128], strides = [1, 1]} : vector<32x128xf32> to vector<8x128xf32>
    %112 = vector.extract_strided_slice %109 {offsets = [16, 0], sizes = [8, 128], strides = [1, 1]} : vector<32x128xf32> to vector<8x128xf32>
    %113 = vector.extract_strided_slice %109 {offsets = [24, 0], sizes = [8, 128], strides = [1, 1]} : vector<32x128xf32> to vector<8x128xf32>
    %114 = tpu.concatenate %110, %111, %112, %113 in 1 : vector<8x128xf32>, vector<8x128xf32>, vector<8x128xf32>, vector<8x128xf32> -> vector<8x512xf32>
    %115 = arith.truncf %114 : vector<8x512xf32> to vector<8x512xbf16>
    %c0_122 = arith.constant 0 : index
    %c0_123 = arith.constant 0 : index
    %116 = vector.load %arg8[%c0_122, %c0_123] : memref<512x512xbf16, #tpu.memory_space<vmem>>, vector<512x512xbf16>
    %cst_124 = arith.constant dense<0.000000e+00> : vector<8x512xf32>
    %117 = tpu.matmul %115, %116, %cst_124 {dimension_numbers = #tpu.dot_dimension_numbers<[1], [0], [0], [1], [0, 0, 1, 1], [], []>} : vector<8x512xbf16>, vector<512x512xbf16>, vector<8x512xf32> -> vector<8x512xf32>
    %c0_125 = arith.constant 0 : index
    %c0_126 = arith.constant 0 : index
    %118 = vector.load %arg9[%c0_125, %c0_126] : memref<1x512xf32, #tpu.memory_space<vmem>>, vector<1x512xf32>
    %119 = vector.broadcast %118 : vector<1x512xf32> to vector<8x512xf32>
    %120 = arith.addf %117, %119 : vector<8x512xf32>
    %cst_127 = arith.constant 0.000000e+00 : f32
    %121 = vector.broadcast %cst_127 : f32 to vector<8x512xf32>
    %122 = arith.maximumf %120, %121 : vector<8x512xf32>
    %123 = arith.truncf %122 : vector<8x512xf32> to vector<8x512xbf16>
    %c0_128 = arith.constant 0 : index
    %c0_129 = arith.constant 0 : index
    %124 = vector.load %arg10[%c0_128, %c0_129] : memref<512x128xbf16, #tpu.memory_space<vmem>>, vector<512x128xbf16>
    %cst_130 = arith.constant dense<0.000000e+00> : vector<8x128xf32>
    %125 = tpu.matmul %123, %124, %cst_130 {dimension_numbers = #tpu.dot_dimension_numbers<[1], [0], [0], [1], [0, 0, 1, 1], [], []>} : vector<8x512xbf16>, vector<512x128xbf16>, vector<8x128xf32> -> vector<8x128xf32>
    %c0_131 = arith.constant 0 : index
    %c0_132 = arith.constant 0 : index
    %126 = vector.load %arg11[%c0_131, %c0_132] : memref<1x128xf32, #tpu.memory_space<vmem>>, vector<1x128xf32>
    %127 = vector.broadcast %126 : vector<1x128xf32> to vector<8x128xf32>
    %128 = arith.addf %125, %127 : vector<8x128xf32>
    %c0_133 = arith.constant 0 : index
    %c0_134 = arith.constant 0 : index
    %129 = vector.load %arg12[%c0_133, %c0_134] : memref<8x128xf32, #tpu.memory_space<vmem>>, vector<8x128xf32>
    tpu.vector_store %arg12[%c0_133, %c0_134], %128 {strides = array<i32>} : memref<8x128xf32, #tpu.memory_space<vmem>>, vector<8x128xf32>,
    return
  }
  func.func @transform_0(%arg0: i32) -> (i32, i32) {
    %c0_i32 = arith.constant 0 : i32
    %c0_i32_0 = arith.constant 0 : i32
    return %arg0, %c0_i32 : i32, i32
  }
  func.func @transform_1(%arg0: i32) -> (i32, i32, i32) {
    %c0_i32 = arith.constant 0 : i32
    %c0_i32_0 = arith.constant 0 : i32
    %c0_i32_1 = arith.constant 0 : i32
    %c0_i32_2 = arith.constant 0 : i32
    return %c0_i32, %c0_i32_0, %c0_i32_1 : i32, i32, i32
  }
  func.func @transform_2(%arg0: i32) -> (i32, i32, i32) {
    %c0_i32 = arith.constant 0 : i32
    %c0_i32_0 = arith.constant 0 : i32
    %c0_i32_1 = arith.constant 0 : i32
    %c0_i32_2 = arith.constant 0 : i32
    return %c0_i32, %c0_i32_0, %c0_i32_1 : i32, i32, i32
  }
  func.func @transform_3(%arg0: i32) -> (i32, i32) {
    %c0_i32 = arith.constant 0 : i32
    %c0_i32_0 = arith.constant 0 : i32
    %c0_i32_1 = arith.constant 0 : i32
    return %c0_i32, %c0_i32_0 : i32, i32
  }
  func.func @transform_4(%arg0: i32) -> (i32, i32, i32) {
    %c0_i32 = arith.constant 0 : i32
    %c0_i32_0 = arith.constant 0 : i32
    %c0_i32_1 = arith.constant 0 : i32
    %c0_i32_2 = arith.constant 0 : i32
    return %c0_i32, %c0_i32_0, %c0_i32_1 : i32, i32, i32
  }
  func.func @transform_5(%arg0: i32) -> (i32, i32, i32) {
    %c0_i32 = arith.constant 0 : i32
    %c0_i32_0 = arith.constant 0 : i32
    %c0_i32_1 = arith.constant 0 : i32
    %c0_i32_2 = arith.constant 0 : i32
    return %c0_i32, %c0_i32_0, %c0_i32_1 : i32, i32, i32
  }
  func.func @transform_6(%arg0: i32) -> (i32, i32) {
    %c0_i32 = arith.constant 0 : i32
    %c0_i32_0 = arith.constant 0 : i32
    %c0_i32_1 = arith.constant 0 : i32
    return %c0_i32, %c0_i32_0 : i32, i32
  }
  func.func @transform_7(%arg0: i32) -> (i32, i32) {
    %c0_i32 = arith.constant 0 : i32
    %c0_i32_0 = arith.constant 0 : i32
    %c0_i32_1 = arith.constant 0 : i32
    return %c0_i32, %c0_i32_0 : i32, i32
  }
  func.func @transform_8(%arg0: i32) -> (i32, i32) {
    %c0_i32 = arith.constant 0 : i32
    %c0_i32_0 = arith.constant 0 : i32
    %c0_i32_1 = arith.constant 0 : i32
    return %c0_i32, %c0_i32_0 : i32, i32
  }
  func.func @transform_9(%arg0: i32) -> (i32, i32) {
    %c0_i32 = arith.constant 0 : i32
    %c0_i32_0 = arith.constant 0 : i32
    %c0_i32_1 = arith.constant 0 : i32
    return %c0_i32, %c0_i32_0 : i32, i32
  }
  func.func @transform_10(%arg0: i32) -> (i32, i32) {
    %c0_i32 = arith.constant 0 : i32
    %c0_i32_0 = arith.constant 0 : i32
    %c0_i32_1 = arith.constant 0 : i32
    return %c0_i32, %c0_i32_0 : i32, i32
  }
  func.func @transform_11(%arg0: i32) -> (i32, i32) {
    %c0_i32 = arith.constant 0 : i32
    %c0_i32_0 = arith.constant 0 : i32
    return %arg0, %c0_i32 : i32, i32
  }
}

</mosaic_0001>

<bundles_post_ra>
// kernel: mnist_cnn_forward.1
= control target key start
LH: loop header
LB: loop body
LE: loop exit
PB: predicated region body
PF: predicated region fallthrough
CT: control target
= control target key end

     0   :  { %s8770_s0 = inlined_call_operand.vmem [shape: bf16[448,28], index: 0, kind: input, shape index: {}]   ;;  %s8771_s1 = inlined_call_operand.hbm [shape: bf16[5,96,224], index: 1, kind: input, shape index: {}]   ;;  %s8772_s2 = inlined_call_operand.vmem [shape: bf16[5,28,192], index: 2, kind: input, shape index: {}]   ;;  %s8773_s3 = inlined_call_operand.vmem [shape: f32[1,192], index: 3, kind: input, shape index: {}]   ;;  %s8774_s4 = inlined_call_operand.hbm [shape: bf16[5,32,96], index: 4, kind: input, shape index: {}]   ;;  %s8775_s5 = inlined_call_operand.hbm [shape: bf16[5,192,128], index: 5, kind: input, shape index: {}]   ;;  %s8776_s6 = inlined_call_operand.vmem [shape: f32[1,128], index: 6, kind: input, shape index: {}]   ;;  %s8777_s7 = inlined_call_operand.vmem [shape: bf16[512,512], index: 7, kind: input, shape index: {}]   ;;  %s8778_s8 = inlined_call_operand.vmem [shape: f32[1,512], index: 8, kind: input, shape index: {}]   ;;  %s8779_s9 = inlined_call_operand.hbm [shape: bf16[512,128], index: 9, kind: input, shape index: {}]   ;;  %s8780_s10 = inlined_call_operand.vmem [shape: f32[1,128], index: 10, kind: input, shape index: {}]   ;;  %s8781_s11 = inlined_call_operand.hbm [shape: f32[16,128], index: 11, kind: output, shape index: {}]  }
   0x1   :  { %8788 = sst [smem:[#allocation23_spill]] %s8771_s1 }
   0x2   :  { %8789 = sst [smem:[#allocation24_spill]] %s8774_s4 }
   0x3   :  { %16 = vsyncpa [#allocation5], 0 }
   0x4   :  { %17 = vsyncpa [#allocation8], 0 }
   0x5   :  { %18 = vsyncpa [#allocation11], 0 }
   0x6   :  { %19 = vsyncpa [#allocation6], 0 }
   0x7   :  { %21 = vsyncpa [#allocation6 + $0x1], 0  ;;  %s7078_s17 = smov 0   ;;  %s7080_s18 = smov 0  }
   0x8   :  { %s7082_s19 = smov 0   ;;  %s7084_s20 = smov 0  }
   0x9 LB: > { %8790 = sst [smem:[#allocation17_spill]] %s6996_s17  ;;  %s7099_s21 = sadd.s32 4294967295, %s7008_s20   ;;  %s7008_s20 = sphi %s7084_s20, %s8805_s20   ;;  %s7004_s19 = sphi %s7082_s19, %s8807_s19   ;;  %s7000_s18 = sphi %s7080_s18, %s8809_s18   ;;  %s6996_s17 = sphi %s7078_s17, %s8808_s17  }
   0xa   : > { %8791 = sst [smem:[#allocation18_spill]] %s7004_s19  ;;  %s4954_s22 = sadd.s32 4294967294, %s7008_s20  }
   0xb   : > { %8792 = sst [smem:[#allocation19_spill]] %s7008_s20  ;;  %s7103_s23 = sadd.s32 1, %s7008_s20  }
   0xc   : > { %8793 = sst [smem:[#allocation20_spill]] %s7103_s23  ;;  %s270_s24 = sadd.s32 1, %s7004_s19 }
   0xd   : > { %s267_s25 = ssub.s32 %s7008_s20, %s7103_s23  ;;  %p280_p0 = scmp.ne.s32.totalorder %s7004_s19, %s7000_s18 }
   0xe   : > { %p268_p1 = scmp.eq.s32.totalorder %s267_s25, 0  ;;  %p281_p2 = scmp.eq.s32.totalorder %s7099_s21, 1 }
   0xf   : > { %p286_p3 = scmp.ne.s32.totalorder %s7000_s18, %s6996_s17  ;;  %p287_p4 = scmp.eq.s32.totalorder %s4954_s22, 1 }
  0x10   : > { %s7114_s26 = scalar_select %p268_p1, %s7004_s19, %s270_s24  }
  0x11   : > { %p7116_p5 = por %p281_p2, %p280_p0  ;;  %p7120_p6 = por %p287_p4, %p286_p3 }
  0x12   : > { %8794 = sst [smem:[#allocation21_spill]] %s7114_s26  ;;  %p4955_p7 = scmp.ge.s32.totalorder %s7008_s20, 1 }
  0x13   : > { %s8796_s28 = scalar_select %p7120_p6, 1, 0 }
  0x14   : > { %p294_p8 = scmp.lt.s32.totalorder %s7008_s20, 3  ;;  %p6763_p9 = scmp.eq.s32.totalorder %s7099_s21, 0 }
  0x15   : > { %8797 = sst [smem:[#allocation22_spill]] %s8796_s28  ;;  %s7010_s14 = smov [#allocation7]  }
  0x16   : > { %p7127_p10 = pnand %p4955_p7, %p294_p8  ;;  %s8799_s4 = sld [smem:[#allocation24_spill]] }
  0x17   : > { %s327_s15 = sshll.u32 %s7010_s14, 4  ;;  %s8801_s1 = sld [smem:[#allocation23_spill]]  ;;  %s328_s15 = int_to_ptr.vmem [resolvable:$true] %s327_s15 }
  0x18   : > { %p6746_p11 = pneg %p7127_p10  ;;  %s7011_s30 = smov 64  }
  0x19   : > { %s7012_s12 = smov 4   ;;  %s7014_s26 = smov 128  }
  0x1a   : > { %p7138_p12 = pnand %p6763_p9, %p6746_p11  ;;  %s7015_s19 = smov 8  }
  0x1b   : > { %s339_s22 = sshll.u32 %s8775_s5, 4  ;;  %s7016_s24 = smov [#allocation9]   ;;  %s340_s22 = int_to_ptr.hbm [resolvable:$true] %s339_s22 }
  0x1c   : > { %s325_s13 = sshll.u32 %s8799_s4, 4  ;;  %s7013_s4 = smov [#allocation4]   ;;  %s326_s13 = int_to_ptr.hbm [resolvable:$true] %s325_s13 }
  0x1d   : > { %s305_s25 = sshll.u32 %s8801_s1, 4  ;;  %s307_s14 = sshll.u32 %s7013_s4, 4  ;;  %s306_s25 = int_to_ptr.hbm [resolvable:$true] %s305_s25  ;;  %s308_s14 = int_to_ptr.vmem [resolvable:$true] %s307_s14 }
  0x1e   : > { %6752 = dma.hbm_to_vmem [thread:$0]  (!%p7138_p12), %s326_s13, 1280, %s328_s15, [#allocation8], %s7011_s30, %s7011_s30, %s7012_s12  }
  0x1f   : > { %6749 = dma.hbm_to_vmem [thread:$0]  (!%p7138_p12), %s306_s25, 7680, %s308_s14, [#allocation5], %s7014_s26, %s7014_s26, %s7015_s19  }
  0x20   : > { %s341_s1 = sshll.u32 %s7016_s24, 4  ;;  %s362_s13 = sshll.u32 %s8779_s9, 4  ;;  %s342_s1 = int_to_ptr.vmem [resolvable:$true] %s341_s1  ;;  %s363_s13 = int_to_ptr.hbm [resolvable:$true] %s362_s13 }
  0x21   : > { %6755 = dma.hbm_to_vmem [thread:$0]  (!%p7138_p12), %s340_s22, 7680, %s342_s1, [#allocation8], %s7011_s30, %s7011_s30, %s7012_s12  }
  0x22   : > { %s7017_s4 = smov [#allocation10]   ;;  %392 = sbr.rel (%p7127_p10) target bundleno = 1766 (0x6e6), region = 64 }
  0x23   : > { %s364_s15 = sshll.u32 %s7017_s4, 4  ;;  %s365_s15 = int_to_ptr.vmem [resolvable:$true] %s364_s15 }
  0x24   : > { %6758 = dma.hbm_to_vmem [thread:$0]  (!%p7138_p12), %s363_s13, 4096, %s365_s15, [#allocation11], %s7011_s30, %s7011_s30, %s7012_s12  }
  0x27   : > { %6979 = dma.done.wait (%p6763_p9), [#allocation5], 7680  }
  0x28   : > { %6981 = vsyncadd (%p6763_p9), [#allocation5], 4294959616 }
  0x29   : > { %6983 = dma.done.wait (%p6763_p9), [#allocation8], 8960  }
  0x2a   : > { %6985 = vsyncadd (%p6763_p9), [#allocation8], 4294958336 }
  0x2b   : > { %6987 = dma.done.wait (%p6763_p9), [#allocation11], 4096  }
  0x2c   : > { %6989 = vsyncadd (%p6763_p9), [#allocation11], 4294963200  ;;  %s448_s1 = smul.u32 28, %s7099_s21  ;;  %v6418_v10 = vld [vmem:[#allocation4 + $0x4] sm:$0xf]  ;;  %vm633_vm0 = vcmask 785408  }
  0x2d   : > { %v4972_v13 = vld [vmem:[#allocation4 + $0x8] sm:$0xf0]  ;;  %v4970_v17 = vld [vmem:[#allocation4] sm:$0xf]  ;;  %v6419_v18 = vld [vmem:[#allocation4 + $0x4] sm:$0xf0] }
  0x2e   : > { %p449_p13 = scmp.lt.s32.totalorder %s448_s1, 55  ;;  %v4975_v14 = vor.u32 %v6418_v10, %v4972_v13  ;;  %v4971_v19 = vor.u32 %v6419_v18, %v4970_v17  ;;  %v6420_v20 = vld [vmem:[#allocation4 + $0x14] sm:$0xf]  ;;  %v4980_v21 = vld [vmem:[#allocation4 + $0x18] sm:$0xf0]  ;;  %vm777_vm1 = vcmask 1045504  }
  0x2f   : > { %v4983_v22 = vor.u32 %v6420_v20, %v4980_v21  ;;  %v4978_v23 = vld [vmem:[#allocation4 + $0x10] sm:$0xf]  ;;  %v6421_v24 = vld [vmem:[#allocation4 + $0x14] sm:$0xf0]  ;;  %v6422_v26 = vld [vmem:[#allocation4 + $0x24] sm:$0xf] }
  0x30   : > { %s8811_s1 = smov (!%p449_p13, %s448_s1), 55  ;;  %v4979_v25 = vor.u32 %v6421_v24, %v4978_v23  ;;  %v4988_v27 = vld [vmem:[#allocation4 + $0x28] sm:$0xf0]  ;;  %v4986_v29 = vld [vmem:[#allocation4 + $0x20] sm:$0xf]  ;;  %vm758_vm2 = vcmask 228352  }
  0x31   : > { %s4967_s17 = sshll.u32 %s8811_s1, 2  ;;  %v4991_v28 = vor.u32 %v6422_v26, %v4988_v27  ;;  %v6423_v30 = vld [vmem:[#allocation4 + $0x24] sm:$0xf0]  ;;  %v6424_v32 = vld [vmem:[#allocation4 + $0x34] sm:$0xf]  ;;  %vm863_vm3 = vcmask 523264  }
  0x32   : > { %s7177_s23 = scalar_lea.vmem %s8770_s0, %s4967_s17  ;;  %v4987_v31 = vor.u32 %v6423_v30, %v4986_v29  ;;  %v4996_v33 = vld [vmem:[#allocation4 + $0x38] sm:$0xf0]  ;;  %v4994_v35 = vld [vmem:[#allocation4 + $0x30] sm:$0xf]  ;;  %v6425_v36 = vld [vmem:[#allocation4 + $0x34] sm:$0xf0] }
  0x33   : > { %v7180_v0 = vld [vmem:[%s7177_s23 + $0x38] sm:$0xff]  ;;  %v7183_v1 = vld [vmem:[%s7177_s23 + $0x68] sm:$0xff]  ;;  %v7188_v2 = vld [vmem:[%s7177_s23 + $0x30] sm:$0xff]  ;;  %v4999_v34 = vor.u32 %v6424_v32, %v4996_v33  ;;  %v4995_v37 = vor.u32 %v6425_v36, %v4994_v35  ;;  %s445_s12 = sand.u32 1, %s7000_s18   ;;  %s6401_s14 = sshll.u32 %s7099_s21, 3 }
  0x34   : > { %652 = vmatpush.bf16.msra.mxu0 %v7180_v0  ;;  %693 = vmatpush.bf16.msra.mxu1 %v7183_v1  ;;  %v7191_v3 = vld [vmem:[%s7177_s23 + $0x60] sm:$0xff]  ;;  %v7196_v4 = vld [vmem:[%s7177_s23 + $0x28] sm:$0xff]  ;;  %v7199_v5 = vld [vmem:[%s7177_s23 + $0x58] sm:$0xff]  ;;  %s4966_s22 = sshll.u32 %s445_s12, 3  ;;  %s4849_s4 = scalar_lea.hbm %s8781_s11, %s6401_s14 }
  0x35   : > { %v7204_v6 = vld [vmem:[%s7177_s23 + $0x20] sm:$0xff]  ;;  %v7207_v7 = vld [vmem:[%s7177_s23 + $0x50] sm:$0xff]  ;;  %v7212_v8 = vld [vmem:[%s7177_s23 + $0x18] sm:$0xff]  ;;  %s447_s15 = scalar_lea.vmem [#allocation12], %s4966_s22  ;;  %s4853_s17 = sshll.u32 %s4849_s4, 4  ;;  %s4854_s17 = int_to_ptr.hbm [resolvable:$true] %s4853_s17 }
  0x36   : > { %v7215_v9 = vld [vmem:[%s7177_s23 + $0x48] sm:$0xff]  ;;  %v7220_v11 = vld [vmem:[%s7177_s23 + $0x10] sm:$0xff]  ;;  %v7223_v12 = vld [vmem:[%s7177_s23 + $0x40] sm:$0xff]  ;;  %s4851_s1 = sshll.u32 %s447_s15, 4  ;;  %s4839_s19 = scalar_lea.sflag [#allocation6], %s445_s12  ;;  %s4852_s1 = int_to_ptr.vmem [resolvable:$true] %s4851_s1 }
  0x37   : > { %v7228_v15 = vld [vmem:[%s7177_s23 + $0x8] sm:$0xff]  ;;  %v7233_v16 = vld [vmem:[%s7177_s23] sm:$0xff]  ;;  %v6428_v44 = vld [vmem:[#allocation4 + $0x54] sm:$0xf]  ;;  %s6948_s20 = sshra.s32 %s4854_s17, 4  ;;  %s6954_s28 = scalar_lea.hbm %s8781_s11, 16  ;;  %s6949_s20 = int_to_ptr.hbm [resolvable:$true] %s6948_s20 }
  0x38   : > { %653 = vmatpush.bf16.msra.mxu0 %v7188_v2  ;;  %694 = vmatpush.bf16.msra.mxu1 %v7191_v3  ;;  %v6426_v38 = vld [vmem:[#allocation4 + $0x44] sm:$0xf]  ;;  %v5004_v39 = vld [vmem:[#allocation4 + $0x48] sm:$0xf0]  ;;  %v5002_v41 = vld [vmem:[#allocation4 + $0x40] sm:$0xf]  ;;  %p6955_p3 = scmp.lt.s32.totalorder %s6949_s20, %s8781_s11 }
  0x39   : > { %v5007_v40 = vor.u32 %v6426_v38, %v5004_v39  ;;  %v6427_v42 = vld [vmem:[#allocation4 + $0x44] sm:$0xf0]  ;;  %v5012_v45 = vld [vmem:[#allocation4 + $0x58] sm:$0xf0]  ;;  %v5010_v47 = vld [vmem:[#allocation4 + $0x50] sm:$0xf] }
  0x3a   : > { %v5003_v43 = vor.u32 %v6427_v42, %v5002_v41  ;;  %v5015_v46 = vor.u32 %v6428_v44, %v5012_v45  ;;  %v6429_v48 = vld [vmem:[#allocation4 + $0x54] sm:$0xf0]  ;;  %v5088_v50 = vld [vmem:[%s8772_s2 + $0x10] sm:$0xf]  ;;  %v6432_v53 = vld [vmem:[%s8772_s2 + $0x14] sm:$0xf] }
  0x3b   : > { %v5011_v49 = vor.u32 %v6429_v48, %v5010_v47  ;;  %v6433_v51 = vld [vmem:[%s8772_s2 + $0x14] sm:$0x30]  ;;  %v5090_v54 = vld [vmem:[%s8772_s2 + $0x18] sm:$0x30]  ;;  %v5080_v58 = vld [vmem:[%s8772_s2] sm:$0xf] }
  0x3c   : > { %654 = vmatpush.bf16.msra.mxu0 %v7196_v4  ;;  %695 = vmatpush.bf16.msra.mxu1 %v7199_v5  ;;  %v5089_v52 = vor.u32 %v6433_v51, %v5088_v50  ;;  %v5093_v55 = vor.u32 %v6432_v53, %v5090_v54  ;;  %v6431_v59 = vld [vmem:[%s8772_s2 + $0x4] sm:$0xf0]  ;;  %v6430_v60 = vld [vmem:[%s8772_s2 + $0x4] sm:$0xf]  ;;  %v5082_v62 = vld [vmem:[%s8772_s2 + $0x8] sm:$0xf0] }
  0x3d   : > { %v5081_v61 = vor.u32 %v6431_v59, %v5080_v58  ;;  %v5085_v63 = vor.u32 %v6430_v60, %v5082_v62  ;;  %v6434_v58 = vld [vmem:[#allocation4 + $0x64] sm:$0xf]  ;;  %v5110_v59 = vld [vmem:[#allocation4 + $0x68] sm:$0xf0]  ;;  %v5116_v62 = vld [vmem:[#allocation4 + $0x70] sm:$0xf] }
  0x3e   : > { %v779_v56 = vsel %vm777_vm1, %v5089_v52, 0  ;;  %v782_v57 = vsel %vm777_vm1, %v5093_v55, 0  ;;  %s6950_s21 = scalar_lea.hbm %s6949_s20, 8 }
  0x3f   : > { %790 = vmatpush.bf16.msra.mxu2 %v779_v56  ;;  %829 = vmatpush.bf16.msra.mxu3 %v782_v57  ;;  %v5108_v56 = vld [vmem:[#allocation4 + $0x60] sm:$0xf]  ;;  %v6435_v57 = vld [vmem:[#allocation4 + $0x64] sm:$0xf0]  ;;  %p6951_p0 = scmp.ne.s32.totalorder %s6949_s20, %s6950_s21  ;;  %p6956_p4 = scmp.lt.s32.totalorder %s6954_s28, %s6950_s21 }
  0x40   : > { %655 = vmatpush.bf16.msra.mxu0 %v7204_v6  ;;  %696 = vmatpush.bf16.msra.mxu1 %v7207_v7  ;;  %v5109_v60 = vor.u32 %v6435_v57, %v5108_v56  ;;  %v5174_v56 = vld [vmem:[%s8772_s2 + $0x30] sm:$0xf]  ;;  %v6449_v57 = vld [vmem:[%s8772_s2 + $0x34] sm:$0x30] }
  0x41   : > { %p6952_p1 = pnand %p6951_p0, %p7116_p5  ;;  %p6957_p7 = por %p6956_p4, %p6955_p3 }
  0x43   : > { %791 = vmatpush.bf16.msra.mxu2 %v5081_v61  ;;  %830 = vmatpush.bf16.msra.mxu3 %v5085_v63  ;;  %v5113_v61 = vor.u32 %v6434_v58, %v5110_v59  ;;  %v6437_v63 = vld [vmem:[#allocation4 + $0x74] sm:$0xf0]  ;;  %v5175_v58 = vor.u32 %v6449_v57, %v5174_v56  ;;  %v6448_v59 = vld [vmem:[%s8772_s2 + $0x34] sm:$0xf]  ;;  %v5226_v56 = vld [vmem:[#allocation4 + $0x100] sm:$0xf]  ;;  %p6953_p2 = pneg %p6952_p1 }
  0x44   : > { %656 = vmatpush.bf16.msra.mxu0 %v7212_v8  ;;  %697 = vmatpush.bf16.msra.mxu1 %v7215_v9  ;;  %v6459_v57 = vld [vmem:[#allocation4 + $0x104] sm:$0xf0] }
  0x45   : > { %p6958_p8 = pnand %p6957_p7, %p6953_p2 }
  0x47   : > { %996 = vmatpush.bf16.msrb.mxu2 %v7180_v0  ;;  %1037 = vmatpush.bf16.msrb.mxu3 %v7183_v1 }
  0x48   : > { %657 = vmatpush.bf16.msra.mxu0 %v7220_v11  ;;  %698 = vmatpush.bf16.msra.mxu1 %v7223_v12 }
  0x4b   : > { %5072 = vmatmul.msk.bf16.vlgmr.msra.gmra.mxu1 %vm633_vm0, %v4975_v14  ;;  %997 = vmatpush.bf16.msrb.mxu2 %v7188_v2 }
  0x4c   : > { %658 = vmatpush.bf16.msra.mxu0 %v7228_v15  ;;  %1038 = vmatpush.bf16.msrb.mxu3 %v7191_v3 }
  0x4f   : > { %998 = vmatpush.bf16.msrb.mxu2 %v7196_v4 }
  0x50   : > { %659 = vmatpush.bf16.msra.mxu0 %v7233_v16  ;;  %1039 = vmatpush.bf16.msrb.mxu3 %v7199_v5 }
  0x53   : > { %660 = vmatmul.bf16.vlgmr.msra.gmra.mxu0 %v4971_v19  ;;  %999 = vmatpush.bf16.msrb.mxu2 %v7204_v6 }
  0x54   : > { %1040 = vmatpush.bf16.msrb.mxu3 %v7207_v7 }
  0x57   : > { %1000 = vmatpush.bf16.msrb.mxu2 %v7212_v8 }
  0x58   : > { %1041 = vmatpush.bf16.msrb.mxu3 %v7215_v9 }
  0x5b   : > { %5073 = vmatmul.msk.bf16.gmra.mxu1 %vm633_vm0, %v4983_v22  ;;  %1001 = vmatpush.bf16.msrb.mxu2 %v7220_v11 }
  0x5c   : > { %1042 = vmatpush.bf16.msrb.mxu3 %v7223_v12 }
  0x5f   : > { %1002 = vmatpush.bf16.msrb.mxu2 %v7228_v15 }
  0x63   : > { %665 = vmatmul.bf16.gmra.mxu0 %v4979_v25  ;;  %1003 = vmatpush.bf16.msrb.mxu2 %v7233_v16 }
  0x6b   : > { %5074 = vmatmul.msk.bf16.gmra.mxu1 %vm633_vm0, %v4991_v28 }
  0x73   : > { %670 = vmatmul.bf16.gmra.mxu0 %v4987_v31 }
  0x7b   : > { %5075 = vmatmul.msk.bf16.gmra.mxu1 %vm633_vm0, %v4999_v34 }
  0x83   : > { %675 = vmatmul.bf16.gmra.mxu0 %v4995_v37 }
  0x8b   : > { %5076 = vmatmul.msk.bf16.gmra.mxu1 %vm633_vm0, %v5007_v40 }
  0x93   : > { %680 = vmatmul.bf16.gmra.mxu0 %v5003_v43 }
  0x9b   : > { %5077 = vmatmul.msk.bf16.gmra.mxu1 %vm633_vm0, %v5015_v46 }
  0xa3   : > { %685 = vmatmul.bf16.gmra.mxu0 %v5011_v49 }
  0xc8   : > { %v700_v10 = vpop.f32.mrf.mxu1 }
  0xd0   : > { %v661_v13 = vpop.f32.mrf.mxu0  ;;  %v702_v14 = vpop.f32.mrf.mxu1 }
  0xd1   : > { %v701_v19 = vadd.f32 %v700_v10, %v661_v13  ;;  %v6436_v10 = vld [vmem:[#allocation4 + $0x74] sm:$0xf]  ;;  %v5118_v13 = vld [vmem:[#allocation4 + $0x78] sm:$0xf0] }
  0xd8   : > { %v663_v17 = vpop.f32.mrf.mxu0  ;;  %v705_v18 = vpop.f32.mrf.mxu1 }
  0xd9   : > { %v703_v20 = vadd.f32 %v702_v14, %v663_v17  ;;  %v5117_v14 = vor.u32 %v6437_v63, %v5116_v62  ;;  %v5121_v17 = vor.u32 %v6436_v10, %v5118_v13  ;;  %v1122_v62 = vsel %vm777_vm1, %v5175_v58, 0  ;;  %v5194_v63 = vld [vmem:[#allocation4 + $0xc0] sm:$0xf]  ;;  %v6451_v13 = vld [vmem:[#allocation4 + $0xc4] sm:$0xf0] }
  0xda   : > { %1133 = vmatpush.bf16.msrb.mxu1 %v1122_v62  ;;  %v6458_v58 = vld [vmem:[#allocation4 + $0x104] sm:$0xf] }
  0xdb   : > { %v730_v21 = vpack.c.bf16 %v703_v20, %v701_v19  ;;  %v6439_v19 = vld [vmem:[#allocation4 + $0x84] sm:$0xf0]  ;;  %v6438_v20 = vld [vmem:[#allocation4 + $0x84] sm:$0xf] }
  0xdd   : > { %5094 = vmatmul.msk.bf16.vlgmr.msra.gmra.mxu2 %vm758_vm2, %v730_v21  ;;  %5100 = vmatmul.msk.bf16.vlgmr.msra.gmra.mxu3 %vm758_vm2, %v730_v21  ;;  %v5126_v21 = vld [vmem:[#allocation4 + $0x88] sm:$0xf0] }
  0xde   : > { %1362 = vmatpush.bf16.msra.mxu2 %v7180_v0  ;;  %1403 = vmatpush.bf16.msra.mxu3 %v7183_v1 }
  0xe0   : > { %v666_v22 = vpop.f32.mrf.mxu0  ;;  %v707_v23 = vpop.f32.mrf.mxu1 }
  0xe1   : > { %v706_v26 = vadd.f32 %v705_v18, %v666_v22  ;;  %v5124_v18 = vld [vmem:[#allocation4 + $0x80] sm:$0xf] }
  0xe2   : > { %1363 = vmatpush.bf16.msra.mxu2 %v7188_v2  ;;  %1404 = vmatpush.bf16.msra.mxu3 %v7191_v3  ;;  %v5125_v22 = vor.u32 %v6439_v19, %v5124_v18 }
  0xe6   : > { %1364 = vmatpush.bf16.msra.mxu2 %v7196_v4  ;;  %1405 = vmatpush.bf16.msra.mxu3 %v7199_v5 }
  0xe8   : > { %v668_v24 = vpop.f32.mrf.mxu0  ;;  %v710_v25 = vpop.f32.mrf.mxu1 }
  0xe9   : > { %v708_v27 = vadd.f32 %v707_v23, %v668_v24  ;;  %v5129_v23 = vor.u32 %v6438_v20, %v5126_v21  ;;  %v5195_v20 = vor.u32 %v6451_v13, %v5194_v63 }
  0xea   : > { %1365 = vmatpush.bf16.msra.mxu2 %v7204_v6  ;;  %1406 = vmatpush.bf16.msra.mxu3 %v7207_v7 }
  0xeb   : > { %v731_v28 = vpack.c.bf16 %v708_v27, %v706_v26  ;;  %v5132_v26 = vld [vmem:[#allocation4 + $0x90] sm:$0xf]  ;;  %v6441_v27 = vld [vmem:[#allocation4 + $0x94] sm:$0xf0] }
  0xed   : > { %5095 = vmatmul.msk.bf16.gmra.mxu2 %vm758_vm2, %v731_v28  ;;  %5101 = vmatmul.msk.bf16.gmra.mxu3 %vm758_vm2, %v731_v28  ;;  %v6440_v28 = vld [vmem:[#allocation4 + $0x94] sm:$0xf] }
  0xee   : > { %1366 = vmatpush.bf16.msra.mxu2 %v7212_v8  ;;  %1407 = vmatpush.bf16.msra.mxu3 %v7215_v9 }
  0xf0   : > { %v671_v29 = vpop.f32.mrf.mxu0  ;;  %v712_v30 = vpop.f32.mrf.mxu1 }
  0xf1   : > { %v711_v33 = vadd.f32 %v710_v25, %v671_v29  ;;  %v5134_v29 = vld [vmem:[#allocation4 + $0x98] sm:$0xf0] }
  0xf2   : > { %1367 = vmatpush.bf16.msra.mxu2 %v7220_v11  ;;  %1408 = vmatpush.bf16.msra.mxu3 %v7223_v12 }
  0xf6   : > { %1368 = vmatpush.bf16.msra.mxu2 %v7228_v15 }
  0xf8   : > { %v673_v31 = vpop.f32.mrf.mxu0  ;;  %v715_v32 = vpop.f32.mrf.mxu1 }
  0xf9   : > { %v713_v34 = vadd.f32 %v712_v30, %v673_v31 }
  0xfa   : > { %1369 = vmatpush.bf16.msra.mxu2 %v7233_v16 }
  0xfb   : > { %v732_v35 = vpack.c.bf16 %v713_v34, %v711_v33  ;;  %v5137_v33 = vor.u32 %v6440_v28, %v5134_v29  ;;  %v5204_v28 = vld [vmem:[#allocation4 + $0xd8] sm:$0xf0] }
  0xfd   : > { %5096 = vmatmul.msk.bf16.gmra.mxu2 %vm758_vm2, %v732_v35  ;;  %5102 = vmatmul.msk.bf16.gmra.mxu3 %vm758_vm2, %v732_v35 }
 0x100   : > { %v676_v36 = vpop.f32.mrf.mxu0  ;;  %v717_v37 = vpop.f32.mrf.mxu1 }
 0x101   : > { %v716_v39 = vadd.f32 %v715_v32, %v676_v36  ;;  %v5133_v32 = vor.u32 %v6441_v27, %v5132_v26  ;;  %v5140_v36 = vld [vmem:[#allocation4 + $0xa0] sm:$0xf]  ;;  %v6453_v26 = vld [vmem:[#allocation4 + $0xd4] sm:$0xf0]  ;;  %v6452_v27 = vld [vmem:[#allocation4 + $0xd4] sm:$0xf] }
 0x108   : > { %v678_v38 = vpop.f32.mrf.mxu0  ;;  %v720_v41 = vpop.f32.mrf.mxu1 }
 0x109   : > { %v718_v40 = vadd.f32 %v717_v37, %v678_v38  ;;  %v6443_v37 = vld [vmem:[#allocation4 + $0xa4] sm:$0xf0]  ;;  %v6442_v38 = vld [vmem:[#allocation4 + $0xa4] sm:$0xf] }
 0x10b   : > { %v733_v42 = vpack.c.bf16 %v718_v40, %v716_v39  ;;  %v5142_v39 = vld [vmem:[#allocation4 + $0xa8] sm:$0xf0] }
 0x10d   : > { %5097 = vmatmul.msk.bf16.gmra.mxu2 %vm758_vm2, %v733_v42  ;;  %5103 = vmatmul.msk.bf16.gmra.mxu3 %vm758_vm2, %v733_v42  ;;  %v5141_v42 = vor.u32 %v6443_v37, %v5140_v36  ;;  %v6455_v37 = vld [vmem:[#allocation4 + $0xe4] sm:$0xf0] }
 0x110   : > { %v681_v43 = vpop.f32.mrf.mxu0  ;;  %v722_v44 = vpop.f32.mrf.mxu1 }
 0x111   : > { %v721_v46 = vadd.f32 %v720_v41, %v681_v43  ;;  %v5145_v43 = vor.u32 %v6442_v38, %v5142_v39  ;;  %v6454_v38 = vld [vmem:[#allocation4 + $0xe4] sm:$0xf] }
 0x118   : > { %v683_v45 = vpop.f32.mrf.mxu0  ;;  %v725_v49 = vpop.f32.mrf.mxu1 }
 0x119   : > { %v723_v47 = vadd.f32 %v722_v44, %v683_v45 }
 0x11b   : > { %v734_v48 = vpack.c.bf16 %v723_v47, %v721_v46  ;;  %v5148_v46 = vld [vmem:[#allocation4 + $0xb0] sm:$0xf]  ;;  %v6445_v47 = vld [vmem:[#allocation4 + $0xb4] sm:$0xf0] }
 0x11d   : > { %5098 = vmatmul.msk.bf16.gmra.mxu2 %vm758_vm2, %v734_v48  ;;  %5104 = vmatmul.msk.bf16.gmra.mxu3 %vm758_vm2, %v734_v48  ;;  %v6444_v48 = vld [vmem:[#allocation4 + $0xb4] sm:$0xf] }
 0x120   : > { %v686_v50 = vpop.f32.mrf.mxu0  ;;  %v727_v51 = vpop.f32.mrf.mxu1 }
 0x121   : > { %v726_v53 = vadd.f32 %v725_v49, %v686_v50  ;;  %v5150_v49 = vld [vmem:[#allocation4 + $0xb8] sm:$0xf0] }
 0x128   : > { %v688_v52 = vpop.f32.mrf.mxu0 }
 0x129   : > { %v728_v54 = vadd.f32 %v727_v51, %v688_v52  ;;  %v5149_v52 = vor.u32 %v6445_v47, %v5148_v46  ;;  %v5220_v46 = vld [vmem:[#allocation4 + $0xf8] sm:$0xf0] }
 0x12b   : > { %v735_v55 = vpack.c.bf16 %v728_v54, %v726_v53  ;;  %v5153_v53 = vor.u32 %v6444_v48, %v5150_v49 }
 0x12d   : > { %5099 = vmatmul.msk.bf16.gmra.mxu2 %vm758_vm2, %v735_v55  ;;  %5105 = vmatmul.msk.bf16.gmra.mxu3 %vm758_vm2, %v735_v55 }
 0x13d   : > { %1004 = vmatmul.bf16.vlgmr.msrb.gmra.mxu2 %v5109_v60  ;;  %5154 = vmatmul.msk.bf16.vlgmr.msrb.gmra.mxu3 %vm633_vm0, %v5113_v61  ;;  %v5176_v60 = vld [vmem:[%s8772_s2 + $0x38] sm:$0x30] }
 0x13e   : > { %1728 = vmatpush.bf16.msrb.mxu2 %v7180_v0  ;;  %1769 = vmatpush.bf16.msrb.mxu3 %v7183_v1  ;;  %v5179_v61 = vor.u32 %v6448_v59, %v5176_v60  ;;  %v5228_v59 = vld [vmem:[#allocation4 + $0x108] sm:$0xf0] }
 0x13f   : > { %v5231_v13 = vor.u32 %v6458_v58, %v5228_v59  ;;  %v6463_v58 = vld [vmem:[%s8772_s2 + $0x44] sm:$0xf0]  ;;  %v6462_v59 = vld [vmem:[%s8772_s2 + $0x44] sm:$0xf] }
 0x140   : > { %v1125_v10 = vsel %vm777_vm1, %v5179_v61, 0 }
 0x141   : > { %1172 = vmatpush.bf16.msrb.mxu0 %v1125_v10  ;;  %v5227_v10 = vor.u32 %v6459_v57, %v5226_v56  ;;  %v5252_v57 = vld [vmem:[%s8772_s2 + $0x40] sm:$0xf] }
 0x142   : > { %1729 = vmatpush.bf16.msrb.mxu2 %v7188_v2  ;;  %1770 = vmatpush.bf16.msrb.mxu3 %v7191_v3 }
 0x146   : > { %1730 = vmatpush.bf16.msrb.mxu2 %v7196_v4  ;;  %1771 = vmatpush.bf16.msrb.mxu3 %v7199_v5 }
 0x14a   : > { %1731 = vmatpush.bf16.msrb.mxu2 %v7204_v6  ;;  %1772 = vmatpush.bf16.msrb.mxu3 %v7207_v7 }
 0x14d   : > { %1009 = vmatmul.bf16.gmra.mxu2 %v5117_v14  ;;  %5155 = vmatmul.msk.bf16.gmra.mxu3 %vm633_vm0, %v5121_v17  ;;  %v6450_v14 = vld [vmem:[#allocation4 + $0xc4] sm:$0xf]  ;;  %v5196_v17 = vld [vmem:[#allocation4 + $0xc8] sm:$0xf0] }
 0x14e   : > { %1732 = vmatpush.bf16.msrb.mxu2 %v7212_v8  ;;  %1773 = vmatpush.bf16.msrb.mxu3 %v7215_v9  ;;  %v5199_v21 = vor.u32 %v6450_v14, %v5196_v17 }
 0x152   : > { %1733 = vmatpush.bf16.msrb.mxu2 %v7220_v11  ;;  %1774 = vmatpush.bf16.msrb.mxu3 %v7223_v12 }
 0x156   : > { %1734 = vmatpush.bf16.msrb.mxu2 %v7228_v15 }
 0x15a   : > { %1735 = vmatpush.bf16.msrb.mxu2 %v7233_v16 }
 0x15d   : > { %1014 = vmatmul.bf16.gmra.mxu2 %v5125_v22  ;;  %5156 = vmatmul.msk.bf16.gmra.mxu3 %vm633_vm0, %v5129_v23 }
 0x160   : > { %v7324_v24 = vpop.f32.mrf.mxu2  ;;  %v832_v25 = vpop.f32.mrf.mxu3 }
 0x161   : > { %864 = vst.msk [vmem:[#allocation2 + $0x8] sm:$0xff] %vm863_vm3, %v832_v25  ;;  %v5202_v25 = vld [vmem:[#allocation4 + $0xd0] sm:$0xf] }
 0x168   : > { %v7327_v30 = vpop.f32.mrf.mxu2  ;;  %v834_v31 = vpop.f32.mrf.mxu3 }
 0x169   : > { %866 = vst.msk [vmem:[#allocation2 + $0x18] sm:$0xff] %vm863_vm3, %v834_v31 }
 0x16d   : > { %1019 = vmatmul.bf16.gmra.mxu2 %v5133_v32  ;;  %5157 = vmatmul.msk.bf16.gmra.mxu3 %vm633_vm0, %v5137_v33  ;;  %v5207_v32 = vor.u32 %v6452_v27, %v5204_v28 }
 0x170   : > { %v7331_v34 = vpop.f32.mrf.mxu2  ;;  %v837_v35 = vpop.f32.mrf.mxu3 }
 0x171   : > { %868 = vst.msk [vmem:[#allocation2 + $0x28] sm:$0xff] %vm863_vm3, %v837_v35 }
 0x178   : > { %v7334_v40 = vpop.f32.mrf.mxu2  ;;  %v839_v41 = vpop.f32.mrf.mxu3 }
 0x179   : > { %870 = vst.msk [vmem:[#allocation2 + $0x38] sm:$0xff] %vm863_vm3, %v839_v41 }
 0x17d   : > { %1024 = vmatmul.bf16.gmra.mxu2 %v5141_v42  ;;  %5158 = vmatmul.msk.bf16.gmra.mxu3 %vm633_vm0, %v5145_v43  ;;  %v5218_v42 = vld [vmem:[#allocation4 + $0xf0] sm:$0xf]  ;;  %v6457_v43 = vld [vmem:[#allocation4 + $0xf4] sm:$0xf0] }
 0x180   : > { %v7338_v44 = vpop.f32.mrf.mxu2  ;;  %v842_v45 = vpop.f32.mrf.mxu3 }
 0x181   : > { %872 = vst.msk [vmem:[#allocation2 + $0x48] sm:$0xff] %vm863_vm3, %v842_v45  ;;  %v6456_v45 = vld [vmem:[#allocation4 + $0xf4] sm:$0xf] }
 0x188   : > { %v7341_v50 = vpop.f32.mrf.mxu2  ;;  %v844_v51 = vpop.f32.mrf.mxu3 }
 0x189   : > { %874 = vst.msk [vmem:[#allocation2 + $0x58] sm:$0xff] %vm863_vm3, %v844_v51  ;;  %v5219_v51 = vor.u32 %v6457_v43, %v5218_v42 }
 0x18d   : > { %1029 = vmatmul.bf16.gmra.mxu2 %v5149_v52  ;;  %5159 = vmatmul.msk.bf16.gmra.mxu3 %vm633_vm0, %v5153_v53  ;;  %v5223_v52 = vor.u32 %v6456_v45, %v5220_v46 }
 0x190   : > { %v7345_v54 = vpop.f32.mrf.mxu2  ;;  %v847_v55 = vpop.f32.mrf.mxu3 }
 0x191   : > { %876 = vst.msk [vmem:[#allocation2 + $0x68] sm:$0xff] %vm863_vm3, %v847_v55 }
 0x198   : > { %v7362_v18 = vpop.f32.mrf.mxu2  ;;  %v849_v19 = vpop.f32.mrf.mxu3 }
 0x199   : > { %878 = vst.msk [vmem:[#allocation2 + $0x78] sm:$0xff] %vm863_vm3, %v849_v19 }
 0x19d   : > { %1370 = vmatmul.bf16.vlgmr.msra.gmra.mxu2 %v5195_v20  ;;  %5240 = vmatmul.msk.bf16.vlgmr.msra.gmra.mxu3 %vm633_vm0, %v5199_v21  ;;  %v5234_v20 = vld [vmem:[#allocation4 + $0x110] sm:$0xf]  ;;  %v6461_v21 = vld [vmem:[#allocation4 + $0x114] sm:$0xf0] }
 0x19e   : > { %2094 = vmatpush.bf16.msra.mxu2 %v7180_v0  ;;  %2135 = vmatpush.bf16.msra.mxu3 %v7183_v1  ;;  %v5166_v0 = vld [vmem:[%s8772_s2 + $0x20] sm:$0xf]  ;;  %v6447_v1 = vld [vmem:[%s8772_s2 + $0x24] sm:$0xf0] }
 0x19f   : > { %v5167_v31 = vor.u32 %v6447_v1, %v5166_v0  ;;  %v5235_v1 = vor.u32 %v6461_v21, %v5234_v20  ;;  %v5296_v21 = vld [vmem:[#allocation4 + $0x140] sm:$0xf] }
 0x1a0   : > { %v7368_v22 = vpop.f32.mrf.mxu2  ;;  %v852_v23 = vpop.f32.mrf.mxu3 }
 0x1a1   : > { %880 = vst.msk [vmem:[#allocation2 + $0x88] sm:$0xff] %vm863_vm3, %v852_v23  ;;  %1134 = vmatpush.bf16.msrb.mxu1 %v5167_v31  ;;  %v6460_v23 = vld [vmem:[#allocation4 + $0x114] sm:$0xf] }
 0x1a2   : > { %2095 = vmatpush.bf16.msra.mxu2 %v7188_v2  ;;  %2136 = vmatpush.bf16.msra.mxu3 %v7191_v3  ;;  %v6446_v2 = vld [vmem:[%s8772_s2 + $0x24] sm:$0xf] }
 0x1a6   : > { %2096 = vmatpush.bf16.msra.mxu2 %v7196_v4  ;;  %2137 = vmatpush.bf16.msra.mxu3 %v7199_v5  ;;  %v5168_v4 = vld [vmem:[%s8772_s2 + $0x28] sm:$0xf0]  ;;  %v5203_v5 = vor.u32 %v6453_v26, %v5202_v25  ;;  %v5236_v25 = vld [vmem:[#allocation4 + $0x118] sm:$0xf0] }
 0x1a7   : > { %v5171_v33 = vor.u32 %v6446_v2, %v5168_v4  ;;  %v5239_v2 = vor.u32 %v6460_v23, %v5236_v25  ;;  %v6471_v23 = vld [vmem:[#allocation4 + $0x144] sm:$0xf0]  ;;  %v6470_v25 = vld [vmem:[#allocation4 + $0x144] sm:$0xf] }
 0x1a8   : > { %v7384_v3 = vpop.f32.mrf.mxu2  ;;  %v854_v29 = vpop.f32.mrf.mxu3 }
 0x1a9   : > { %882 = vst.msk [vmem:[#allocation2 + $0x98] sm:$0xff] %vm863_vm3, %v854_v29  ;;  %1173 = vmatpush.bf16.msrb.mxu0 %v5171_v33  ;;  %v6464_v33 = vld [vmem:[%s8772_s2 + $0x54] sm:$0xf] }
 0x1aa   : > { %2097 = vmatpush.bf16.msra.mxu2 %v7204_v6  ;;  %2138 = vmatpush.bf16.msra.mxu3 %v7207_v7  ;;  %v5210_v6 = vld [vmem:[#allocation4 + $0xe0] sm:$0xf]  ;;  %v5212_v7 = vld [vmem:[#allocation4 + $0xe8] sm:$0xf0] }
 0x1ab   : > { %v5215_v41 = vor.u32 %v6454_v38, %v5212_v7 }
 0x1ad   : > { %1375 = vmatmul.bf16.gmra.mxu2 %v5203_v5  ;;  %5241 = vmatmul.msk.bf16.gmra.mxu3 %vm633_vm0, %v5207_v32  ;;  %v5260_v5 = vld [vmem:[%s8772_s2 + $0x50] sm:$0xf]  ;;  %v6465_v32 = vld [vmem:[%s8772_s2 + $0x54] sm:$0x30] }
 0x1ae   : > { %2098 = vmatpush.bf16.msra.mxu2 %v7212_v8  ;;  %2139 = vmatpush.bf16.msra.mxu3 %v7215_v9  ;;  %v5211_v9 = vor.u32 %v6455_v37, %v5210_v6  ;;  %v5262_v6 = vld [vmem:[%s8772_s2 + $0x58] sm:$0x30] }
 0x1af   : > { %v5265_v37 = vor.u32 %v6464_v33, %v5262_v6  ;;  %v6473_v33 = vld [vmem:[#allocation4 + $0x154] sm:$0xf0]  ;;  %v5306_v6 = vld [vmem:[#allocation4 + $0x158] sm:$0xf0] }
 0x1b0   : > { %v7395_v35 = vpop.f32.mrf.mxu2  ;;  %v857_v36 = vpop.f32.mrf.mxu3 }
 0x1b1   : > { %884 = vst.msk [vmem:[#allocation2 + $0xa8] sm:$0xff] %vm863_vm3, %v857_v36  ;;  %v5261_v36 = vor.u32 %v6465_v32, %v5260_v5  ;;  %v1491_v7 = vsel %vm777_vm1, %v5265_v37, 0  ;;  %v5304_v32 = vld [vmem:[#allocation4 + $0x150] sm:$0xf] }
 0x1b2   : > { %2099 = vmatpush.bf16.msra.mxu2 %v7220_v11  ;;  %2140 = vmatpush.bf16.msra.mxu3 %v7223_v12 }
 0x1b3   : > { %v1488_v38 = vsel %vm777_vm1, %v5261_v36, 0  ;;  %1538 = vmatpush.bf16.msra.mxu0 %v1491_v7  ;;  %v6472_v36 = vld [vmem:[#allocation4 + $0x154] sm:$0xf] }
 0x1b4   : > { %1499 = vmatpush.bf16.msra.mxu1 %v1488_v38 }
 0x1b6   : > { %2100 = vmatpush.bf16.msra.mxu2 %v7228_v15 }
 0x1b8   : > { %v7401_v39 = vpop.f32.mrf.mxu2  ;;  %v859_v8 = vpop.f32.mrf.mxu3 }
 0x1b9   : > { %886 = vst.msk [vmem:[#allocation2 + $0xb8] sm:$0xff] %vm863_vm3, %v859_v8  ;;  %v5280_v8 = vld [vmem:[#allocation4 + $0x120] sm:$0xf] }
 0x1ba   : > { %2101 = vmatpush.bf16.msra.mxu2 %v7233_v16 }
 0x1bd   : > { %1380 = vmatmul.bf16.gmra.mxu2 %v5211_v9  ;;  %5242 = vmatmul.msk.bf16.gmra.mxu3 %vm633_vm0, %v5215_v41  ;;  %v6467_v9 = vld [vmem:[#allocation4 + $0x124] sm:$0xf0]  ;;  %v6466_v41 = vld [vmem:[#allocation4 + $0x124] sm:$0xf] }
 0x1be   : > { %v5281_v46 = vor.u32 %v6467_v9, %v5280_v8  ;;  %v5305_v9 = vor.u32 %v6473_v33, %v5304_v32  ;;  %v5366_v32 = vld [vmem:[#allocation4 + $0x180] sm:$0xf]  ;;  %v6483_v33 = vld [vmem:[#allocation4 + $0x184] sm:$0xf0] }
 0x1c0   : > { %v1005_v11 = vpop.f32.mrf.mxu2  ;;  %v1044_v12 = vpop.f32.mrf.mxu3 }
 0x1c1   : > { %v1045_v48 = vadd.f32 %v1044_v12, %v1005_v11  ;;  %v5282_v11 = vld [vmem:[#allocation4 + $0x128] sm:$0xf0] }
 0x1c8   : > { %v1007_v47 = vpop.f32.mrf.mxu2  ;;  %v1046_v15 = vpop.f32.mrf.mxu3 }
 0x1c9   : > { %v1047_v49 = vadd.f32 %v1046_v15, %v1007_v47  ;;  %v5285_v47 = vor.u32 %v6466_v41, %v5282_v11  ;;  %v5309_v41 = vor.u32 %v6472_v36, %v5306_v6  ;;  %v6482_v6 = vld [vmem:[#allocation4 + $0x184] sm:$0xf] }
 0x1cb   : > { %v1074_v53 = vpack.c.bf16 %v1047_v49, %v1045_v48 }
 0x1cd   : > { %5180 = vmatmul.msk.bf16.vlgmr.msrb.gmra.mxu1 %vm758_vm2, %v1074_v53  ;;  %5186 = vmatmul.msk.bf16.vlgmr.msrb.gmra.mxu0 %vm758_vm2, %v1074_v53  ;;  %v6468_v53 = vld [vmem:[#allocation4 + $0x134] sm:$0xf] }
 0x1ce   : > { %1385 = vmatmul.bf16.gmra.mxu2 %v5219_v51  ;;  %5243 = vmatmul.msk.bf16.gmra.mxu3 %vm633_vm0, %v5223_v52  ;;  %v5288_v51 = vld [vmem:[#allocation4 + $0x130] sm:$0xf]  ;;  %v6469_v52 = vld [vmem:[#allocation4 + $0x134] sm:$0xf0] }
 0x1d0   : > { %v1010_v16 = vpop.f32.mrf.mxu2  ;;  %v1049_v55 = vpop.f32.mrf.mxu3 }
 0x1d1   : > { %v1050_v62 = vadd.f32 %v1049_v55, %v1010_v16  ;;  %v5290_v16 = vld [vmem:[#allocation4 + $0x138] sm:$0xf0] }
 0x1d8   : > { %v1012_v60 = vpop.f32.mrf.mxu2  ;;  %v1051_v61 = vpop.f32.mrf.mxu3 }
 0x1d9   : > { %v1052_v63 = vadd.f32 %v1051_v61, %v1012_v60 }
 0x1db   : > { %v1075_v14 = vpack.c.bf16 %v1052_v63, %v1050_v62  ;;  %v5253_v62 = vor.u32 %v6463_v58, %v5252_v57  ;;  %v5254_v63 = vld [vmem:[%s8772_s2 + $0x48] sm:$0xf0]  ;;  %v5320_v57 = vld [vmem:[#allocation4 + $0x170] sm:$0xf]  ;;  %v6477_v58 = vld [vmem:[#allocation4 + $0x174] sm:$0xf0] }
 0x1dd   : > { %5181 = vmatmul.msk.bf16.gmra.mxu1 %vm758_vm2, %v1075_v14  ;;  %5187 = vmatmul.msk.bf16.gmra.mxu0 %vm758_vm2, %v1075_v14  ;;  %v5257_v14 = vor.u32 %v6462_v59, %v5254_v63  ;;  %v6476_v59 = vld [vmem:[#allocation4 + $0x174] sm:$0xf] }
 0x1de   : > { %1390 = vmatmul.bf16.gmra.mxu2 %v5227_v10  ;;  %5244 = vmatmul.msk.bf16.gmra.mxu3 %vm633_vm0, %v5231_v13  ;;  %v5289_v10 = vor.u32 %v6469_v52, %v5288_v51  ;;  %v5293_v13 = vor.u32 %v6468_v53, %v5290_v16 }
 0x1df   : > { %1500 = vmatpush.bf16.msra.mxu1 %v5253_v62  ;;  %1539 = vmatpush.bf16.msra.mxu0 %v5257_v14  ;;  %v888_v14 = vld [vmem:[#allocation2 + $0x8] sm:$0xff] }
 0x1e0   : > { %v1015_v17 = vpop.f32.mrf.mxu2  ;;  %v1054_v19 = vpop.f32.mrf.mxu3 }
 0x1e1   : > { %v1055_v28 = vadd.f32 %v1054_v19, %v1015_v17 }
 0x1e8   : > { %v1017_v26 = vpop.f32.mrf.mxu2  ;;  %v1056_v27 = vpop.f32.mrf.mxu3 }
 0x1e9   : > { %v1057_v0 = vadd.f32 %v1056_v27, %v1017_v26  ;;  %v5298_v26 = vld [vmem:[#allocation4 + $0x148] sm:$0xf0] }
 0x1eb   : > { %v1076_v29 = vpack.c.bf16 %v1057_v0, %v1055_v28 }
 0x1ed   : > { %5182 = vmatmul.msk.bf16.gmra.mxu1 %vm758_vm2, %v1076_v29  ;;  %5188 = vmatmul.msk.bf16.gmra.mxu0 %vm758_vm2, %v1076_v29  ;;  %v5301_v29 = vor.u32 %v6470_v25, %v5298_v26 }
 0x1ee   : > { %1395 = vmatmul.bf16.gmra.mxu2 %v5235_v1  ;;  %5245 = vmatmul.msk.bf16.gmra.mxu3 %vm633_vm0, %v5239_v2  ;;  %v5297_v2 = vor.u32 %v6471_v23, %v5296_v21 }
 0x1f0   : > { %v1020_v31 = vpop.f32.mrf.mxu2  ;;  %v1059_v4 = vpop.f32.mrf.mxu3 }
 0x1f1   : > { %v1060_v43 = vadd.f32 %v1059_v4, %v1020_v31 }
 0x1f8   : > { %v1022_v12 = vpop.f32.mrf.mxu2  ;;  %v1061_v42 = vpop.f32.mrf.mxu3 }
 0x1f9   : > { %v1062_v45 = vadd.f32 %v1061_v42, %v1022_v12 }
 0x1fb   : > { %v1077_v15 = vpack.c.bf16 %v1062_v45, %v1060_v43  ;;  %v5312_v43 = vld [vmem:[#allocation4 + $0x160] sm:$0xf]  ;;  %v6475_v45 = vld [vmem:[#allocation4 + $0x164] sm:$0xf0] }
 0x1fc   : > { %v5313_v52 = vor.u32 %v6475_v45, %v5312_v43 }
 0x1fd   : > { %5183 = vmatmul.msk.bf16.gmra.mxu1 %vm758_vm2, %v1077_v15  ;;  %5189 = vmatmul.msk.bf16.gmra.mxu0 %vm758_vm2, %v1077_v15 }
 0x1fe   : > { %1736 = vmatmul.bf16.vlgmr.msrb.gmra.mxu2 %v5281_v46  ;;  %5326 = vmatmul.msk.bf16.vlgmr.msrb.gmra.mxu3 %vm633_vm0, %v5285_v47  ;;  %v6474_v46 = vld [vmem:[#allocation4 + $0x164] sm:$0xf]  ;;  %v5314_v47 = vld [vmem:[#allocation4 + $0x168] sm:$0xf0] }
 0x1ff   : > { %v5317_v53 = vor.u32 %v6474_v46, %v5314_v47  ;;  %v5367_v46 = vor.u32 %v6483_v33, %v5366_v32  ;;  %v5382_v33 = vld [vmem:[#allocation4 + $0x1a0] sm:$0xf] }
 0x200   : > { %v1025_v48 = vpop.f32.mrf.mxu2  ;;  %v1064_v49 = vpop.f32.mrf.mxu3 }
 0x201   : > { %v1065_v60 = vadd.f32 %v1064_v49, %v1025_v48 }
 0x208   : > { %v1027_v55 = vpop.f32.mrf.mxu2  ;;  %v1066_v56 = vpop.f32.mrf.mxu3 }
 0x209   : > { %v1067_v61 = vadd.f32 %v1066_v56, %v1027_v55 }
 0x20b   : > { %v1078_v17 = vpack.c.bf16 %v1067_v61, %v1065_v60  ;;  %v5322_v60 = vld [vmem:[#allocation4 + $0x178] sm:$0xf0] }
 0x20d   : > { %5184 = vmatmul.msk.bf16.gmra.mxu1 %vm758_vm2, %v1078_v17  ;;  %5190 = vmatmul.msk.bf16.gmra.mxu0 %vm758_vm2, %v1078_v17 }
 0x20e   : > { %1741 = vmatmul.bf16.gmra.mxu2 %v5289_v10  ;;  %5327 = vmatmul.msk.bf16.gmra.mxu3 %vm633_vm0, %v5293_v13 }
 0x210   : > { %v1030_v19 = vpop.f32.mrf.mxu2  ;;  %v1069_v20 = vpop.f32.mrf.mxu3 }
 0x211   : > { %v1070_v0 = vadd.f32 %v1069_v20, %v1030_v19  ;;  %v5321_v19 = vor.u32 %v6477_v58, %v5320_v57  ;;  %v5325_v20 = vor.u32 %v6476_v59, %v5322_v60  ;;  %v6484_v57 = vld [vmem:[#allocation4 + $0x194] sm:$0xf]  ;;  %v5376_v58 = vld [vmem:[#allocation4 + $0x198] sm:$0xf0] }
 0x218   : > { %v1032_v27 = vpop.f32.mrf.mxu2  ;;  %v1071_v28 = vpop.f32.mrf.mxu3 }
 0x219   : > { %v1072_v1 = vadd.f32 %v1071_v28, %v1032_v27  ;;  %v890_v28 = vld [vmem:[#allocation2 + $0x18] sm:$0xff] }
 0x21b   : > { %v1079_v31 = vpack.c.bf16 %v1072_v1, %v1070_v0 }
 0x21d   : > { %5185 = vmatmul.msk.bf16.gmra.mxu1 %vm758_vm2, %v1079_v31  ;;  %5191 = vmatmul.msk.bf16.gmra.mxu0 %vm758_vm2, %v1079_v31 }
 0x21e   : > { %1746 = vmatmul.bf16.gmra.mxu2 %v5297_v2  ;;  %5328 = vmatmul.msk.bf16.gmra.mxu3 %vm633_vm0, %v5301_v29  ;;  %v5346_v2 = vld [vmem:[%s8772_s2 + $0x70] sm:$0xf]  ;;  %v6481_v29 = vld [vmem:[%s8772_s2 + $0x74] sm:$0x30] }
 0x21f   : > { %v5347_v31 = vor.u32 %v6481_v29, %v5346_v2 }
 0x220   : > { %v1371_v4 = vpop.f32.mrf.mxu2  ;;  %v1410_v5 = vpop.f32.mrf.mxu3 }
 0x221   : > { %v1411_v7 = vadd.f32 %v1410_v5, %v1371_v4  ;;  %v6480_v4 = vld [vmem:[%s8772_s2 + $0x74] sm:$0xf]  ;;  %v5348_v5 = vld [vmem:[%s8772_s2 + $0x78] sm:$0x30] }
 0x222   : > { %v5351_v36 = vor.u32 %v6480_v4, %v5348_v5  ;;  %v898_v4 = vld [vmem:[#allocation2 + $0x58] sm:$0xff] }
 0x228   : > { %v1373_v37 = vpop.f32.mrf.mxu2  ;;  %v1412_v38 = vpop.f32.mrf.mxu3 }
 0x229   : > { %v1413_v8 = vadd.f32 %v1412_v38, %v1373_v37  ;;  %v5368_v37 = vld [vmem:[#allocation4 + $0x188] sm:$0xf0]  ;;  %v1854_v38 = vsel %vm777_vm1, %v5347_v31, 0 }
 0x22a   : > { %1865 = vmatpush.bf16.msrb.mxu1 %v1854_v38  ;;  %v5371_v47 = vor.u32 %v6482_v6, %v5368_v37  ;;  %v6486_v6 = vld [vmem:[#allocation4 + $0x1a4] sm:$0xf]  ;;  %v5384_v37 = vld [vmem:[#allocation4 + $0x1a8] sm:$0xf0] }
 0x22b   : > { %v1440_v11 = vpack.c.bf16 %v1413_v8, %v1411_v7 }
 0x22d   : > { %5266 = vmatmul.msk.bf16.vlgmr.msra.gmra.mxu1 %vm758_vm2, %v1440_v11  ;;  %5272 = vmatmul.msk.bf16.vlgmr.msra.gmra.mxu0 %vm758_vm2, %v1440_v11 }
 0x22e   : > { %1751 = vmatmul.bf16.gmra.mxu2 %v5305_v9  ;;  %5329 = vmatmul.msk.bf16.gmra.mxu3 %vm633_vm0, %v5309_v41  ;;  %v1857_v9 = vsel %vm777_vm1, %v5351_v36, 0  ;;  %v6487_v36 = vld [vmem:[#allocation4 + $0x1a4] sm:$0xf0] }
 0x22f   : > { %1904 = vmatpush.bf16.msrb.mxu0 %v1857_v9 }
 0x230   : > { %v1376_v12 = vpop.f32.mrf.mxu2  ;;  %v1415_v42 = vpop.f32.mrf.mxu3 }
 0x231   : > { %v1416_v49 = vadd.f32 %v1415_v42, %v1376_v12  ;;  %v892_v42 = vld [vmem:[#allocation2 + $0x28] sm:$0xff] }
 0x238   : > { %v1378_v15 = vpop.f32.mrf.mxu2  ;;  %v1417_v48 = vpop.f32.mrf.mxu3 }
 0x239   : > { %v1418_v51 = vadd.f32 %v1417_v48, %v1378_v15 }
 0x23b   : > { %v1441_v16 = vpack.c.bf16 %v1418_v51, %v1416_v49 }
 0x23d   : > { %5267 = vmatmul.msk.bf16.gmra.mxu1 %vm758_vm2, %v1441_v16  ;;  %5273 = vmatmul.msk.bf16.gmra.mxu0 %vm758_vm2, %v1441_v16 }
 0x23e   : > { %1756 = vmatmul.bf16.gmra.mxu2 %v5313_v52  ;;  %5330 = vmatmul.msk.bf16.gmra.mxu3 %vm633_vm0, %v5317_v53  ;;  %v894_v52 = vld [vmem:[#allocation2 + $0x38] sm:$0xff] }
 0x240   : > { %v1381_v55 = vpop.f32.mrf.mxu2  ;;  %v1420_v56 = vpop.f32.mrf.mxu3 }
 0x241   : > { %v1421_v63 = vadd.f32 %v1420_v56, %v1381_v55  ;;  %v5374_v55 = vld [vmem:[#allocation4 + $0x190] sm:$0xf]  ;;  %v6485_v56 = vld [vmem:[#allocation4 + $0x194] sm:$0xf0] }
 0x248   : > { %v1383_v61 = vpop.f32.mrf.mxu2  ;;  %v1422_v62 = vpop.f32.mrf.mxu3 }
 0x249   : > { %v1423_v10 = vadd.f32 %v1422_v62, %v1383_v61  ;;  %v5338_v61 = vld [vmem:[%s8772_s2 + $0x60] sm:$0xf]  ;;  %v6479_v62 = vld [vmem:[%s8772_s2 + $0x64] sm:$0xf0] }
 0x24a   : > { %v7456_v13 = vpop.f32.mrf.mxu1  ;;  %v1175_v17 = vpop.f32.mrf.mxu0 }
 0x24b   : > { %v1442_v21 = vpack.c.bf16 %v1423_v10, %v1421_v63  ;;  %v1206_v23 = vadd.f32 %v1175_v17, %v888_v14  ;;  %v6478_v63 = vld [vmem:[%s8772_s2 + $0x64] sm:$0xf] }
 0x24d   : > { %1230 = vst.msk [vmem:[#allocation2 + $0x8] sm:$0xff] %vm863_vm3, %v1206_v23  ;;  %5268 = vmatmul.msk.bf16.gmra.mxu1 %vm758_vm2, %v1442_v21  ;;  %5274 = vmatmul.msk.bf16.gmra.mxu0 %vm758_vm2, %v1442_v21  ;;  %v5339_v21 = vor.u32 %v6479_v62, %v5338_v61  ;;  %v5340_v23 = vld [vmem:[%s8772_s2 + $0x68] sm:$0xf0] }
 0x24e   : > { %1761 = vmatmul.bf16.gmra.mxu2 %v5321_v19  ;;  %5331 = vmatmul.msk.bf16.gmra.mxu3 %vm633_vm0, %v5325_v20  ;;  %v896_v19 = vld [vmem:[#allocation2 + $0x48] sm:$0xff] }
 0x24f   : > { %1866 = vmatpush.bf16.msrb.mxu1 %v5339_v21 }
 0x251   : > { %v1386_v25 = vpop.f32.mrf.mxu2  ;;  %v1425_v26 = vpop.f32.mrf.mxu3 }
 0x252   : > { %v7462_v27 = vpop.f32.mrf.mxu1  ;;  %v1177_v0 = vpop.f32.mrf.mxu0  ;;  %v1426_v41 = vadd.f32 %v1425_v26, %v1386_v25  ;;  %v5375_v26 = vor.u32 %v6485_v56, %v5374_v55  ;;  %v5390_v55 = vld [vmem:[#allocation4 + $0x1b0] sm:$0xf]  ;;  %v6489_v56 = vld [vmem:[#allocation4 + $0x1b4] sm:$0xf0] }
 0x253   : > { %v1208_v1 = vadd.f32 %v1177_v0, %v890_v28  ;;  %v5379_v28 = vor.u32 %v6484_v57, %v5376_v58  ;;  %v5343_v0 = vor.u32 %v6478_v63, %v5340_v23  ;;  %v6488_v57 = vld [vmem:[#allocation4 + $0x1b4] sm:$0xf]  ;;  %v5392_v58 = vld [vmem:[#allocation4 + $0x1b8] sm:$0xf0] }
 0x254   : > { %v5395_v21 = vor.u32 %v6488_v57, %v5392_v58  ;;  %v1205_v57 = vadd.f32 %v7456_v13, %v7324_v24  ;;  %v1207_v24 = vadd.f32 %v7462_v27, %v7327_v30  ;;  %v6496_v30 = vld [vmem:[%s8772_s2 + $0x94] sm:$0xf]  ;;  %v5434_v27 = vld [vmem:[%s8772_s2 + $0x98] sm:$0x30] }
 0x255   : > { %1232 = vst.msk [vmem:[#allocation2 + $0x18] sm:$0xff] %vm863_vm3, %v1208_v1  ;;  %1905 = vmatpush.bf16.msrb.mxu0 %v5343_v0  ;;  %v906_v0 = vld [vmem:[#allocation2 + $0x98] sm:$0xff] }
 0x259   : > { %v1388_v7 = vpop.f32.mrf.mxu2  ;;  %v1427_v8 = vpop.f32.mrf.mxu3 }
 0x25a   : > { %v1428_v11 = vadd.f32 %v1427_v8, %v1388_v7  ;;  %v7479_v12 = vpop.f32.mrf.mxu1  ;;  %v1180_v43 = vpop.f32.mrf.mxu0 }
 0x25b   : > { %v1210_v45 = vadd.f32 %v1180_v43, %v892_v42 }
 0x25c   : > { %v1443_v15 = vpack.c.bf16 %v1428_v11, %v1426_v41  ;;  %v900_v11 = vld [vmem:[#allocation2 + $0x68] sm:$0xff] }
 0x25d   : > { %1234 = vst.msk [vmem:[#allocation2 + $0x28] sm:$0xff] %vm863_vm3, %v1210_v45  ;;  %v5383_v45 = vor.u32 %v6487_v36, %v5382_v33 }
 0x25e   : > { %5269 = vmatmul.msk.bf16.gmra.mxu1 %vm758_vm2, %v1443_v15  ;;  %5275 = vmatmul.msk.bf16.gmra.mxu0 %vm758_vm2, %v1443_v15 }
 0x25f   : > { %2102 = vmatmul.bf16.vlgmr.msra.gmra.mxu2 %v5367_v46  ;;  %5412 = vmatmul.msk.bf16.vlgmr.msra.gmra.mxu3 %vm633_vm0, %v5371_v47  ;;  %v5387_v46 = vor.u32 %v6486_v6, %v5384_v37 }
 0x261   : > { %v1391_v48 = vpop.f32.mrf.mxu2  ;;  %v1430_v49 = vpop.f32.mrf.mxu3 }
 0x262   : > { %v7485_v51 = vpop.f32.mrf.mxu1  ;;  %v1182_v53 = vpop.f32.mrf.mxu0  ;;  %v1431_v10 = vadd.f32 %v1430_v49, %v1391_v48 }
 0x263   : > { %v1212_v16 = vadd.f32 %v1182_v53, %v894_v52  ;;  %v902_v52 = vld [vmem:[#allocation2 + $0x78] sm:$0xff] }
 0x265   : > { %1236 = vst.msk [vmem:[#allocation2 + $0x38] sm:$0xff] %vm863_vm3, %v1212_v16 }
 0x269   : > { %v1393_v59 = vpop.f32.mrf.mxu2  ;;  %v1432_v60 = vpop.f32.mrf.mxu3 }
 0x26a   : > { %v1433_v14 = vadd.f32 %v1432_v60, %v1393_v59  ;;  %v7497_v17 = vpop.f32.mrf.mxu1  ;;  %v1185_v20 = vpop.f32.mrf.mxu0 }
 0x26b   : > { %v1214_v25 = vadd.f32 %v1185_v20, %v896_v19  ;;  %v5391_v20 = vor.u32 %v6489_v56, %v5390_v55  ;;  %v6492_v55 = vld [vmem:[#allocation4 + $0x1d4] sm:$0xf]  ;;  %v5408_v56 = vld [vmem:[#allocation4 + $0x1d8] sm:$0xf0] }
 0x26c   : > { %v1444_v1 = vpack.c.bf16 %v1433_v14, %v1431_v10  ;;  %v904_v10 = vld [vmem:[#allocation2 + $0x88] sm:$0xff] }
 0x26d   : > { %1238 = vst.msk [vmem:[#allocation2 + $0x48] sm:$0xff] %vm863_vm3, %v1214_v25 }
 0x26e   : > { %5270 = vmatmul.msk.bf16.gmra.mxu1 %vm758_vm2, %v1444_v1  ;;  %5276 = vmatmul.msk.bf16.gmra.mxu0 %vm758_vm2, %v1444_v1 }
 0x26f   : > { %2107 = vmatmul.bf16.gmra.mxu2 %v5375_v26  ;;  %5413 = vmatmul.msk.bf16.gmra.mxu3 %vm633_vm0, %v5379_v28 }
 0x271   : > { %v1396_v2 = vpop.f32.mrf.mxu2  ;;  %v1435_v29 = vpop.f32.mrf.mxu3 }
 0x272   : > { %v7506_v31 = vpop.f32.mrf.mxu1  ;;  %v1187_v5 = vpop.f32.mrf.mxu0  ;;  %v1436_v8 = vadd.f32 %v1435_v29, %v1396_v2  ;;  %v5398_v29 = vld [vmem:[#allocation4 + $0x1c0] sm:$0xf] }
 0x273   : > { %v1216_v32 = vadd.f32 %v1187_v5, %v898_v4  ;;  %v6491_v4 = vld [vmem:[#allocation4 + $0x1c4] sm:$0xf0]  ;;  %v6490_v5 = vld [vmem:[#allocation4 + $0x1c4] sm:$0xf] }
 0x275   : > { %1240 = vst.msk [vmem:[#allocation2 + $0x58] sm:$0xff] %vm863_vm3, %v1216_v32  ;;  %v5400_v32 = vld [vmem:[#allocation4 + $0x1c8] sm:$0xf0] }
 0x279   : > { %v1398_v38 = vpop.f32.mrf.mxu2  ;;  %v1437_v7 = vpop.f32.mrf.mxu3 }
 0x27a   : > { %v1438_v9 = vadd.f32 %v1437_v7, %v1398_v38  ;;  %v7509_v41 = vpop.f32.mrf.mxu1  ;;  %v1190_v42 = vpop.f32.mrf.mxu0  ;;  %v908_v7 = vld [vmem:[#allocation2 + $0xa8] sm:$0xff] }
 0x27b   : > { %v1218_v43 = vadd.f32 %v1190_v42, %v900_v11  ;;  %v5399_v11 = vor.u32 %v6491_v4, %v5398_v29  ;;  %v5403_v42 = vor.u32 %v6490_v5, %v5400_v32  ;;  %v5432_v5 = vld [vmem:[%s8772_s2 + $0x90] sm:$0xf]  ;;  %v6497_v32 = vld [vmem:[%s8772_s2 + $0x94] sm:$0x30] }
 0x27c   : > { %v1445_v47 = vpack.c.bf16 %v1438_v9, %v1436_v8 }
 0x27d   : > { %1242 = vst.msk [vmem:[#allocation2 + $0x68] sm:$0xff] %vm863_vm3, %v1218_v43 }
 0x27e   : > { %5271 = vmatmul.msk.bf16.gmra.mxu1 %vm758_vm2, %v1445_v47  ;;  %5277 = vmatmul.msk.bf16.gmra.mxu0 %vm758_vm2, %v1445_v47 }
 0x27f   : > { %2112 = vmatmul.bf16.gmra.mxu2 %v5383_v45  ;;  %5414 = vmatmul.msk.bf16.gmra.mxu3 %vm633_vm0, %v5387_v46 }
 0x281   : > { %v1737_v15 = vpop.f32.mrf.mxu2  ;;  %v1776_v48 = vpop.f32.mrf.mxu3 }
 0x282   : > { %v7515_v49 = vpop.f32.mrf.mxu1  ;;  %v1192_v53 = vpop.f32.mrf.mxu0  ;;  %v1777_v61 = vadd.f32 %v1776_v48, %v1737_v15  ;;  %v910_v15 = vld [vmem:[#allocation2 + $0xb8] sm:$0xff] }
 0x283   : > { %v1220_v16 = vadd.f32 %v1192_v53, %v902_v52  ;;  %v5406_v53 = vld [vmem:[#allocation4 + $0x1d0] sm:$0xf] }
 0x285   : > { %1244 = vst.msk [vmem:[#allocation2 + $0x78] sm:$0xff] %vm863_vm3, %v1220_v16  ;;  %v6493_v16 = vld [vmem:[#allocation4 + $0x1d4] sm:$0xf0] }
 0x289   : > { %v1739_v59 = vpop.f32.mrf.mxu2  ;;  %v1778_v60 = vpop.f32.mrf.mxu3 }
 0x28a   : > { %v1779_v62 = vadd.f32 %v1778_v60, %v1739_v59  ;;  %v7518_v63 = vpop.f32.mrf.mxu1  ;;  %v1195_v14 = vpop.f32.mrf.mxu0 }
 0x28b   : > { %v1222_v19 = vadd.f32 %v1195_v14, %v904_v10  ;;  %v1254_v10 = vld [vmem:[#allocation2 + $0x8] sm:$0xff] }
 0x28c   : > { %v1806_v23 = vpack.c.bf16 %v1779_v62, %v1777_v61 }
 0x28d   : > { %1246 = vst.msk [vmem:[#allocation2 + $0x88] sm:$0xff] %vm863_vm3, %v1222_v19 }
 0x28e   : > { %5352 = vmatmul.msk.bf16.vlgmr.msrb.gmra.mxu1 %vm758_vm2, %v1806_v23  ;;  %5358 = vmatmul.msk.bf16.vlgmr.msrb.gmra.mxu0 %vm758_vm2, %v1806_v23  ;;  %v5411_v23 = vor.u32 %v6492_v55, %v5408_v56  ;;  %v1260_v55 = vld [vmem:[#allocation2 + $0x38] sm:$0xff] }
 0x28f   : > { %2117 = vmatmul.bf16.gmra.mxu2 %v5391_v20  ;;  %5415 = vmatmul.msk.bf16.gmra.mxu3 %vm633_vm0, %v5395_v21  ;;  %v5407_v21 = vor.u32 %v6493_v16, %v5406_v53 }
 0x291   : > { %v1742_v25 = vpop.f32.mrf.mxu2  ;;  %v1781_v26 = vpop.f32.mrf.mxu3 }
 0x292   : > { %v7524_v28 = vpop.f32.mrf.mxu1  ;;  %v1197_v1 = vpop.f32.mrf.mxu0  ;;  %v1782_v6 = vadd.f32 %v1781_v26, %v1742_v25 }
 0x293   : > { %v1224_v2 = vadd.f32 %v1197_v1, %v906_v0  ;;  %v1256_v1 = vld [vmem:[#allocation2 + $0x18] sm:$0xff] }
 0x295   : > { %1248 = vst.msk [vmem:[#allocation2 + $0x98] sm:$0xff] %vm863_vm3, %v1224_v2 }
 0x299   : > { %v1744_v33 = vpop.f32.mrf.mxu2  ;;  %v1783_v36 = vpop.f32.mrf.mxu3 }
 0x29a   : > { %v1784_v37 = vadd.f32 %v1783_v36, %v1744_v33  ;;  %v7527_v38 = vpop.f32.mrf.mxu1  ;;  %v1200_v8 = vpop.f32.mrf.mxu0  ;;  %v5433_v33 = vor.u32 %v6497_v32, %v5432_v5  ;;  %v5437_v36 = vor.u32 %v6496_v30, %v5434_v27  ;;  %v1264_v5 = vld [vmem:[#allocation2 + $0x58] sm:$0xff] }
 0x29b   : > { %v1226_v9 = vadd.f32 %v1200_v8, %v908_v7 }
 0x29c   : > { %v1807_v43 = vpack.c.bf16 %v1784_v37, %v1782_v6  ;;  %v2220_v6 = vsel %vm777_vm1, %v5433_v33, 0  ;;  %v1209_v37 = vadd.f32 %v7479_v12, %v7331_v34  ;;  %v1211_v34 = vadd.f32 %v7485_v51, %v7334_v40  ;;  %v6495_v40 = vld [vmem:[%s8772_s2 + $0x84] sm:$0xf0]  ;;  %v6494_v51 = vld [vmem:[%s8772_s2 + $0x84] sm:$0xf] }
 0x29d   : > { %1250 = vst.msk [vmem:[#allocation2 + $0xa8] sm:$0xff] %vm863_vm3, %v1226_v9  ;;  %2231 = vmatpush.bf16.msra.mxu1 %v2220_v6  ;;  %v2223_v9 = vsel %vm777_vm1, %v5437_v36, 0  ;;  %v1217_v6 = vadd.f32 %v7509_v41, %v7345_v54 }
 0x29e   : > { %5353 = vmatmul.msk.bf16.gmra.mxu1 %vm758_vm2, %v1807_v43  ;;  %5359 = vmatmul.msk.bf16.gmra.mxu0 %vm758_vm2, %v1807_v43 }
 0x29f   : > { %2122 = vmatmul.bf16.gmra.mxu2 %v5399_v11  ;;  %5416 = vmatmul.msk.bf16.gmra.mxu3 %vm633_vm0, %v5403_v42 }
 0x2a0   : > { %2270 = vmatpush.bf16.msra.mxu0 %v2223_v9  ;;  %v1266_v9 = vld [vmem:[#allocation2 + $0x68] sm:$0xff] }
 0x2a1   : > { %v1747_v45 = vpop.f32.mrf.mxu2  ;;  %v1786_v46 = vpop.f32.mrf.mxu3 }
 0x2a2   : > { %v7533_v47 = vpop.f32.mrf.mxu1  ;;  %v1202_v48 = vpop.f32.mrf.mxu0  ;;  %v1787_v60 = vadd.f32 %v1786_v46, %v1747_v45  ;;  %v1258_v45 = vld [vmem:[#allocation2 + $0x28] sm:$0xff] }
 0x2a3   : > { %v1228_v52 = vadd.f32 %v1202_v48, %v910_v15 }
 0x2a5   : > { %1252 = vst.msk [vmem:[#allocation2 + $0xb8] sm:$0xff] %vm863_vm3, %v1228_v52 }
 0x2a9   : > { %v1749_v58 = vpop.f32.mrf.mxu2  ;;  %v1788_v59 = vpop.f32.mrf.mxu3 }
 0x2aa   : > { %v1789_v61 = vadd.f32 %v1788_v59, %v1749_v58  ;;  %v1502_v62 = vpop.f32.mrf.mxu1  ;;  %v1541_v14 = vpop.f32.mrf.mxu0  ;;  %v1213_v59 = vadd.f32 %v7497_v17, %v7338_v44  ;;  %v5426_v17 = vld [vmem:[%s8772_s2 + $0x88] sm:$0xf0] }
 0x2ab   : > { %v7538_v19 = vadd.f32 %v1502_v62, %v1205_v57  ;;  %v1572_v20 = vadd.f32 %v1541_v14, %v1254_v10  ;;  %v5424_v62 = vld [vmem:[%s8772_s2 + $0x80] sm:$0xf] }
 0x2ac   : > { %v1808_v25 = vpack.c.bf16 %v1789_v61, %v1787_v60  ;;  %v5425_v44 = vor.u32 %v6495_v40, %v5424_v62 }
 0x2ad   : > { %1596 = vst.msk [vmem:[#allocation2 + $0x8] sm:$0xff] %vm863_vm3, %v1572_v20 }
 0x2ae   : > { %5354 = vmatmul.msk.bf16.gmra.mxu1 %vm758_vm2, %v1808_v25  ;;  %5360 = vmatmul.msk.bf16.gmra.mxu0 %vm758_vm2, %v1808_v25 }
 0x2af   : > { %2127 = vmatmul.bf16.gmra.mxu2 %v5407_v21  ;;  %5417 = vmatmul.msk.bf16.gmra.mxu3 %vm633_vm0, %v5411_v23  ;;  %v1262_v21 = vld [vmem:[#allocation2 + $0x48] sm:$0xff] }
 0x2b0   : > { %2232 = vmatpush.bf16.msra.mxu1 %v5425_v44 }
 0x2b1   : > { %v1752_v13 = vpop.f32.mrf.mxu2  ;;  %v1791_v26 = vpop.f32.mrf.mxu3 }
 0x2b2   : > { %v1504_v0 = vpop.f32.mrf.mxu1  ;;  %v1543_v2 = vpop.f32.mrf.mxu0  ;;  %v1792_v11 = vadd.f32 %v1791_v26, %v1752_v13  ;;  %v5429_v13 = vor.u32 %v6494_v51, %v5426_v17  ;;  %v1272_v51 = vld [vmem:[#allocation2 + $0x98] sm:$0xff] }
 0x2b3   : > { %v7546_v29 = vadd.f32 %v1504_v0, %v1207_v24  ;;  %v1574_v4 = vadd.f32 %v1543_v2, %v1256_v1  ;;  %v1215_v0 = vadd.f32 %v7506_v31, %v7341_v50 }
 0x2b4   : > { %2271 = vmatpush.bf16.msra.mxu0 %v5429_v13 }
 0x2b5   : > { %1598 = vst.msk [vmem:[#allocation2 + $0x18] sm:$0xff] %vm863_vm3, %v1574_v4 }
 0x2b9   : > { %v1754_v7 = vpop.f32.mrf.mxu2  ;;  %v1793_v8 = vpop.f32.mrf.mxu3 }
 0x2ba   : > { %v1794_v42 = vadd.f32 %v1793_v8, %v1754_v7  ;;  %v1507_v43 = vpop.f32.mrf.mxu1  ;;  %v1546_v46 = vpop.f32.mrf.mxu0 }
 0x2bb   : > { %v7565_v15 = vadd.f32 %v1507_v43, %v1209_v37  ;;  %v1576_v48 = vadd.f32 %v1546_v46, %v1258_v45  ;;  %v1219_v43 = vadd.f32 %v7515_v49, %v7362_v18  ;;  %v1268_v46 = vld [vmem:[#allocation2 + $0x78] sm:$0xff] }
 0x2bc   : > { %v1809_v52 = vpack.c.bf16 %v1794_v42, %v1792_v11 }
 0x2bd   : > { %1600 = vst.msk [vmem:[#allocation2 + $0x28] sm:$0xff] %vm863_vm3, %v1576_v48 }
 0x2be   : > { %5355 = vmatmul.msk.bf16.gmra.mxu1 %vm758_vm2, %v1809_v52  ;;  %5361 = vmatmul.msk.bf16.gmra.mxu0 %vm758_vm2, %v1809_v52 }
 0x2c1   : > { %v1757_v12 = vpop.f32.mrf.mxu2  ;;  %v1796_v53 = vpop.f32.mrf.mxu3 }
 0x2c2   : > { %v1509_v16 = vpop.f32.mrf.mxu1  ;;  %v1548_v56 = vpop.f32.mrf.mxu0  ;;  %v1797_v10 = vadd.f32 %v1796_v53, %v1757_v12  ;;  %v1221_v12 = vadd.f32 %v7518_v63, %v7368_v22  ;;  %v1223_v22 = vadd.f32 %v7524_v28, %v7384_v3 }
 0x2c3   : > { %v7572_v57 = vadd.f32 %v1509_v16, %v1211_v34  ;;  %v1578_v58 = vadd.f32 %v1548_v56, %v1260_v55 }
 0x2c5   : > { %1602 = vst.msk [vmem:[#allocation2 + $0x38] sm:$0xff] %vm863_vm3, %v1578_v58 }
 0x2c9   : > { %v1759_v60 = vpop.f32.mrf.mxu2  ;;  %v1798_v61 = vpop.f32.mrf.mxu3 }
 0x2ca   : > { %v1799_v14 = vadd.f32 %v1798_v61, %v1759_v60  ;;  %v1512_v20 = vpop.f32.mrf.mxu1  ;;  %v1551_v23 = vpop.f32.mrf.mxu0 }
 0x2cb   : > { %v7589_v25 = vadd.f32 %v1512_v20, %v1213_v59  ;;  %v1580_v24 = vadd.f32 %v1551_v23, %v1262_v21  ;;  %v1270_v59 = vld [vmem:[#allocation2 + $0x88] sm:$0xff]  ;;  %v1225_v21 = vadd.f32 %v7527_v38, %v7395_v35  ;;  %v1227_v35 = vadd.f32 %v7533_v47, %v7401_v39 }
 0x2cc   : > { %v1810_v26 = vpack.c.bf16 %v1799_v14, %v1797_v10 }
 0x2cd   : > { %1604 = vst.msk [vmem:[#allocation2 + $0x48] sm:$0xff] %vm863_vm3, %v1580_v24 }
 0x2ce   : > { %5356 = vmatmul.msk.bf16.gmra.mxu1 %vm758_vm2, %v1810_v26  ;;  %5362 = vmatmul.msk.bf16.gmra.mxu0 %vm758_vm2, %v1810_v26  ;;  %v1274_v26 = vld [vmem:[#allocation2 + $0xa8] sm:$0xff] }
 0x2d1   : > { %v1762_v1 = vpop.f32.mrf.mxu2  ;;  %v1801_v2 = vpop.f32.mrf.mxu3 }
 0x2d2   : > { %v1514_v4 = vpop.f32.mrf.mxu1  ;;  %v1553_v32 = vpop.f32.mrf.mxu0  ;;  %v1802_v37 = vadd.f32 %v1801_v2, %v1762_v1 }
 0x2d3   : > { %v7596_v33 = vadd.f32 %v1514_v4, %v1215_v0  ;;  %v1582_v30 = vadd.f32 %v1553_v32, %v1264_v5  ;;  %v1276_v5 = vld [vmem:[#allocation2 + $0xb8] sm:$0xff] }
 0x2d5   : > { %1606 = vst.msk [vmem:[#allocation2 + $0x58] sm:$0xff] %vm863_vm3, %v1582_v30 }
 0x2d9   : > { %v1764_v27 = vpop.f32.mrf.mxu2  ;;  %v1803_v36 = vpop.f32.mrf.mxu3 }
 0x2da   : > { %v1804_v7 = vadd.f32 %v1803_v36, %v1764_v27 }
 0x2db   : > { %v1517_v8 = vpop.f32.mrf.mxu1  ;;  %v1556_v50 = vpop.f32.mrf.mxu0 }
 0x2dc   : > { %v1811_v31 = vpack.c.bf16 %v1804_v7, %v1802_v37  ;;  %v7601_v11 = vadd.f32 %v1517_v8, %v1217_v6  ;;  %v1584_v42 = vadd.f32 %v1556_v50, %v1266_v9  ;;  %v1620_v9 = vld [vmem:[#allocation2 + $0x8] sm:$0xff] }
 0x2de   : > { %1608 = vst.msk [vmem:[#allocation2 + $0x68] sm:$0xff] %vm863_vm3, %v1584_v42  ;;  %5357 = vmatmul.msk.bf16.gmra.mxu1 %vm758_vm2, %v1811_v31  ;;  %5363 = vmatmul.msk.bf16.gmra.mxu0 %vm758_vm2, %v1811_v31 }
 0x2e2   : > { %v2103_v45 = vpop.f32.mrf.mxu2  ;;  %v2142_v54 = vpop.f32.mrf.mxu3 }
 0x2e3   : > { %v1519_v41 = vpop.f32.mrf.mxu1  ;;  %v1558_v48 = vpop.f32.mrf.mxu0  ;;  %v2143_v55 = vadd.f32 %v2142_v54, %v2103_v45  ;;  %v1622_v54 = vld [vmem:[#allocation2 + $0x18] sm:$0xff] }
 0x2e4   : > { %v7608_v52 = vadd.f32 %v1519_v41, %v1219_v43  ;;  %v1586_v34 = vadd.f32 %v1558_v48, %v1268_v46 }
 0x2e6   : > { %1610 = vst.msk [vmem:[#allocation2 + $0x78] sm:$0xff] %vm863_vm3, %v1586_v34 }
 0x2ea   : > { %v2105_v53 = vpop.f32.mrf.mxu2  ;;  %v2144_v16 = vpop.f32.mrf.mxu3 }
 0x2eb   : > { %v2145_v56 = vadd.f32 %v2144_v16, %v2105_v53  ;;  %v1522_v58 = vpop.f32.mrf.mxu1  ;;  %v1561_v18 = vpop.f32.mrf.mxu0  ;;  %v1624_v16 = vld [vmem:[#allocation2 + $0x28] sm:$0xff] }
 0x2ec   : > { %v7613_v49 = vadd.f32 %v1522_v58, %v1221_v12  ;;  %v1588_v60 = vadd.f32 %v1561_v18, %v1270_v59 }
 0x2ed   : > { %v2172_v61 = vpack.c.bf16 %v2145_v56, %v2143_v55 }
 0x2ee   : > { %1612 = vst.msk [vmem:[#allocation2 + $0x88] sm:$0xff] %vm863_vm3, %v1588_v60 }
 0x2ef   : > { %5438 = vmatmul.msk.bf16.vlgmr.msra.gmra.mxu1 %vm758_vm2, %v2172_v61  ;;  %5444 = vmatmul.msk.bf16.vlgmr.msra.gmra.mxu0 %vm758_vm2, %v2172_v61 }
 0x2f2   : > { %v2108_v63 = vpop.f32.mrf.mxu2  ;;  %v2147_v62 = vpop.f32.mrf.mxu3 }
 0x2f3   : > { %v1524_v40 = vpop.f32.mrf.mxu1  ;;  %v1563_v10 = vpop.f32.mrf.mxu0  ;;  %v2148_v17 = vadd.f32 %v2147_v62, %v2108_v63 }
 0x2f4   : > { %v7620_v14 = vadd.f32 %v1524_v40, %v1223_v22  ;;  %v1590_v20 = vadd.f32 %v1563_v10, %v1272_v51  ;;  %v1626_v22 = vld [vmem:[#allocation2 + $0x38] sm:$0xff] }
 0x2f6   : > { %1614 = vst.msk [vmem:[#allocation2 + $0x98] sm:$0xff] %vm863_vm3, %v1590_v20 }
 0x2fa   : > { %v2110_v23 = vpop.f32.mrf.mxu2  ;;  %v2149_v44 = vpop.f32.mrf.mxu3 }
 0x2fb   : > { %v2150_v24 = vadd.f32 %v2149_v44, %v2110_v23  ;;  %v1527_v13 = vpop.f32.mrf.mxu1  ;;  %v1566_v3 = vpop.f32.mrf.mxu0 }
 0x2fc   : > { %v7625_v28 = vadd.f32 %v1527_v13, %v1225_v21  ;;  %v1592_v0 = vadd.f32 %v1566_v3, %v1274_v26  ;;  %v1628_v21 = vld [vmem:[#allocation2 + $0x48] sm:$0xff] }
 0x2fd   : > { %v2173_v1 = vpack.c.bf16 %v2150_v24, %v2148_v17 }
 0x2fe   : > { %1616 = vst.msk [vmem:[#allocation2 + $0xa8] sm:$0xff] %vm863_vm3, %v1592_v0  ;;  %v1630_v0 = vld [vmem:[#allocation2 + $0x58] sm:$0xff] }
 0x2ff   : > { %5439 = vmatmul.msk.bf16.gmra.mxu1 %vm758_vm2, %v2173_v1  ;;  %5445 = vmatmul.msk.bf16.gmra.mxu0 %vm758_vm2, %v2173_v1 }
 0x302   : > { %v2113_v38 = vpop.f32.mrf.mxu2  ;;  %v2152_v2 = vpop.f32.mrf.mxu3 }
 0x303   : > { %v1529_v4 = vpop.f32.mrf.mxu1  ;;  %v1568_v32 = vpop.f32.mrf.mxu0  ;;  %v2153_v37 = vadd.f32 %v2152_v2, %v2113_v38 }
 0x304   : > { %v7632_v30 = vadd.f32 %v1529_v4, %v1227_v35  ;;  %v1594_v27 = vadd.f32 %v1568_v32, %v1276_v5  ;;  %v1632_v32 = vld [vmem:[#allocation2 + $0x68] sm:$0xff] }
 0x306   : > { %1618 = vst.msk [vmem:[#allocation2 + $0xb8] sm:$0xff] %vm863_vm3, %v1594_v27 }
 0x30a   : > { %v2115_v36 = vpop.f32.mrf.mxu2  ;;  %v2154_v6 = vpop.f32.mrf.mxu3 }
 0x30b   : > { %v2155_v7 = vadd.f32 %v2154_v6, %v2115_v36  ;;  %v1868_v8 = vpop.f32.mrf.mxu1  ;;  %v1907_v50 = vpop.f32.mrf.mxu0 }
 0x30c   : > { %v7636_v31 = vadd.f32 %v1868_v8, %v7538_v19  ;;  %v1938_v39 = vadd.f32 %v1907_v50, %v1620_v9  ;;  %v1634_v8 = vld [vmem:[#allocation2 + $0x78] sm:$0xff] }
 0x30d   : > { %v2174_v47 = vpack.c.bf16 %v2155_v7, %v2153_v37 }
 0x30e   : > { %1962 = vst.msk [vmem:[#allocation2 + $0x8] sm:$0xff] %vm863_vm3, %v1938_v39 }
 0x30f   : > { %5440 = vmatmul.msk.bf16.gmra.mxu1 %vm758_vm2, %v2174_v47  ;;  %5446 = vmatmul.msk.bf16.gmra.mxu0 %vm758_vm2, %v2174_v47  ;;  %v1636_v47 = vld [vmem:[#allocation2 + $0x88] sm:$0xff] }
 0x312   : > { %v2118_v42 = vpop.f32.mrf.mxu2  ;;  %v2157_v43 = vpop.f32.mrf.mxu3 }
 0x313   : > { %v7641_v45 = vpop.f32.mrf.mxu1  ;;  %v1909_v41 = vpop.f32.mrf.mxu0  ;;  %v2158_v34 = vadd.f32 %v2157_v43, %v2118_v42 }
 0x314   : > { %v1940_v46 = vadd.f32 %v1909_v41, %v1622_v54  ;;  %v1638_v41 = vld [vmem:[#allocation2 + $0x98] sm:$0xff] }
 0x316   : > { %1964 = vst.msk [vmem:[#allocation2 + $0x18] sm:$0xff] %vm863_vm3, %v1940_v46 }
 0x31a   : > { %v2120_v48 = vpop.f32.mrf.mxu2  ;;  %v2159_v19 = vpop.f32.mrf.mxu3 }
 0x31b   : > { %v2160_v12 = vadd.f32 %v2159_v19, %v2120_v48  ;;  %v1873_v53 = vpop.f32.mrf.mxu1  ;;  %v1912_v55 = vpop.f32.mrf.mxu0 }
 0x31c   : > { %v7645_v56 = vadd.f32 %v1873_v53, %v7565_v15  ;;  %v1942_v58 = vadd.f32 %v1912_v55, %v1624_v16  ;;  %v1642_v55 = vld [vmem:[#allocation2 + $0xb8] sm:$0xff] }
 0x31d   : > { %v2175_v59 = vpack.c.bf16 %v2160_v12, %v2158_v34  ;;  %v1640_v34 = vld [vmem:[#allocation2 + $0xa8] sm:$0xff] }
 0x31e   : > { %1966 = vst.msk [vmem:[#allocation2 + $0x28] sm:$0xff] %vm863_vm3, %v1942_v58 }
 0x31f   : > { %5441 = vmatmul.msk.bf16.gmra.mxu1 %vm758_vm2, %v2175_v59  ;;  %5447 = vmatmul.msk.bf16.gmra.mxu0 %vm758_vm2, %v2175_v59 }
 0x322   : > { %v2123_v18 = vpop.f32.mrf.mxu2  ;;  %v2162_v60 = vpop.f32.mrf.mxu3 }
 0x323   : > { %v7650_v61 = vpop.f32.mrf.mxu1  ;;  %v1914_v63 = vpop.f32.mrf.mxu0  ;;  %v2163_v51 = vadd.f32 %v2162_v60, %v2123_v18  ;;  %v1986_v60 = vld [vmem:[#allocation2 + $0x8] sm:$0xff] }
 0x324   : > { %v1944_v62 = vadd.f32 %v1914_v63, %v1626_v22 }
 0x326   : > { %1968 = vst.msk [vmem:[#allocation2 + $0x38] sm:$0xff] %vm863_vm3, %v1944_v62 }
 0x32a   : > { %v2125_v40 = vpop.f32.mrf.mxu2  ;;  %v2164_v15 = vpop.f32.mrf.mxu3 }
 0x32b   : > { %v2165_v10 = vadd.f32 %v2164_v15, %v2125_v40  ;;  %v1878_v20 = vpop.f32.mrf.mxu1  ;;  %v1917_v23 = vpop.f32.mrf.mxu0  ;;  %v1939_v15 = vadd.f32 %v7641_v45, %v7546_v29 }
 0x32c   : > { %v7654_v44 = vadd.f32 %v1878_v20, %v7589_v25  ;;  %v1946_v17 = vadd.f32 %v1917_v23, %v1628_v21 }
 0x32d   : > { %v2176_v24 = vpack.c.bf16 %v2165_v10, %v2163_v51  ;;  %v1988_v10 = vld [vmem:[#allocation2 + $0x18] sm:$0xff] }
 0x32e   : > { %1970 = vst.msk [vmem:[#allocation2 + $0x48] sm:$0xff] %vm863_vm3, %v1946_v17 }
 0x32f   : > { %5442 = vmatmul.msk.bf16.gmra.mxu1 %vm758_vm2, %v2176_v24  ;;  %5448 = vmatmul.msk.bf16.gmra.mxu0 %vm758_vm2, %v2176_v24 }
 0x332   : > { %v2128_v13 = vpop.f32.mrf.mxu2  ;;  %v2167_v26 = vpop.f32.mrf.mxu3 }
 0x333   : > { %v7659_v3 = vpop.f32.mrf.mxu1  ;;  %v1919_v1 = vpop.f32.mrf.mxu0  ;;  %v2168_v2 = vadd.f32 %v2167_v26, %v2128_v13 }
 0x334   : > { %v1948_v35 = vadd.f32 %v1919_v1, %v1630_v0  ;;  %v1990_v1 = vld [vmem:[#allocation2 + $0x28] sm:$0xff] }
 0x336   : > { %1972 = vst.msk [vmem:[#allocation2 + $0x58] sm:$0xff] %vm863_vm3, %v1948_v35 }
 0x33a   : > { %v2130_v38 = vpop.f32.mrf.mxu2  ;;  %v2169_v25 = vpop.f32.mrf.mxu3 }
 0x33b   : > { %v2170_v4 = vadd.f32 %v2169_v25, %v2130_v38  ;;  %v1883_v5 = vpop.f32.mrf.mxu1  ;;  %v1922_v27 = vpop.f32.mrf.mxu0  ;;  %v1943_v38 = vadd.f32 %v7650_v61, %v7572_v57 }
 0x33c   : > { %v7663_v36 = vadd.f32 %v1883_v5, %v7601_v11  ;;  %v1950_v6 = vadd.f32 %v1922_v27, %v1632_v32 }
 0x33d   : > { %v2177_v37 = vpack.c.bf16 %v2170_v4, %v2168_v2  ;;  %v1992_v2 = vld [vmem:[#allocation2 + $0x38] sm:$0xff] }
 0x33e   : > { %1974 = vst.msk [vmem:[#allocation2 + $0x68] sm:$0xff] %vm863_vm3, %v1950_v6 }
 0x33f   : > { %5443 = vmatmul.msk.bf16.gmra.mxu1 %vm758_vm2, %v2177_v37  ;;  %5449 = vmatmul.msk.bf16.gmra.mxu0 %vm758_vm2, %v2177_v37 }
 0x343   : > { %v7668_v7 = vpop.f32.mrf.mxu1  ;;  %v1924_v9 = vpop.f32.mrf.mxu0 }
 0x344   : > { %v1952_v50 = vadd.f32 %v1924_v9, %v1634_v8 }
 0x346   : > { %1976 = vst.msk [vmem:[#allocation2 + $0x78] sm:$0xff] %vm863_vm3, %v1952_v50  ;;  %v1994_v50 = vld [vmem:[#allocation2 + $0x48] sm:$0xff] }
 0x34b   : > { %v1888_v39 = vpop.f32.mrf.mxu1  ;;  %v1927_v42 = vpop.f32.mrf.mxu0 }
 0x34c   : > { %v7672_v11 = vadd.f32 %v1888_v39, %v7613_v49  ;;  %v1954_v43 = vadd.f32 %v1927_v42, %v1636_v47  ;;  %v1947_v47 = vadd.f32 %v7659_v3, %v7596_v33 }
 0x34e   : > { %1978 = vst.msk [vmem:[#allocation2 + $0x88] sm:$0xff] %vm863_vm3, %v1954_v43  ;;  %v1996_v43 = vld [vmem:[#allocation2 + $0x58] sm:$0xff] }
 0x353   : > { %v7675_v54 = vpop.f32.mrf.mxu1  ;;  %v1929_v46 = vpop.f32.mrf.mxu0 }
 0x354   : > { %v1956_v48 = vadd.f32 %v1929_v46, %v1638_v41 }
 0x356   : > { %1980 = vst.msk [vmem:[#allocation2 + $0x98] sm:$0xff] %vm863_vm3, %v1956_v48 }
 0x35b   : > { %v1893_v19 = vpop.f32.mrf.mxu1  ;;  %v1932_v12 = vpop.f32.mrf.mxu0 }
 0x35c   : > { %v7679_v53 = vadd.f32 %v1893_v19, %v7625_v28  ;;  %v1958_v16 = vadd.f32 %v1932_v12, %v1640_v34  ;;  %v7689_v28 = vld [vmem:[%s8773_s3] sm:$0x3] }
 0x35d   : > { %v7693_v40 = vperm.slane %v7689_v28, 0 }
 0x35e   : > { %1982 = vst.msk [vmem:[#allocation2 + $0xa8] sm:$0xff] %vm863_vm3, %v1958_v16 }
 0x363   : > { %v7682_v49 = vpop.f32.mrf.mxu1  ;;  %v1934_v58 = vpop.f32.mrf.mxu0 }
 0x364   : > { %v1960_v59 = vadd.f32 %v1934_v58, %v1642_v55  ;;  %v1998_v58 = vld [vmem:[#allocation2 + $0x68] sm:$0xff] }
 0x366   : > { %1984 = vst.msk [vmem:[#allocation2 + $0xb8] sm:$0xff] %vm863_vm3, %v1960_v59 }
 0x36c   : > { %v2234_v18 = vpop.f32.mrf.mxu1  ;;  %v2273_v22 = vpop.f32.mrf.mxu0 }
 0x36d   : > { %v2303_v63 = vadd.f32 %v2234_v18, %v7636_v31  ;;  %v2304_v62 = vadd.f32 %v2273_v22, %v1986_v60  ;;  %v1951_v18 = vadd.f32 %v7668_v7, %v7608_v52  ;;  %v2000_v22 = vld [vmem:[#allocation2 + $0x78] sm:$0xff] }
 0x36f   : > { %2328 = vst.msk [vmem:[#allocation2 + $0x8] sm:$0xff] %vm863_vm3, %v2304_v62  ;;  %v2381_v31 = vadd.f32 %v7693_v40, %v2303_v63 }
 0x371   : > { %v2405_v24 = vmax.f32 %v2381_v31, 0.0  ;;  %v2002_v31 = vld [vmem:[#allocation2 + $0x88] sm:$0xff] }
 0x374   : > { %v2236_v51 = vpop.f32.mrf.mxu1  ;;  %v2275_v20 = vpop.f32.mrf.mxu0 }
 0x375   : > { %v2305_v21 = vadd.f32 %v2236_v51, %v1939_v15  ;;  %v2306_v23 = vadd.f32 %v2275_v20, %v1988_v10 }
 0x377   : > { %v2383_v17 = vadd.f32 %v7693_v40, %v2305_v21  ;;  %2330 = vst.msk [vmem:[#allocation2 + $0x18] sm:$0xff] %vm863_vm3, %v2306_v23 }
 0x379   : > { %v2407_v13 = vmax.f32 %v2383_v17, 0.0 }
 0x37b   : > { %v7700_v26 = vpack.c.bf16 %v2407_v13, %v2405_v24  ;;  %v1955_v24 = vadd.f32 %v7675_v54, %v7620_v14 }
 0x37c   : > { %v2239_v0 = vpop.f32.mrf.mxu1  ;;  %v2278_v35 = vpop.f32.mrf.mxu0 }
 0x37d   : > { %v2307_v29 = vadd.f32 %v2239_v0, %v7645_v56  ;;  %v2308_v45 = vadd.f32 %v2278_v35, %v1990_v1  ;;  %v2004_v0 = vld [vmem:[#allocation2 + $0x98] sm:$0xff] }
 0x37f   : > { %2332 = vst.msk [vmem:[#allocation2 + $0x28] sm:$0xff] %vm863_vm3, %v2308_v45  ;;  %v2385_v27 = vadd.f32 %v7693_v40, %v2307_v29 }
 0x381   : > { %v2409_v37 = vmax.f32 %v2385_v27, 0.0  ;;  %v1959_v27 = vadd.f32 %v7682_v49, %v7632_v30 }
 0x384   : > { %v2241_v25 = vpop.f32.mrf.mxu1  ;;  %v2280_v4 = vpop.f32.mrf.mxu0 }
 0x385   : > { %v2309_v5 = vadd.f32 %v2241_v25, %v1943_v38  ;;  %v2310_v32 = vadd.f32 %v2280_v4, %v1992_v2 }
 0x387   : > { %v2387_v6 = vadd.f32 %v7693_v40, %v2309_v5  ;;  %2334 = vst.msk [vmem:[#allocation2 + $0x38] sm:$0xff] %vm863_vm3, %v2310_v32  ;;  %v2006_v5 = vld [vmem:[#allocation2 + $0xa8] sm:$0xff] }
 0x389   : > { %v2411_v8 = vmax.f32 %v2387_v6, 0.0 }
 0x38b   : > { %v7709_v56 = vpack.c.bf16 %v2411_v8, %v2409_v37  ;;  %v2008_v37 = vld [vmem:[#allocation2 + $0xb8] sm:$0xff] }
 0x38c   : > { %v2244_v9 = vpop.f32.mrf.mxu1  ;;  %v2283_v39 = vpop.f32.mrf.mxu0 }
 0x38d   : > { %v2311_v57 = vadd.f32 %v2244_v9, %v7654_v44  ;;  %v2312_v61 = vadd.f32 %v2283_v39, %v1994_v50 }
 0x38f   : > { %2336 = vst.msk [vmem:[#allocation2 + $0x48] sm:$0xff] %vm863_vm3, %v2312_v61  ;;  %v2389_v19 = vadd.f32 %v7693_v40, %v2311_v57 }
 0x391   : > { %v2413_v12 = vmax.f32 %v2389_v19, 0.0 }
 0x394   : > { %v2246_v42 = vpop.f32.mrf.mxu1  ;;  %v2285_v41 = vpop.f32.mrf.mxu0 }
 0x395   : > { %v2313_v46 = vadd.f32 %v2246_v42, %v1947_v47  ;;  %v2314_v48 = vadd.f32 %v2285_v41, %v1996_v43  ;;  %v2378_v43 = vperm.slane %v7689_v28, 1 }
 0x397   : > { %v2391_v34 = vadd.f32 %v7693_v40, %v2313_v46  ;;  %2338 = vst.msk [vmem:[#allocation2 + $0x58] sm:$0xff] %vm863_vm3, %v2314_v48 }
 0x399   : > { %v2415_v16 = vmax.f32 %v2391_v34, 0.0 }
 0x39b   : > { %v7718_v44 = vpack.c.bf16 %v2415_v16, %v2413_v12 }
 0x39c   : > { %v2249_v55 = vpop.f32.mrf.mxu1  ;;  %v2288_v59 = vpop.f32.mrf.mxu0 }
 0x39d   : > { %v2315_v33 = vadd.f32 %v2249_v55, %v7663_v36  ;;  %v2316_v3 = vadd.f32 %v2288_v59, %v1998_v58 }
 0x39e   : > { %v2362_v28 = vld [vmem:[#allocation2 + $0x58] sm:$0xff] }
 0x39f   : > { %2340 = vst.msk [vmem:[#allocation2 + $0x68] sm:$0xff] %vm863_vm3, %v2316_v3  ;;  %v2393_v51 = vadd.f32 %v7693_v40, %v2315_v33 }
 0x3a1   : > { %v2417_v20 = vmax.f32 %v2393_v51, 0.0 }
 0x3a4   : > { %v2251_v60 = vpop.f32.mrf.mxu1  ;;  %v2290_v63 = vpop.f32.mrf.mxu0 }
 0x3a5   : > { %v2317_v62 = vadd.f32 %v2251_v60, %v1951_v18  ;;  %v2318_v15 = vadd.f32 %v2290_v63, %v2000_v22  ;;  %v2360_v60 = vld [vmem:[#allocation2 + $0x48] sm:$0xff] }
 0x3a6   : > { %v2364_v55 = vld [vmem:[#allocation2 + $0x68] sm:$0xff] }
 0x3a7   : > { %v2395_v10 = vadd.f32 %v7693_v40, %v2317_v62  ;;  %2342 = vst.msk [vmem:[#allocation2 + $0x78] sm:$0xff] %vm863_vm3, %v2318_v15  ;;  %v2394_v18 = vadd.f32 %v2378_v43, %v2364_v55  ;;  %v2392_v62 = vadd.f32 %v2378_v43, %v2362_v28  ;;  %v2358_v15 = vld [vmem:[#allocation2 + $0x38] sm:$0xff]  ;;  %v6535_v28 = vld [vmem:[#allocation9 + $0xf8] sm:$0xff] }
 0x3a9   : > { %v2419_v21 = vmax.f32 %v2395_v10, 0.0  ;;  %v2418_v51 = vmax.f32 %v2394_v18, 0.0  ;;  %v2390_v10 = vadd.f32 %v2378_v43, %v2360_v60  ;;  %v6522_v18 = vld [vmem:[#allocation9 + $0xa0] sm:$0xff]  ;;  %v6534_v60 = vld [vmem:[#allocation9 + $0xf0] sm:$0xff] }
 0x3ab   : > { %v7727_v36 = vpack.c.bf16 %v2419_v21, %v2417_v20  ;;  %v2356_v20 = vld [vmem:[#allocation2 + $0x28] sm:$0xff] }
 0x3ac   : > { %v2254_v23 = vpop.f32.mrf.mxu1  ;;  %v2293_v17 = vpop.f32.mrf.mxu0 }
 0x3ad   : > { %v2319_v52 = vadd.f32 %v2254_v23, %v7672_v11  ;;  %v2320_v7 = vadd.f32 %v2293_v17, %v2002_v31  ;;  %v2416_v23 = vmax.f32 %v2392_v62, 0.0  ;;  %v2388_v31 = vadd.f32 %v2378_v43, %v2358_v15  ;;  %v2354_v17 = vld [vmem:[#allocation2 + $0x18] sm:$0xff] }
 0x3ae   : > { %v6533_v62 = vld [vmem:[#allocation9 + $0xe8] sm:$0xff] }
 0x3af   : > { %2344 = vst.msk [vmem:[#allocation2 + $0x88] sm:$0xff] %vm863_vm3, %v2320_v7  ;;  %v2397_v45 = vadd.f32 %v7693_v40, %v2319_v52  ;;  %v2414_v52 = vmax.f32 %v2390_v10, 0.0  ;;  %v2386_v7 = vadd.f32 %v2378_v43, %v2356_v20 }
 0x3b1   : > { %v2421_v25 = vmax.f32 %v2397_v45, 0.0 }
 0x3b4   : > { %v2256_v13 = vpop.f32.mrf.mxu1  ;;  %v2295_v1 = vpop.f32.mrf.mxu0 }
 0x3b5   : > { %v2321_v35 = vadd.f32 %v2256_v13, %v1955_v24  ;;  %v2322_v29 = vadd.f32 %v2295_v1, %v2004_v0  ;;  %v2352_v24 = vld [vmem:[#allocation2 + $0x8] sm:$0xff]  ;;  %v7762_v13 = vpack.c.bf16 %v2416_v23, %v2414_v52  ;;  %v2412_v0 = vmax.f32 %v2388_v31, 0.0  ;;  %v6530_v31 = vld [vmem:[#allocation9 + $0xd0] sm:$0xff] }
 0x3b6   : > { %v2368_v46 = vld [vmem:[#allocation2 + $0x88] sm:$0xff]  ;;  %v2384_v1 = vadd.f32 %v2378_v43, %v2354_v17  ;;  %v2382_v45 = vadd.f32 %v2378_v43, %v2352_v24  ;;  %v6529_v24 = vld [vmem:[#allocation9 + $0xc8] sm:$0xff] }
 0x3b7   : > { %v2399_v38 = vadd.f32 %v7693_v40, %v2321_v35  ;;  %2346 = vst.msk [vmem:[#allocation2 + $0x98] sm:$0xff] %vm863_vm3, %v2322_v29  ;;  %v2398_v16 = vadd.f32 %v2378_v43, %v2368_v46  ;;  %v6498_v35 = vld [vmem:[#allocation7] sm:$0xff]  ;;  %v2410_v29 = vmax.f32 %v2386_v7, 0.0  ;;  %v6539_v7 = vld [vmem:[#allocation9 + $0x118] sm:$0xff] }
 0x3b9   : > { %v2423_v2 = vmax.f32 %v2399_v38, 0.0  ;;  %v2422_v3 = vmax.f32 %v2398_v16, 0.0  ;;  %v7767_v38 = vpack.c.bf16 %v2412_v0, %v2410_v29  ;;  %v6514_v16 = vld [vmem:[#allocation9 + $0x60] sm:$0xff]  ;;  %v6538_v0 = vld [vmem:[#allocation9 + $0x110] sm:$0xff] }
 0x3bb   : > { %v7736_v11 = vpack.c.bf16 %v2423_v2, %v2421_v25  ;;  %v2408_v25 = vmax.f32 %v2384_v1, 0.0  ;;  %v2406_v2 = vmax.f32 %v2382_v45, 0.0  ;;  %v6528_v1 = vld [vmem:[#allocation9 + $0xc0] sm:$0xff]  ;;  %v6537_v45 = vld [vmem:[#allocation9 + $0x108] sm:$0xff] }
 0x3bc   : > { %v2259_v4 = vpop.f32.mrf.mxu1  ;;  %v2298_v32 = vpop.f32.mrf.mxu0 }
 0x3bd   : > { %v2323_v14 = vadd.f32 %v2259_v4, %v7679_v53  ;;  %v2324_v54 = vadd.f32 %v2298_v32, %v2006_v5  ;;  %v7772_v4 = vpack.c.bf16 %v2408_v25, %v2406_v2  ;;  %v6499_v5 = vld [vmem:[#allocation7 + $0x8] sm:$0xff]  ;;  %v6512_v32 = vld [vmem:[#allocation7 + $0x10] sm:$0xff] }
 0x3be   : > { %v2370_v30 = vld [vmem:[#allocation2 + $0x98] sm:$0xff]  ;;  %v6536_v2 = vld [vmem:[#allocation9 + $0x100] sm:$0xff] }
 0x3bf   : > { %2348 = vst.msk [vmem:[#allocation2 + $0xa8] sm:$0xff] %vm863_vm3, %v2324_v54  ;;  %v2401_v39 = vadd.f32 %v7693_v40, %v2323_v14  ;;  %v2400_v19 = vadd.f32 %v2378_v43, %v2370_v30  ;;  %v6513_v14 = vld [vmem:[#allocation7 + $0x18] sm:$0xff]  ;;  %v6526_v54 = vld [vmem:[#allocation7 + $0x20] sm:$0xff]  ;;  %v6518_v30 = vld [vmem:[#allocation9 + $0x80] sm:$0xff] }
 0x3c1   : > { %v2425_v61 = vmax.f32 %v2401_v39, 0.0  ;;  %v2424_v59 = vmax.f32 %v2400_v19, 0.0  ;;  %v6500_v39 = vld [vmem:[#allocation9] sm:$0xff]  ;;  %v6525_v19 = vld [vmem:[#allocation9 + $0xb8] sm:$0xff] }
 0x3c3   : > { %v7754_v22 = vpack.c.bf16 %v2424_v59, %v2422_v3  ;;  %v6555_v59 = vld [vmem:[#allocation7 + $0x48] sm:$0xff] }
 0x3c4   : > { %v2261_v6 = vpop.f32.mrf.mxu1  ;;  %v2300_v8 = vpop.f32.mrf.mxu0 }
 0x3c5   : > { %v2325_v9 = vadd.f32 %v2261_v6, %v1959_v27  ;;  %v2326_v50 = vadd.f32 %v2300_v8, %v2008_v37  ;;  %v6507_v27 = vld [vmem:[#allocation9 + $0x38] sm:$0xff]  ;;  %v6540_v8 = vld [vmem:[#allocation7 + $0x30] sm:$0xff] }
 0x3c6   : > { %v2372_v42 = vld [vmem:[#allocation2 + $0xa8] sm:$0xff]  ;;  %2605 = vmatpush.bf16.msrb.mxu1 %v6507_v27  ;;  %v6546_v27 = vld [vmem:[#allocation9 + $0x140] sm:$0xff] }
 0x3c7   : > { %v2403_v57 = vadd.f32 %v7693_v40, %v2325_v9  ;;  %2350 = vst.msk [vmem:[#allocation2 + $0xb8] sm:$0xff] %vm863_vm3, %v2326_v50  ;;  %v2402_v49 = vadd.f32 %v2378_v43, %v2372_v42  ;;  %v2366_v40 = vld [vmem:[#allocation2 + $0x78] sm:$0xff]  ;;  %v6527_v6 = vld [vmem:[#allocation7 + $0x28] sm:$0xff]  ;;  %v6510_v50 = vld [vmem:[#allocation9 + $0x50] sm:$0xff] }
 0x3c8   : > { %v2396_v33 = vadd.f32 %v2378_v43, %v2366_v40  ;;  %v6511_v37 = vld [vmem:[#allocation9 + $0x58] sm:$0xff]  ;;  %v6501_v9 = vld [vmem:[#allocation9 + $0x8] sm:$0xff]  ;;  %v6520_v42 = vld [vmem:[#allocation9 + $0x90] sm:$0xff] }
 0x3c9   : > { %v2427_v47 = vmax.f32 %v2403_v57, 0.0  ;;  %v2426_v34 = vmax.f32 %v2402_v49, 0.0  ;;  %2628 = vmatpush.bf16.msrb.mxu0 %v6511_v37  ;;  %v6541_v57 = vld [vmem:[#allocation7 + $0x38] sm:$0xff]  ;;  %v6554_v49 = vld [vmem:[#allocation7 + $0x40] sm:$0xff] }
 0x3ca   : > { %v2420_v63 = vmax.f32 %v2396_v33, 0.0  ;;  %v6515_v40 = vld [vmem:[#allocation9 + $0x68] sm:$0xff] }
 0x3cb   : > { %v7745_v53 = vpack.c.bf16 %v2427_v47, %v2425_v61  ;;  %v6509_v61 = vld [vmem:[#allocation9 + $0x48] sm:$0xff]  ;;  %v6521_v47 = vld [vmem:[#allocation9 + $0x98] sm:$0xff] }
 0x3cc   : > { %v7758_v21 = vpack.c.bf16 %v2420_v63, %v2418_v51  ;;  %v6523_v33 = vld [vmem:[#allocation9 + $0xa8] sm:$0xff]  ;;  %v6532_v51 = vld [vmem:[#allocation9 + $0xe0] sm:$0xff] }
 0x3cd   : > { %2463 = vmatpush.bf16.msrb.mxu2 %v7745_v53  ;;  %2629 = vmatpush.bf16.msrb.mxu0 %v6510_v50 }
 0x3ce   : > { %v2374_v41 = vld [vmem:[#allocation2 + $0xb8] sm:$0xff] }
 0x3cf   : > { %v2404_v48 = vadd.f32 %v2378_v43, %v2374_v41  ;;  %v6519_v43 = vld [vmem:[#allocation9 + $0x88] sm:$0xff]  ;;  %v6517_v41 = vld [vmem:[#allocation9 + $0x78] sm:$0xff] }
 0x3d1   : > { %2464 = vmatpush.bf16.msrb.mxu2 %v7736_v11  ;;  %v2428_v12 = vmax.f32 %v2404_v48, 0.0  ;;  %2630 = vmatpush.bf16.msrb.mxu0 %v6509_v61  ;;  %v6516_v48 = vld [vmem:[#allocation9 + $0x70] sm:$0xff] }
 0x3d3   : > { %v7750_v58 = vpack.c.bf16 %v2428_v12, %v2426_v34  ;;  %v6524_v12 = vld [vmem:[#allocation9 + $0xb0] sm:$0xff] }
 0x3d5   : > { %2465 = vmatpush.bf16.msrb.mxu2 %v7727_v36  ;;  %2482 = vmatpush.bf16.msrb.mxu3 %v7750_v58 }
 0x3d9   : > { %2466 = vmatpush.bf16.msrb.mxu2 %v7718_v44  ;;  %2483 = vmatpush.bf16.msrb.mxu3 %v7754_v22 }
 0x3dd   : > { %2467 = vmatpush.bf16.msrb.mxu2 %v7709_v56  ;;  %2484 = vmatpush.bf16.msrb.mxu3 %v7758_v21 }
 0x3e1   : > { %2468 = vmatpush.bf16.msrb.mxu2 %v7700_v26  ;;  %2485 = vmatpush.bf16.msrb.mxu3 %v7762_v13 }
 0x3e4   : > { %5458 = vmatmul.msk.bf16.vlgmr.msrb.gmra.mxu2 %vm633_vm0, %v6498_v35 }
 0x3e5   : > { %2674 = vmatpush.bf16.msra.mxu2 %v7745_v53  ;;  %2486 = vmatpush.bf16.msrb.mxu3 %v7767_v38 }
 0x3e9   : > { %2675 = vmatpush.bf16.msra.mxu2 %v7736_v11  ;;  %2487 = vmatpush.bf16.msrb.mxu3 %v7772_v4 }
 0x3ec   : > { %5460 = vmatmul.msk.bf16.vlgmr.msrb.gmra.mxu3 %vm633_vm0, %v6498_v35 }
 0x3ed   : > { %2676 = vmatpush.bf16.msra.mxu2 %v7727_v36  ;;  %2693 = vmatpush.bf16.msra.mxu3 %v7750_v58 }
 0x3f1   : > { %2677 = vmatpush.bf16.msra.mxu2 %v7718_v44  ;;  %2694 = vmatpush.bf16.msra.mxu3 %v7754_v22 }
 0x3f4   : > { %5459 = vmatmul.msk.bf16.gmra.mxu2 %vm633_vm0, %v6499_v5 }
 0x3f5   : > { %2678 = vmatpush.bf16.msra.mxu2 %v7709_v56  ;;  %2695 = vmatpush.bf16.msra.mxu3 %v7758_v21 }
 0x3f9   : > { %2679 = vmatpush.bf16.msra.mxu2 %v7700_v26  ;;  %2696 = vmatpush.bf16.msra.mxu3 %v7762_v13 }
 0x3fc   : > { %5461 = vmatmul.msk.bf16.gmra.mxu3 %vm633_vm0, %v6499_v5 }
 0x3fd   : > { %2890 = vmatpush.bf16.msrb.mxu2 %v7745_v53  ;;  %2697 = vmatpush.bf16.msra.mxu3 %v7767_v38 }
 0x401   : > { %2891 = vmatpush.bf16.msrb.mxu2 %v7736_v11  ;;  %2698 = vmatpush.bf16.msra.mxu3 %v7772_v4 }
 0x404   : > { %5520 = vmatmul.msk.bf16.vlgmr.msra.gmra.mxu2 %vm633_vm0, %v6512_v32 }
 0x405   : > { %2892 = vmatpush.bf16.msrb.mxu2 %v7727_v36  ;;  %2909 = vmatpush.bf16.msrb.mxu3 %v7750_v58 }
 0x409   : > { %2893 = vmatpush.bf16.msrb.mxu2 %v7718_v44  ;;  %2910 = vmatpush.bf16.msrb.mxu3 %v7754_v22 }
 0x40c   : > { %5522 = vmatmul.msk.bf16.vlgmr.msra.gmra.mxu3 %vm633_vm0, %v6512_v32 }
 0x40d   : > { %2894 = vmatpush.bf16.msrb.mxu2 %v7709_v56  ;;  %2911 = vmatpush.bf16.msrb.mxu3 %v7758_v21 }
 0x411   : > { %2895 = vmatpush.bf16.msrb.mxu2 %v7700_v26  ;;  %2912 = vmatpush.bf16.msrb.mxu3 %v7762_v13 }
 0x414   : > { %5521 = vmatmul.msk.bf16.gmra.mxu2 %vm633_vm0, %v6513_v14 }
 0x415   : > { %3106 = vmatpush.bf16.msra.mxu2 %v7745_v53  ;;  %2913 = vmatpush.bf16.msrb.mxu3 %v7767_v38 }
 0x419   : > { %3107 = vmatpush.bf16.msra.mxu2 %v7736_v11  ;;  %2914 = vmatpush.bf16.msrb.mxu3 %v7772_v4 }
 0x41c   : > { %5523 = vmatmul.msk.bf16.gmra.mxu3 %vm633_vm0, %v6513_v14  ;;  %v6547_v14 = vld [vmem:[#allocation9 + $0x148] sm:$0xff] }
 0x41d   : > { %3125 = vmatpush.bf16.msra.mxu3 %v7750_v58  ;;  %3108 = vmatpush.bf16.msra.mxu2 %v7727_v36 }
 0x421   : > { %3126 = vmatpush.bf16.msra.mxu3 %v7754_v22  ;;  %3109 = vmatpush.bf16.msra.mxu2 %v7718_v44 }
 0x424   : > { %5582 = vmatmul.msk.bf16.vlgmr.msrb.gmra.mxu2 %vm633_vm0, %v6526_v54 }
 0x425   : > { %3110 = vmatpush.bf16.msra.mxu2 %v7709_v56  ;;  %3127 = vmatpush.bf16.msra.mxu3 %v7758_v21 }
 0x429   : > { %3111 = vmatpush.bf16.msra.mxu2 %v7700_v26  ;;  %3128 = vmatpush.bf16.msra.mxu3 %v7762_v13 }
 0x42c   : > { %5584 = vmatmul.msk.bf16.vlgmr.msrb.gmra.mxu3 %vm633_vm0, %v6526_v54 }
 0x42d   : > { %3322 = vmatpush.bf16.msrb.mxu2 %v7745_v53  ;;  %3129 = vmatpush.bf16.msra.mxu3 %v7767_v38  ;;  %v6508_v53 = vld [vmem:[#allocation9 + $0x40] sm:$0xff] }
 0x42e   : > { %2631 = vmatpush.bf16.msrb.mxu0 %v6508_v53  ;;  %v6551_v53 = vld [vmem:[#allocation9 + $0x168] sm:$0xff] }
 0x431   : > { %3323 = vmatpush.bf16.msrb.mxu2 %v7736_v11  ;;  %3130 = vmatpush.bf16.msra.mxu3 %v7772_v4  ;;  %v6506_v11 = vld [vmem:[#allocation9 + $0x30] sm:$0xff] }
 0x432   : > { %2606 = vmatpush.bf16.msrb.mxu1 %v6506_v11  ;;  %2840 = vmatpush.bf16.msra.mxu0 %v6525_v19 }
 0x434   : > { %5583 = vmatmul.msk.bf16.gmra.mxu2 %vm633_vm0, %v6527_v6 }
 0x435   : > { %3324 = vmatpush.bf16.msrb.mxu2 %v7727_v36  ;;  %3341 = vmatpush.bf16.msrb.mxu3 %v7750_v58  ;;  %v6505_v36 = vld [vmem:[#allocation9 + $0x28] sm:$0xff] }
 0x436   : > { %2607 = vmatpush.bf16.msrb.mxu1 %v6505_v36  ;;  %2841 = vmatpush.bf16.msra.mxu0 %v6524_v12  ;;  %v6545_v36 = vld [vmem:[#allocation9 + $0x138] sm:$0xff] }
 0x439   : > { %3325 = vmatpush.bf16.msrb.mxu2 %v7718_v44  ;;  %3342 = vmatpush.bf16.msrb.mxu3 %v7754_v22  ;;  %v6504_v44 = vld [vmem:[#allocation9 + $0x20] sm:$0xff] }
 0x43a   : > { %2608 = vmatpush.bf16.msrb.mxu1 %v6504_v44  ;;  %2842 = vmatpush.bf16.msra.mxu0 %v6523_v33  ;;  %v6544_v44 = vld [vmem:[#allocation9 + $0x130] sm:$0xff] }
 0x43c   : > { %5585 = vmatmul.msk.bf16.gmra.mxu3 %vm633_vm0, %v6527_v6 }
 0x43d   : > { %3326 = vmatpush.bf16.msrb.mxu2 %v7709_v56  ;;  %3343 = vmatpush.bf16.msrb.mxu3 %v7758_v21  ;;  %v6503_v56 = vld [vmem:[#allocation9 + $0x18] sm:$0xff] }
 0x43e   : > { %2609 = vmatpush.bf16.msrb.mxu1 %v6503_v56  ;;  %2843 = vmatpush.bf16.msra.mxu0 %v6522_v18  ;;  %v6531_v21 = vld [vmem:[#allocation9 + $0xd8] sm:$0xff] }
 0x441   : > { %3327 = vmatpush.bf16.msrb.mxu2 %v7700_v26  ;;  %3344 = vmatpush.bf16.msrb.mxu3 %v7762_v13  ;;  %v6502_v26 = vld [vmem:[#allocation9 + $0x10] sm:$0xff] }
 0x442   : > { %2610 = vmatpush.bf16.msrb.mxu1 %v6502_v26  ;;  %v6553_v26 = vld [vmem:[#allocation9 + $0x178] sm:$0xff] }
 0x444   : > { %5644 = vmatmul.msk.bf16.vlgmr.msra.gmra.mxu2 %vm633_vm0, %v6540_v8 }
 0x445   : > { %3345 = vmatpush.bf16.msrb.mxu3 %v7767_v38  ;;  %v6549_v38 = vld [vmem:[#allocation9 + $0x158] sm:$0xff] }
 0x446   : > { %2611 = vmatpush.bf16.msrb.mxu1 %v6501_v9  ;;  %v6543_v9 = vld [vmem:[#allocation9 + $0x128] sm:$0xff] }
 0x449   : > { %3346 = vmatpush.bf16.msrb.mxu3 %v7772_v4  ;;  %v6548_v4 = vld [vmem:[#allocation9 + $0x150] sm:$0xff] }
 0x44a   : > { %2612 = vmatpush.bf16.msrb.mxu1 %v6500_v39  ;;  %v6552_v39 = vld [vmem:[#allocation9 + $0x170] sm:$0xff] }
 0x44c   : > { %5646 = vmatmul.msk.bf16.vlgmr.msra.gmra.mxu3 %vm633_vm0, %v6540_v8 }
 0x44e   : > { %2817 = vmatpush.bf16.msra.mxu1 %v6521_v47 }
 0x452   : > { %2818 = vmatpush.bf16.msra.mxu1 %v6520_v42  ;;  %v6563_v42 = vld [vmem:[#allocation9 + $0x1b8] sm:$0xff] }
 0x454   : > { %5645 = vmatmul.msk.bf16.gmra.mxu2 %vm633_vm0, %v6541_v57 }
 0x456   : > { %2819 = vmatpush.bf16.msra.mxu1 %v6519_v43 }
 0x45a   : > { %2820 = vmatpush.bf16.msra.mxu1 %v6518_v30  ;;  %v6550_v30 = vld [vmem:[#allocation9 + $0x160] sm:$0xff] }
 0x45c   : > { %5647 = vmatmul.msk.bf16.gmra.mxu3 %vm633_vm0, %v6541_v57  ;;  %v6542_v57 = vld [vmem:[#allocation9 + $0x120] sm:$0xff] }
 0x45e   : > { %2821 = vmatpush.bf16.msra.mxu1 %v6517_v41 }
 0x462   : > { %2822 = vmatpush.bf16.msra.mxu1 %v6516_v48  ;;  %v6561_v48 = vld [vmem:[#allocation9 + $0x1a8] sm:$0xff] }
 0x464   : > { %5706 = vmatmul.msk.bf16.vlgmr.msrb.gmra.mxu2 %vm633_vm0, %v6554_v49 }
 0x466   : > { %2823 = vmatpush.bf16.msra.mxu1 %v6515_v40  ;;  %v6560_v40 = vld [vmem:[#allocation9 + $0x1a0] sm:$0xff] }
 0x467   : > { %v2470_v46 = vpop.f32.mrf.mxu2 }
 0x46a   : > { %2824 = vmatpush.bf16.msra.mxu1 %v6514_v16  ;;  %v6559_v16 = vld [vmem:[#allocation9 + $0x198] sm:$0xff] }
 0x46c   : > { %5708 = vmatmul.msk.bf16.vlgmr.msrb.gmra.mxu3 %vm633_vm0, %v6554_v49  ;;  %v6562_v49 = vld [vmem:[#allocation9 + $0x1b0] sm:$0xff] }
 0x46f   : > { %v2472_v34 = vpop.f32.mrf.mxu2  ;;  %v2489_v55 = vpop.f32.mrf.mxu3 }
 0x470   : > { %v2499_v58 = vpack.c.bf16 %v2472_v34, %v2470_v46 }
 0x472   : > { %2613 = vmatmul.bf16.vlgmr.msrb.gmra.mxu1 %v2499_v58  ;;  %v6558_v58 = vld [vmem:[#allocation9 + $0x190] sm:$0xff] }
 0x473   : > { %3033 = vmatpush.bf16.msrb.mxu1 %v6535_v28  ;;  %v6567_v28 = vld [vmem:[#allocation9 + $0x1d8] sm:$0xff] }
 0x474   : > { %5707 = vmatmul.msk.bf16.gmra.mxu2 %vm633_vm0, %v6555_v59 }
 0x477   : > { %v2475_v3 = vpop.f32.mrf.mxu2  ;;  %v2491_v22 = vpop.f32.mrf.mxu3  ;;  %3034 = vmatpush.bf16.msrb.mxu1 %v6534_v60  ;;  %v6566_v60 = vld [vmem:[#allocation9 + $0x1d0] sm:$0xff] }
 0x478   : > { %v2500_v63 = vpack.c.bf16 %v2491_v22, %v2489_v55  ;;  %v6556_v22 = vld [vmem:[#allocation9 + $0x180] sm:$0xff] }
 0x47a   : > { %5510 = vmatmul.msk.bf16.vlgmr.msrb.gmra.mxu0 %vm863_vm3, %v2500_v63 }
 0x47b   : > { %3035 = vmatpush.bf16.msrb.mxu1 %v6533_v62  ;;  %3056 = vmatpush.bf16.msrb.mxu0 %v6539_v7 }
 0x47c   : > { %5709 = vmatmul.msk.bf16.gmra.mxu3 %vm633_vm0, %v6555_v59 }
 0x47f   : > { %v2477_v15 = vpop.f32.mrf.mxu2  ;;  %v2494_v10 = vpop.f32.mrf.mxu3  ;;  %3036 = vmatpush.bf16.msrb.mxu1 %v6532_v51  ;;  %3057 = vmatpush.bf16.msrb.mxu0 %v6538_v0 }
 0x480   : > { %v2501_v20 = vpack.c.bf16 %v2477_v15, %v2475_v3  ;;  %v6557_v3 = vld [vmem:[#allocation9 + $0x188] sm:$0xff] }
 0x481   : > { %v6565_v15 = vld [vmem:[#allocation9 + $0x1c8] sm:$0xff] }
 0x482   : > { %2618 = vmatmul.bf16.gmra.mxu1 %v2501_v20 }
 0x483   : > { %3037 = vmatpush.bf16.msrb.mxu1 %v6531_v21  ;;  %3058 = vmatpush.bf16.msrb.mxu0 %v6537_v45 }
 0x487   : > { %v2681_v23 = vpop.f32.mrf.mxu2  ;;  %v2496_v17 = vpop.f32.mrf.mxu3  ;;  %3038 = vmatpush.bf16.msrb.mxu1 %v6530_v31  ;;  %3059 = vmatpush.bf16.msrb.mxu0 %v6536_v2 }
 0x488   : > { %v2502_v52 = vpack.c.bf16 %v2496_v17, %v2494_v10  ;;  %v6564_v10 = vld [vmem:[#allocation9 + $0x1c0] sm:$0xff] }
 0x48a   : > { %5511 = vmatmul.msk.bf16.gmra.mxu0 %vm863_vm3, %v2502_v52 }
 0x48b   : > { %3039 = vmatpush.bf16.msrb.mxu1 %v6529_v24 }
 0x48f   : > { %v2683_v13 = vpop.f32.mrf.mxu2  ;;  %v2700_v35 = vpop.f32.mrf.mxu3  ;;  %3040 = vmatpush.bf16.msrb.mxu1 %v6528_v1 }
 0x490   : > { %v2710_v29 = vpack.c.bf16 %v2683_v13, %v2681_v23 }
 0x492   : > { %2825 = vmatmul.bf16.vlgmr.msra.gmra.mxu1 %v2710_v29 }
 0x493   : > { %3249 = vmatpush.bf16.msra.mxu1 %v6549_v38 }
 0x497   : > { %v2686_v25 = vpop.f32.mrf.mxu2  ;;  %v2702_v5 = vpop.f32.mrf.mxu3  ;;  %3250 = vmatpush.bf16.msra.mxu1 %v6548_v4 }
 0x498   : > { %v2711_v32 = vpack.c.bf16 %v2702_v5, %v2700_v35 }
 0x49a   : > { %5572 = vmatmul.msk.bf16.vlgmr.msra.gmra.mxu0 %vm863_vm3, %v2711_v32 }
 0x49b   : > { %3251 = vmatpush.bf16.msra.mxu1 %v6547_v14  ;;  %3272 = vmatpush.bf16.msra.mxu0 %v6553_v26 }
 0x49f   : > { %v2688_v54 = vpop.f32.mrf.mxu2  ;;  %v2705_v6 = vpop.f32.mrf.mxu3  ;;  %3252 = vmatpush.bf16.msra.mxu1 %v6546_v27  ;;  %3273 = vmatpush.bf16.msra.mxu0 %v6552_v39 }
 0x4a0   : > { %v2712_v11 = vpack.c.bf16 %v2688_v54, %v2686_v25 }
 0x4a2   : > { %2830 = vmatmul.bf16.gmra.mxu1 %v2712_v11 }
 0x4a3   : > { %3253 = vmatpush.bf16.msra.mxu1 %v6545_v36  ;;  %3274 = vmatpush.bf16.msra.mxu0 %v6551_v53  ;;  %v5874_v53 = vld [vmem:[%s8777_s7 + $0xe0] sm:$0xf] }
 0x4a7   : > { %v2897_v37 = vpop.f32.mrf.mxu2  ;;  %v2707_v8 = vpop.f32.mrf.mxu3  ;;  %3254 = vmatpush.bf16.msra.mxu1 %v6544_v44  ;;  %3275 = vmatpush.bf16.msra.mxu0 %v6550_v30 }
 0x4a8   : > { %v2713_v56 = vpack.c.bf16 %v2707_v8, %v2705_v6 }
 0x4aa   : > { %5573 = vmatmul.msk.bf16.gmra.mxu0 %vm863_vm3, %v2713_v56 }
 0x4ab   : > { %3255 = vmatpush.bf16.msra.mxu1 %v6543_v9 }
 0x4af   : > { %v2899_v50 = vpop.f32.mrf.mxu2  ;;  %v2916_v61 = vpop.f32.mrf.mxu3  ;;  %3256 = vmatpush.bf16.msra.mxu1 %v6542_v57 }
 0x4b0   : > { %v2926_v47 = vpack.c.bf16 %v2899_v50, %v2897_v37 }
 0x4b2   : > { %3041 = vmatmul.bf16.vlgmr.msrb.gmra.mxu1 %v2926_v47 }
 0x4b3   : > { %3465 = vmatpush.bf16.msrb.mxu1 %v6563_v42  ;;  %v6598_v42 = vld [vmem:[%s8777_s7 + $0xec] sm:$0xf0] }
 0x4b4   : > { %v5875_v30 = vor.u32 %v6598_v42, %v5874_v53  ;;  %v5762_v42 = vld [vmem:[%s8777_s7] sm:$0xf] }
 0x4b6   : > { %4309 = vmatpush.bf16.msra.mxu2 %v5875_v30  ;;  %v5922_v30 = vld [vmem:[%s8777_s7 + $0x140] sm:$0xf] }
 0x4b7   : > { %v2902_v43 = vpop.f32.mrf.mxu2  ;;  %v2918_v41 = vpop.f32.mrf.mxu3  ;;  %3466 = vmatpush.bf16.msrb.mxu1 %v6562_v49 }
 0x4b8   : > { %v2927_v46 = vpack.c.bf16 %v2918_v41, %v2916_v61 }
 0x4ba   : > { %5634 = vmatmul.msk.bf16.vlgmr.msrb.gmra.mxu0 %vm863_vm3, %v2927_v46  ;;  %v5858_v46 = vld [vmem:[%s8777_s7 + $0xc0] sm:$0xf] }
 0x4bb   : > { %3467 = vmatpush.bf16.msrb.mxu1 %v6561_v48  ;;  %3488 = vmatpush.bf16.msrb.mxu0 %v6567_v28  ;;  %v6594_v48 = vld [vmem:[%s8777_s7 + $0xcc] sm:$0xf0] }
 0x4bf   : > { %v2904_v19 = vpop.f32.mrf.mxu2  ;;  %v2921_v34 = vpop.f32.mrf.mxu3  ;;  %3468 = vmatpush.bf16.msrb.mxu1 %v6560_v40  ;;  %3489 = vmatpush.bf16.msrb.mxu0 %v6566_v60  ;;  %v5986_v60 = vld [vmem:[%s8777_s7 + $0x1c0] sm:$0xf] }
 0x4c0   : > { %v2928_v12 = vpack.c.bf16 %v2904_v19, %v2902_v43  ;;  %v5859_v19 = vor.u32 %v6594_v48, %v5858_v46  ;;  %v6610_v46 = vld [vmem:[%s8777_s7 + $0x14c] sm:$0xf0]  ;;  %v6082_v48 = vld [vmem:[%s8777_s7 + $0x280] sm:$0xf] }
 0x4c2   : > { %3046 = vmatmul.bf16.gmra.mxu1 %v2928_v12  ;;  %4310 = vmatpush.bf16.msra.mxu2 %v5859_v19  ;;  %v6590_v12 = vld [vmem:[%s8777_s7 + $0xac] sm:$0xf0] }
 0x4c3   : > { %3469 = vmatpush.bf16.msrb.mxu1 %v6559_v16  ;;  %3490 = vmatpush.bf16.msrb.mxu0 %v6565_v15  ;;  %v6002_v16 = vld [vmem:[%s8777_s7 + $0x1e0] sm:$0xf]  ;;  %v6650_v19 = vld [vmem:[%s8777_s7 + $0x28c] sm:$0xf0] }
 0x4c7   : > { %v3113_v55 = vpop.f32.mrf.mxu2  ;;  %v2923_v59 = vpop.f32.mrf.mxu3  ;;  %3470 = vmatpush.bf16.msrb.mxu1 %v6558_v58  ;;  %3491 = vmatpush.bf16.msrb.mxu0 %v6564_v10  ;;  %v6582_v10 = vld [vmem:[%s8777_s7 + $0x6c] sm:$0xf0] }
 0x4c8   : > { %v2929_v33 = vpack.c.bf16 %v2923_v59, %v2921_v34  ;;  %v5842_v34 = vld [vmem:[%s8777_s7 + $0xa0] sm:$0xf]  ;;  %v6630_v59 = vld [vmem:[%s8777_s7 + $0x1ec] sm:$0xf0] }
 0x4c9   : > { %v5843_v58 = vor.u32 %v6590_v12, %v5842_v34  ;;  %v6003_v28 = vor.u32 %v6630_v59, %v6002_v16  ;;  %v5923_v34 = vor.u32 %v6610_v46, %v5922_v30  ;;  %v6083_v12 = vor.u32 %v6650_v19, %v6082_v48  ;;  %v6242_v16 = vld [vmem:[%s8777_s7 + $0x3c0] sm:$0xf]  ;;  %v5828_v30 = vld [vmem:[%s8777_s7 + $0x90] sm:$0xf0]  ;;  %v6624_v48 = vld [vmem:[%s8777_s7 + $0x1c4] sm:$0xf] }
 0x4ca   : > { %5635 = vmatmul.msk.bf16.gmra.mxu0 %vm863_vm3, %v2929_v33  ;;  %v5988_v19 = vld [vmem:[%s8777_s7 + $0x1d0] sm:$0xf0] }
 0x4cb   : > { %3471 = vmatpush.bf16.msrb.mxu1 %v6557_v3  ;;  %4311 = vmatpush.bf16.msra.mxu2 %v5843_v58  ;;  %v5826_v3 = vld [vmem:[%s8777_s7 + $0x80] sm:$0xf]  ;;  %v6596_v58 = vld [vmem:[%s8777_s7 + $0xe4] sm:$0xf] }
 0x4cc   : > { %4322 = vmatpush.bf16.msra.mxu3 %v6003_v28  ;;  %v5876_v28 = vld [vmem:[%s8777_s7 + $0xf0] sm:$0xf0] }
 0x4cf   : > { %v3115_v18 = vpop.f32.mrf.mxu2  ;;  %v3132_v63 = vpop.f32.mrf.mxu3  ;;  %3472 = vmatpush.bf16.msrb.mxu1 %v6556_v22 }
 0x4d0   : > { %v3142_v62 = vpack.c.bf16 %v3115_v18, %v3113_v55  ;;  %v6586_v18 = vld [vmem:[%s8777_s7 + $0x8c] sm:$0xf0] }
 0x4d1   : > { %v5827_v22 = vor.u32 %v6586_v18, %v5826_v3  ;;  %v5879_v18 = vor.u32 %v6596_v58, %v5876_v28  ;;  %v6580_v28 = vld [vmem:[%s8777_s7 + $0x64] sm:$0xf] }
 0x4d2   : > { %3257 = vmatmul.bf16.vlgmr.msra.gmra.mxu1 %v3142_v62 }
 0x4d3   : > { %4312 = vmatpush.bf16.msra.mxu2 %v5827_v22  ;;  %v6606_v22 = vld [vmem:[%s8777_s7 + $0x12c] sm:$0xf0] }
 0x4d7   : > { %v3118_v51 = vpop.f32.mrf.mxu2  ;;  %v3134_v20 = vpop.f32.mrf.mxu3 }
 0x4d8   : > { %v3143_v21 = vpack.c.bf16 %v3134_v20, %v3132_v63  ;;  %v6626_v63 = vld [vmem:[%s8777_s7 + $0x1cc] sm:$0xf0]  ;;  %v5970_v20 = vld [vmem:[%s8777_s7 + $0x1a0] sm:$0xf] }
 0x4d9   : > { %v5987_v62 = vor.u32 %v6626_v63, %v5986_v60  ;;  %v5906_v60 = vld [vmem:[%s8777_s7 + $0x120] sm:$0xf] }
 0x4da   : > { %5696 = vmatmul.msk.bf16.vlgmr.msra.gmra.mxu0 %vm863_vm3, %v3143_v21  ;;  %v6066_v63 = vld [vmem:[%s8777_s7 + $0x260] sm:$0xf] }
 0x4db   : > { %4323 = vmatpush.bf16.msra.mxu3 %v5987_v62 }
 0x4df   : > { %v3120_v23 = vpop.f32.mrf.mxu2  ;;  %v3137_v31 = vpop.f32.mrf.mxu3 }
 0x4e0   : > { %v3144_v17 = vpack.c.bf16 %v3120_v23, %v3118_v51  ;;  %v5810_v51 = vld [vmem:[%s8777_s7 + $0x60] sm:$0xf] }
 0x4e1   : > { %v5811_v23 = vor.u32 %v6582_v10, %v5810_v51  ;;  %v5907_v51 = vor.u32 %v6606_v22, %v5906_v60  ;;  %v6646_v10 = vld [vmem:[%s8777_s7 + $0x26c] sm:$0xf0] }
 0x4e2   : > { %3262 = vmatmul.bf16.gmra.mxu1 %v3144_v17  ;;  %v6130_v17 = vld [vmem:[%s8777_s7 + $0x2e0] sm:$0xf] }
 0x4e3   : > { %4313 = vmatpush.bf16.msra.mxu2 %v5811_v23  ;;  %v6686_v23 = vld [vmem:[%s8777_s7 + $0x3ac] sm:$0xf0] }
 0x4e7   : > { %v3329_v52 = vpop.f32.mrf.mxu2  ;;  %v3139_v7 = vpop.f32.mrf.mxu3 }
 0x4e8   : > { %v3145_v24 = vpack.c.bf16 %v3139_v7, %v3137_v31  ;;  %v6622_v31 = vld [vmem:[%s8777_s7 + $0x1ac] sm:$0xf0] }
 0x4e9   : > { %v5971_v7 = vor.u32 %v6622_v31, %v5970_v20  ;;  %v6226_v20 = vld [vmem:[%s8777_s7 + $0x3a0] sm:$0xf]  ;;  %v6067_v31 = vor.u32 %v6646_v10, %v6066_v63  ;;  %v6620_v63 = vld [vmem:[%s8777_s7 + $0x1a4] sm:$0xf] }
 0x4ea   : > { %5697 = vmatmul.msk.bf16.gmra.mxu0 %vm863_vm3, %v3145_v24  ;;  %v6660_v10 = vld [vmem:[%s8777_s7 + $0x2e4] sm:$0xf] }
 0x4eb   : > { %4324 = vmatpush.bf16.msra.mxu3 %v5971_v7  ;;  %v5860_v7 = vld [vmem:[%s8777_s7 + $0xd0] sm:$0xf0] }
 0x4ef   : > { %v2614_v13 = vpop.f32.mrf.mxu1  ;;  %v3331_v0 = vpop.f32.mrf.mxu2 }
 0x4f0   : > { %v3348_v1 = vpop.f32.mrf.mxu3  ;;  %v3358_v35 = vpack.c.bf16 %v3331_v0, %v3329_v52  ;;  %v6662_v52 = vld [vmem:[%s8777_s7 + $0x2ec] sm:$0xf0] }
 0x4f1   : > { %v6131_v24 = vor.u32 %v6662_v52, %v6130_v17  ;;  %v6578_v0 = vld [vmem:[%s8777_s7 + $0x4c] sm:$0xf0]  ;;  %v6227_v17 = vor.u32 %v6686_v23, %v6226_v20  ;;  %v6592_v52 = vld [vmem:[%s8777_s7 + $0xc4] sm:$0xf]  ;;  %v6132_v23 = vld [vmem:[%s8777_s7 + $0x2f0] sm:$0xf0] }
 0x4f2   : > { %3473 = vmatmul.bf16.vlgmr.msrb.gmra.mxu1 %v3358_v35 }
 0x4f3   : > { %4335 = vmatpush.bf16.msra.mxu1 %v6131_v24  ;;  %v5863_v24 = vor.u32 %v6592_v52, %v5860_v7  ;;  %v6162_v52 = vld [vmem:[%s8777_s7 + $0x320] sm:$0xf]  ;;  %v6670_v7 = vld [vmem:[%s8777_s7 + $0x32c] sm:$0xf0] }
 0x4f7   : > { %v7848_v29 = vpop.f32.mrf.mxu1  ;;  %v3334_v45 = vpop.f32.mrf.mxu2 }
 0x4f8   : > { %v2633_v38 = vpop.f32.mrf.mxu0  ;;  %v3350_v25 = vpop.f32.mrf.mxu3 }
 0x4f9   : > { %v2634_v2 = vadd.f32 %v2633_v38, %v2614_v13  ;;  %v3359_v4 = vpack.c.bf16 %v3350_v25, %v3348_v1  ;;  %v5794_v13 = vld [vmem:[%s8777_s7 + $0x40] sm:$0xf]  ;;  %v6658_v25 = vld [vmem:[%s8777_s7 + $0x2cc] sm:$0xf0] }
 0x4fa   : > { %v5954_v1 = vld [vmem:[%s8777_s7 + $0x180] sm:$0xf]  ;;  %v5795_v35 = vor.u32 %v6578_v0, %v5794_v13  ;;  %v6602_v0 = vld [vmem:[%s8777_s7 + $0x10c] sm:$0xf0] }
 0x4fb   : > { %5758 = vmatmul.msk.bf16.vlgmr.msrb.gmra.mxu0 %vm863_vm3, %v3359_v4  ;;  %v6114_v38 = vld [vmem:[%s8777_s7 + $0x2c0] sm:$0xf] }
 0x4fc   : > { %v6115_v4 = vor.u32 %v6658_v25, %v6114_v38  ;;  %4314 = vmatpush.bf16.msra.mxu2 %v5795_v35  ;;  %v5890_v13 = vld [vmem:[%s8777_s7 + $0x100] sm:$0xf]  ;;  %v6682_v25 = vld [vmem:[%s8777_s7 + $0x38c] sm:$0xf0] }
 0x4fd   : > { %v5891_v35 = vor.u32 %v6602_v0, %v5890_v13  ;;  %v6210_v38 = vld [vmem:[%s8777_s7 + $0x380] sm:$0xf]  ;;  %v6163_v13 = vor.u32 %v6670_v7, %v6162_v52  ;;  %v6576_v0 = vld [vmem:[%s8777_s7 + $0x44] sm:$0xf]  ;;  %v6068_v7 = vld [vmem:[%s8777_s7 + $0x270] sm:$0xf0] }
 0x4fe   : > { %4336 = vmatpush.bf16.msra.mxu1 %v6115_v4  ;;  %v6211_v4 = vor.u32 %v6682_v25, %v6210_v38  ;;  %v5956_v38 = vld [vmem:[%s8777_s7 + $0x190] sm:$0xf0]  ;;  %v6656_v25 = vld [vmem:[%s8777_s7 + $0x2c4] sm:$0xf] }
 0x4ff   : > { %v2619_v5 = vpop.f32.mrf.mxu1  ;;  %v3336_v32 = vpop.f32.mrf.mxu2 }
 0x500   : > { %v7851_v14 = vpop.f32.mrf.mxu0  ;;  %v3353_v54 = vpop.f32.mrf.mxu3  ;;  %v3360_v27 = vpack.c.bf16 %v3336_v32, %v3334_v45  ;;  %v6618_v45 = vld [vmem:[%s8777_s7 + $0x18c] sm:$0xf0]  ;;  %v5778_v32 = vld [vmem:[%s8777_s7 + $0x20] sm:$0xf] }
 0x502   : > { %3478 = vmatmul.bf16.gmra.mxu1 %v3360_v27  ;;  %v5938_v27 = vld [vmem:[%s8777_s7 + $0x160] sm:$0xf] }
 0x507   : > { %v7853_v6 = vpop.f32.mrf.mxu1 }
 0x508   : > { %v2638_v11 = vpop.f32.mrf.mxu0  ;;  %v3355_v36 = vpop.f32.mrf.mxu3 }
 0x509   : > { %v2639_v37 = vadd.f32 %v2638_v11, %v2619_v5  ;;  %v3361_v44 = vpack.c.bf16 %v3355_v36, %v3353_v54  ;;  %v6574_v54 = vld [vmem:[%s8777_s7 + $0x2c] sm:$0xf0] }
 0x50a   : > { %v5779_v36 = vor.u32 %v6574_v54, %v5778_v32  ;;  %v6588_v32 = vld [vmem:[%s8777_s7 + $0xa4] sm:$0xf]  ;;  %v5844_v54 = vld [vmem:[%s8777_s7 + $0xb0] sm:$0xf0] }
 0x50b   : > { %5759 = vmatmul.msk.bf16.gmra.mxu0 %vm863_vm3, %v3361_v44  ;;  %v6098_v44 = vld [vmem:[%s8777_s7 + $0x2a0] sm:$0xf] }
 0x50c   : > { %4315 = vmatpush.bf16.msra.mxu2 %v5779_v36  ;;  %v5847_v36 = vor.u32 %v6588_v32, %v5844_v54  ;;  %v6146_v54 = vld [vmem:[%s8777_s7 + $0x300] sm:$0xf] }
 0x50f   : > { %v2826_v8 = vpop.f32.mrf.mxu1 }
 0x510   : > { %v7856_v56 = vpop.f32.mrf.mxu0 }
 0x517   : > { %v7858_v26 = vpop.f32.mrf.mxu1 }
 0x518   : > { %v2845_v9 = vpop.f32.mrf.mxu0 }
 0x519   : > { %v2846_v50 = vadd.f32 %v2845_v9, %v2826_v8  ;;  %v6654_v8 = vld [vmem:[%s8777_s7 + $0x2ac] sm:$0xf0] }
 0x51b   : > { %v7860_v39 = vadd.f32 %v2846_v50, %v2634_v2  ;;  %v5955_v2 = vor.u32 %v6618_v45, %v5954_v1  ;;  %v6099_v50 = vor.u32 %v6654_v8, %v6098_v44  ;;  %v6050_v1 = vld [vmem:[%s8777_s7 + $0x240] sm:$0xf]  ;;  %v6642_v45 = vld [vmem:[%s8777_s7 + $0x24c] sm:$0xf0] }
 0x51d   : > { %4325 = vmatpush.bf16.msra.mxu3 %v5955_v2  ;;  %4337 = vmatpush.bf16.msra.mxu1 %v6099_v50  ;;  %v6051_v2 = vor.u32 %v6642_v45, %v6050_v1  ;;  %v6638_v50 = vld [vmem:[%s8777_s7 + $0x22c] sm:$0xf0]  ;;  %v5796_v1 = vld [vmem:[%s8777_s7 + $0x50] sm:$0xf0] }
 0x51e   : > { %v5799_v45 = vor.u32 %v6576_v0, %v5796_v1  ;;  %v6228_v0 = vld [vmem:[%s8777_s7 + $0x3b0] sm:$0xf0] }
 0x51f   : > { %v2831_v57 = vpop.f32.mrf.mxu1 }
 0x520   : > { %v7862_v61 = vpop.f32.mrf.mxu0 }
 0x521   : > { %4338 = vmatpush.bf16.msra.mxu1 %v6083_v12  ;;  %v6018_v12 = vld [vmem:[%s8777_s7 + $0x200] sm:$0xf] }
 0x525   : > { %4339 = vmatpush.bf16.msra.mxu1 %v6067_v31 }
 0x527   : > { %v2833_v47 = vpop.f32.mrf.mxu1 }
 0x528   : > { %v2850_v43 = vpop.f32.mrf.mxu0 }
 0x529   : > { %v2851_v49 = vadd.f32 %v2850_v43, %v2831_v57  ;;  %v6258_v57 = vld [vmem:[%s8777_s7 + $0x3e0] sm:$0xf]  ;;  %v6570_v43 = vld [vmem:[%s8777_s7 + $0xc] sm:$0xf0]  ;;  %4340 = vmatpush.bf16.msra.mxu1 %v6051_v2  ;;  %v6116_v2 = vld [vmem:[%s8777_s7 + $0x2d0] sm:$0xf0] }
 0x52a   : > { %v6119_v32 = vor.u32 %v6656_v25, %v6116_v2  ;;  %v6600_v25 = vld [vmem:[%s8777_s7 + $0x104] sm:$0xf]  ;;  %v5892_v2 = vld [vmem:[%s8777_s7 + $0x110] sm:$0xf0] }
 0x52b   : > { %v7870_v41 = vadd.f32 %v2851_v49, %v2639_v37  ;;  %v6614_v37 = vld [vmem:[%s8777_s7 + $0x16c] sm:$0xf0]  ;;  %v5763_v49 = vor.u32 %v6570_v43, %v5762_v42  ;;  %v6584_v43 = vld [vmem:[%s8777_s7 + $0x84] sm:$0xf] }
 0x52c   : > { %v5939_v9 = vor.u32 %v6614_v37, %v5938_v27  ;;  %v6628_v27 = vld [vmem:[%s8777_s7 + $0x1e4] sm:$0xf]  ;;  %v6004_v37 = vld [vmem:[%s8777_s7 + $0x1f0] sm:$0xf0]  ;;  %v6678_v42 = vld [vmem:[%s8777_s7 + $0x36c] sm:$0xf0]  ;;  %v5831_v46 = vor.u32 %v6584_v43, %v5828_v30 }
 0x52d   : > { %4316 = vmatpush.bf16.msra.mxu2 %v5763_v49  ;;  %v6007_v8 = vor.u32 %v6628_v27, %v6004_v37  ;;  %v6666_v27 = vld [vmem:[%s8777_s7 + $0x30c] sm:$0xf0]  ;;  %v6572_v37 = vld [vmem:[%s8777_s7 + $0x24] sm:$0xf] }
 0x52e   : > { %4326 = vmatpush.bf16.msra.mxu3 %v5939_v9  ;;  %v6034_v9 = vld [vmem:[%s8777_s7 + $0x220] sm:$0xf] }
 0x52f   : > { %v7878_v40 = vpop.f32.mrf.mxu1 }
 0x530   : > { %v2852_v55 = vpop.f32.mrf.mxu0 }
 0x531   : > { %v7892_v33 = vadd.f32 %v2852_v55, %v2833_v47  ;;  %v6694_v47 = vld [vmem:[%s8777_s7 + $0x3ec] sm:$0xf0]  ;;  %4361 = vmatpush.bf16.msrb.mxu2 %v5879_v18  ;;  %v5812_v18 = vld [vmem:[%s8777_s7 + $0x70] sm:$0xf0] }
 0x532   : > { %v6259_v53 = vor.u32 %v6694_v47, %v6258_v57  ;;  %v6690_v55 = vld [vmem:[%s8777_s7 + $0x3cc] sm:$0xf0]  ;;  %4327 = vmatpush.bf16.msra.mxu3 %v5923_v34  ;;  %v6194_v57 = vld [vmem:[%s8777_s7 + $0x360] sm:$0xf]  ;;  %v5991_v34 = vor.u32 %v6624_v48, %v5988_v19  ;;  %v5815_v22 = vor.u32 %v6580_v28, %v5812_v18  ;;  %v6648_v28 = vld [vmem:[%s8777_s7 + $0x284] sm:$0xf] }
 0x533   : > { %v6243_v59 = vor.u32 %v6690_v55, %v6242_v16  ;;  %v6195_v49 = vor.u32 %v6678_v42, %v6194_v57  ;;  %v6634_v16 = vld [vmem:[%s8777_s7 + $0x20c] sm:$0xf0]  ;;  %v6178_v55 = vld [vmem:[%s8777_s7 + $0x340] sm:$0xf]  ;;  %v5940_v57 = vld [vmem:[%s8777_s7 + $0x170] sm:$0xf0] }
 0x534   : > { %4348 = vmatpush.bf16.msra.mxu0 %v6259_v53  ;;  %v6035_v53 = vor.u32 %v6638_v50, %v6034_v9  ;;  %v6019_v58 = vor.u32 %v6634_v16, %v6018_v12  ;;  %v6612_v9 = vld [vmem:[%s8777_s7 + $0x164] sm:$0xf]  ;;  %v6100_v42 = vld [vmem:[%s8777_s7 + $0x2b0] sm:$0xf0] }
 0x535   : > { %4362 = vmatpush.bf16.msrb.mxu2 %v5863_v24  ;;  %v5943_v43 = vor.u32 %v6612_v9, %v5940_v57  ;;  %v6568_v12 = vld [vmem:[%s8777_s7 + $0x4] sm:$0xf]  ;;  %v5764_v16 = vld [vmem:[%s8777_s7 + $0x10] sm:$0xf0] }
 0x536   : > { %4328 = vmatpush.bf16.msra.mxu3 %v5907_v51  ;;  %4341 = vmatpush.bf16.msra.mxu1 %v6035_v53  ;;  %v5972_v51 = vld [vmem:[%s8777_s7 + $0x1b0] sm:$0xf0]  ;;  %v6652_v53 = vld [vmem:[%s8777_s7 + $0x2a4] sm:$0xf] }
 0x537   : > { %v7906_v15 = vpop.f32.mrf.mxu1  ;;  %v5975_v20 = vor.u32 %v6620_v63, %v5972_v51  ;;  %v6103_v30 = vor.u32 %v6652_v53, %v6100_v42  ;;  %v6084_v18 = vld [vmem:[%s8777_s7 + $0x290] sm:$0xf0]  ;;  %v6688_v63 = vld [vmem:[%s8777_s7 + $0x3c4] sm:$0xf] }
 0x538   : > { %v7917_v21 = vpop.f32.mrf.mxu0  ;;  %4349 = vmatpush.bf16.msra.mxu0 %v6243_v59  ;;  %v6674_v59 = vld [vmem:[%s8777_s7 + $0x34c] sm:$0xf0]  ;;  %v6244_v51 = vld [vmem:[%s8777_s7 + $0x3d0] sm:$0xf0]  ;;  %v6636_v9 = vld [vmem:[%s8777_s7 + $0x224] sm:$0xf] }
 0x539   : > { %4363 = vmatpush.bf16.msrb.mxu2 %v5847_v36  ;;  %v6179_v60 = vor.u32 %v6674_v59, %v6178_v55  ;;  %v6147_v36 = vor.u32 %v6666_v27, %v6146_v54  ;;  %v6608_v55 = vld [vmem:[%s8777_s7 + $0x144] sm:$0xf]  ;;  %v5924_v59 = vld [vmem:[%s8777_s7 + $0x150] sm:$0xf0] }
 0x53a   : > { %4329 = vmatpush.bf16.msra.mxu3 %v5891_v35  ;;  %4342 = vmatpush.bf16.msra.mxu1 %v6019_v58  ;;  %v6616_v35 = vld [vmem:[%s8777_s7 + $0x184] sm:$0xf]  ;;  %v5767_v58 = vor.u32 %v6568_v12, %v5764_v16  ;;  %v6052_v54 = vld [vmem:[%s8777_s7 + $0x250] sm:$0xf0] }
 0x53b   : > { %v6680_v27 = vld [vmem:[%s8777_s7 + $0x384] sm:$0xf]  ;;  %v6196_v53 = vld [vmem:[%s8777_s7 + $0x370] sm:$0xf0] }
 0x53c   : > { %4350 = vmatpush.bf16.msra.mxu0 %v6227_v17  ;;  %v6135_v17 = vor.u32 %v6660_v10, %v6132_v23  ;;  %v6247_v10 = vor.u32 %v6688_v63, %v6244_v51  ;;  %v5908_v23 = vld [vmem:[%s8777_s7 + $0x130] sm:$0xf0]  ;;  %v6676_v57 = vld [vmem:[%s8777_s7 + $0x364] sm:$0xf] }
 0x53d   : > { %4364 = vmatpush.bf16.msrb.mxu2 %v5831_v46  ;;  %v6260_v46 = vld [vmem:[%s8777_s7 + $0x3f0] sm:$0xf0] }
 0x53e   : > { %4374 = vmatpush.bf16.msrb.mxu3 %v6007_v8  ;;  %4387 = vmatpush.bf16.msrb.mxu1 %v6135_v17  ;;  %v5780_v8 = vld [vmem:[%s8777_s7 + $0x30] sm:$0xf0]  ;;  %v6644_v17 = vld [vmem:[%s8777_s7 + $0x264] sm:$0xf] }
 0x53f   : > { %v7946_v5 = vpop.f32.mrf.mxu1  ;;  %v5783_v50 = vor.u32 %v6572_v37, %v5780_v8  ;;  %v6071_v1 = vor.u32 %v6644_v17, %v6068_v7  ;;  %v6180_v12 = vld [vmem:[%s8777_s7 + $0x350] sm:$0xf0] }
 0x540   : > { %v7957_v11 = vpop.f32.mrf.mxu0  ;;  %4351 = vmatpush.bf16.msra.mxu0 %v6211_v4  ;;  %v5959_v4 = vor.u32 %v6616_v35, %v5956_v38 }
 0x541   : > { %4365 = vmatpush.bf16.msrb.mxu2 %v5815_v22  ;;  %v6087_v22 = vor.u32 %v6648_v28, %v6084_v18  ;;  %v6668_v18 = vld [vmem:[%s8777_s7 + $0x324] sm:$0xf] }
 0x542   : > { %4375 = vmatpush.bf16.msrb.mxu3 %v5991_v34  ;;  %4388 = vmatpush.bf16.msrb.mxu1 %v6119_v32  ;;  %v5895_v32 = vor.u32 %v6600_v25, %v5892_v2 }
 0x544   : > { %4352 = vmatpush.bf16.msra.mxu0 %v6195_v49  ;;  %v6692_v49 = vld [vmem:[%s8777_s7 + $0x3e4] sm:$0xf] }
 0x545   : > { %4366 = vmatpush.bf16.msrb.mxu2 %v5799_v45  ;;  %v6263_v19 = vor.u32 %v6692_v49, %v6260_v46  ;;  %v6632_v49 = vld [vmem:[%s8777_s7 + $0x204] sm:$0xf]  ;;  %v6020_v46 = vld [vmem:[%s8777_s7 + $0x210] sm:$0xf0] }
 0x546   : > { %4376 = vmatpush.bf16.msrb.mxu3 %v5975_v20  ;;  %4389 = vmatpush.bf16.msrb.mxu1 %v6103_v30  ;;  %v6604_v20 = vld [vmem:[%s8777_s7 + $0x124] sm:$0xf] }
 0x547   : > { %v8004_v3 = vpop.f32.mrf.mxu1  ;;  %v5911_v52 = vor.u32 %v6604_v20, %v5908_v23  ;;  %v6148_v20 = vld [vmem:[%s8777_s7 + $0x310] sm:$0xf0] }
 0x548   : > { %v8015_v62 = vpop.f32.mrf.mxu0  ;;  %4353 = vmatpush.bf16.msra.mxu0 %v6179_v60  ;;  %v5927_v60 = vor.u32 %v6608_v55, %v5924_v59  ;;  %v6023_v55 = vor.u32 %v6632_v49, %v6020_v46  ;;  %v3062_v59 = vadd.f32 %v7917_v21, %v7878_v40  ;;  %v2848_v40 = vadd.f32 %v7862_v61, %v7858_v26 }
 0x549   : > { %4367 = vmatpush.bf16.msrb.mxu2 %v5783_v50  ;;  %v6036_v50 = vld [vmem:[%s8777_s7 + $0x230] sm:$0xf0]  ;;  %v2636_v26 = vadd.f32 %v7851_v14, %v7848_v29  ;;  %v3064_v61 = vadd.f32 %v7957_v11, %v7906_v15 }
 0x54a   : > { %4377 = vmatpush.bf16.msrb.mxu3 %v5959_v4  ;;  %4390 = vmatpush.bf16.msrb.mxu1 %v6087_v22  ;;  %v6640_v4 = vld [vmem:[%s8777_s7 + $0x244] sm:$0xf]  ;;  %v6039_v42 = vor.u32 %v6636_v9, %v6036_v50  ;;  %v3071_v63 = vadd.f32 %v3062_v59, %v7860_v39 }
 0x54b   : > { %v6055_v37 = vor.u32 %v6640_v4, %v6052_v54  ;;  %v3067_v4 = vadd.f32 %v8015_v62, %v7946_v5  ;;  %v6010_v5 = vld [vmem:[%s8777_s7 + $0x1e8] sm:$0xf]  ;;  %v6631_v62 = vld [vmem:[%s8777_s7 + $0x1f4] sm:$0xf0] }
 0x54c   : > { %4354 = vmatpush.bf16.msra.mxu0 %v6163_v13  ;;  %v6684_v13 = vld [vmem:[%s8777_s7 + $0x3a4] sm:$0xf] }
 0x54d   : > { %4368 = vmatpush.bf16.msrb.mxu2 %v5767_v58  ;;  %v6231_v35 = vor.u32 %v6684_v13, %v6228_v0  ;;  %v5882_v0 = vld [vmem:[%s8777_s7 + $0xe8] sm:$0xf]  ;;  %v3073_v50 = vadd.f32 %v3067_v4, %v7870_v41  ;;  %v6655_v4 = vld [vmem:[%s8777_s7 + $0x2b4] sm:$0xf0] }
 0x54e   : > { %4378 = vmatpush.bf16.msrb.mxu3 %v5943_v43  ;;  %4391 = vmatpush.bf16.msrb.mxu1 %v6071_v1  ;;  %v6199_v43 = vor.u32 %v6676_v57, %v6196_v53  ;;  %v6599_v1 = vld [vmem:[%s8777_s7 + $0xf4] sm:$0xf0]  ;;  %v6011_v53 = vor.u32 %v6631_v62, %v6010_v5  ;;  %v5994_v41 = vld [vmem:[%s8777_s7 + $0x1c8] sm:$0xf] }
 0x54f   : > { %v8062_v44 = vpop.f32.mrf.mxu1  ;;  %v5883_v11 = vor.u32 %v6599_v1, %v5882_v0 }
 0x550   : > { %v8073_v47 = vpop.f32.mrf.mxu0  ;;  %4355 = vmatpush.bf16.msra.mxu0 %v6147_v36  ;;  %v6212_v36 = vld [vmem:[%s8777_s7 + $0x390] sm:$0xf0] }
 0x551   : > { %v6215_v8 = vor.u32 %v6680_v27, %v6212_v36  ;;  %v5850_v27 = vld [vmem:[%s8777_s7 + $0xa8] sm:$0xf] }
 0x552   : > { %4379 = vmatpush.bf16.msrb.mxu3 %v5927_v60  ;;  %4392 = vmatpush.bf16.msrb.mxu1 %v6055_v37  ;;  %v6164_v60 = vld [vmem:[%s8777_s7 + $0x330] sm:$0xf0] }
 0x553   : > { %v6167_v22 = vor.u32 %v6668_v18, %v6164_v60  ;;  %v5818_v18 = vld [vmem:[%s8777_s7 + $0x68] sm:$0xf] }
 0x554   : > { %4400 = vmatpush.bf16.msrb.mxu0 %v6263_v19  ;;  %v6672_v19 = vld [vmem:[%s8777_s7 + $0x344] sm:$0xf] }
 0x555   : > { %v6183_v58 = vor.u32 %v6672_v19, %v6180_v12  ;;  %v6587_v19 = vld [vmem:[%s8777_s7 + $0x94] sm:$0xf0] }
 0x556   : > { %4380 = vmatpush.bf16.msrb.mxu3 %v5911_v52  ;;  %4393 = vmatpush.bf16.msrb.mxu1 %v6039_v42  ;;  %v2856_v52 = vadd.f32 %v2848_v40, %v2636_v26  ;;  %v5834_v42 = vld [vmem:[%s8777_s7 + $0x88] sm:$0xf]  ;;  %v6627_v12 = vld [vmem:[%s8777_s7 + $0x1d4] sm:$0xf0] }
 0x557   : > { %v8120_v31 = vpop.f32.mrf.mxu1  ;;  %v5835_v59 = vor.u32 %v6587_v19, %v5834_v42  ;;  %v6691_v42 = vld [vmem:[%s8777_s7 + $0x3d4] sm:$0xf0] }
 0x558   : > { %v8128_v24 = vpop.f32.mrf.mxu0  ;;  %4401 = vmatpush.bf16.msrb.mxu0 %v6247_v10  ;;  %v3072_v29 = vadd.f32 %v3064_v61, %v2856_v52  ;;  %v6619_v52 = vld [vmem:[%s8777_s7 + $0x194] sm:$0xf0] }
 0x559   : > { %v3278_v28 = vadd.f32 %v8128_v24, %v8062_v44  ;;  %v8288_v44 = vld [vmem:[%s8776_s6] ss:$0 sm:$0xff]  ;;  %v6664_v24 = vld [vmem:[%s8777_s7 + $0x304] sm:$0xf] }
 0x55a   : > { %4381 = vmatpush.bf16.msrb.mxu3 %v5895_v32  ;;  %4394 = vmatpush.bf16.msrb.mxu1 %v6023_v55  ;;  %v6151_v39 = vor.u32 %v6664_v24, %v6148_v20  ;;  %v3069_v55 = vadd.f32 %v8073_v47, %v8004_v3  ;;  %v5978_v3 = vld [vmem:[%s8777_s7 + $0x1a8] sm:$0xf]  ;;  %v6623_v47 = vld [vmem:[%s8777_s7 + $0x1b4] sm:$0xf0] }
 0x55b   : > { %v3287_v21 = vadd.f32 %v3278_v28, %v3071_v63  ;;  %v5995_v28 = vor.u32 %v6627_v12, %v5994_v41  ;;  %v5802_v24 = vld [vmem:[%s8777_s7 + $0x48] sm:$0xf] }
 0x55c   : > { %4402 = vmatpush.bf16.msrb.mxu0 %v6231_v35 }
 0x55f   : > { %v8178_v48 = vpop.f32.mrf.mxu1 }
 0x560   : > { %v8180_v34 = vpop.f32.mrf.mxu0  ;;  %4403 = vmatpush.bf16.msrb.mxu0 %v6215_v8  ;;  %v6591_v8 = vld [vmem:[%s8777_s7 + $0xb4] sm:$0xf0] }
 0x561   : > { %v3280_v7 = vadd.f32 %v8180_v34, %v8120_v31  ;;  %v5866_v31 = vld [vmem:[%s8777_s7 + $0xc8] sm:$0xf]  ;;  %v6595_v34 = vld [vmem:[%s8777_s7 + $0xd4] sm:$0xf0] }
 0x562   : > { %v5867_v54 = vor.u32 %v6595_v34, %v5866_v31  ;;  %v6615_v31 = vld [vmem:[%s8777_s7 + $0x174] sm:$0xf0]  ;;  %v6106_v34 = vld [vmem:[%s8777_s7 + $0x2a8] sm:$0xf] }
 0x563   : > { %v3288_v35 = vadd.f32 %v3280_v7, %v3072_v29  ;;  %v6122_v7 = vld [vmem:[%s8777_s7 + $0x2c8] sm:$0xf]  ;;  %v6107_v62 = vor.u32 %v6655_v4, %v6106_v34 }
 0x564   : > { %4404 = vmatpush.bf16.msrb.mxu0 %v6199_v43  ;;  %v6026_v4 = vld [vmem:[%s8777_s7 + $0x208] sm:$0xf] }
 0x567   : > { %v8226_v38 = vpop.f32.mrf.mxu1 }
 0x568   : > { %v8224_v45 = vpop.f32.mrf.mxu0  ;;  %4405 = vmatpush.bf16.msrb.mxu0 %v6183_v58 }
 0x569   : > { %v3283_v36 = vadd.f32 %v8224_v45, %v8178_v48  ;;  %v5851_v45 = vor.u32 %v6591_v8, %v5850_v27  ;;  %v6571_v8 = vld [vmem:[%s8777_s7 + $0x14] sm:$0xf0] }
 0x56b   : > { %v3289_v43 = vadd.f32 %v3283_v36, %v3073_v50  ;;  %v5930_v50 = vld [vmem:[%s8777_s7 + $0x148] sm:$0xf] }
 0x56c   : > { %4406 = vmatpush.bf16.msrb.mxu0 %v6167_v22 }
 0x56f   : > { %v3474_v16 = vpop.f32.mrf.mxu1 }
 0x570   : > { %v8258_v30 = vpop.f32.mrf.mxu0  ;;  %4407 = vmatpush.bf16.msrb.mxu0 %v6151_v39 }
 0x571   : > { %v3285_v22 = vadd.f32 %v8258_v30, %v8226_v38  ;;  %v6663_v38 = vld [vmem:[%s8777_s7 + $0x2f4] sm:$0xf0] }
 0x577   : > { %v3476_v17 = vpop.f32.mrf.mxu1 }
 0x578   : > { %v3493_v51 = vpop.f32.mrf.mxu0 }
 0x579   : > { %v3494_v10 = vadd.f32 %v3493_v51, %v3474_v16  ;;  %v2641_v16 = vadd.f32 %v7856_v56, %v7853_v6  ;;  %v6583_v56 = vld [vmem:[%s8777_s7 + $0x74] sm:$0xf0] }
 0x57b   : > { %v3503_v23 = vadd.f32 %v3494_v10, %v3287_v21  ;;  %v2858_v60 = vadd.f32 %v7892_v33, %v2641_v16  ;;  %v6138_v33 = vld [vmem:[%s8777_s7 + $0x2e8] sm:$0xf]  ;;  %v5819_v21 = vor.u32 %v6583_v56, %v5818_v18  ;;  %v5979_v10 = vor.u32 %v6623_v47, %v5978_v3  ;;  %v6647_v18 = vld [vmem:[%s8777_s7 + $0x274] sm:$0xf0]  ;;  %v5868_v56 = vld [vmem:[%s8777_s7 + $0xd8] sm:$0xf0] }
 0x57c   : > { %v6139_v61 = vor.u32 %v6663_v38, %v6138_v33  ;;  %v5898_v47 = vld [vmem:[%s8777_s7 + $0x108] sm:$0xf] }
 0x57d   : > { %v3519_v13 = vadd.f32 %v8288_v44, %v3503_v23  ;;  %v3074_v30 = vadd.f32 %v3069_v55, %v2858_v60  ;;  %v6579_v23 = vld [vmem:[%s8777_s7 + $0x54] sm:$0xf0]  ;;  %v5914_v55 = vld [vmem:[%s8777_s7 + $0x128] sm:$0xf] }
 0x57e   : > { %v5803_v1 = vor.u32 %v6579_v23, %v5802_v24  ;;  %v6234_v60 = vld [vmem:[%s8777_s7 + $0x3a8] sm:$0xf]  ;;  %v6589_v24 = vld [vmem:[%s8777_s7 + $0xac] sm:$0xf] }
 0x57f   : > { %v3523_v14 = vmax.f32 %v3519_v13, 0.0  ;;  %v3479_v9 = vpop.f32.mrf.mxu1  ;;  %v3290_v20 = vadd.f32 %v3285_v22, %v3074_v30  ;;  %v6659_v13 = vld [vmem:[%s8777_s7 + $0x2d4] sm:$0xf0] }
 0x580   : > { %v3495_v15 = vpop.f32.mrf.mxu0  ;;  %v6687_v22 = vld [vmem:[%s8777_s7 + $0x3b4] sm:$0xf0] }
 0x581   : > { %v8309_v25 = vpack.c.bf16 %v3523_v14, %v3523_v14  ;;  %v3496_v2 = vadd.f32 %v3495_v15, %v3476_v17  ;;  %v5962_v17 = vld [vmem:[%s8777_s7 + $0x188] sm:$0xf]  ;;  %v6575_v15 = vld [vmem:[%s8777_s7 + $0x34] sm:$0xf0]  ;;  %v6235_v38 = vor.u32 %v6687_v22, %v6234_v60 }
 0x582   : > { %v5963_v29 = vor.u32 %v6619_v52, %v5962_v17  ;;  %v5786_v14 = vld [vmem:[%s8777_s7 + $0x28] sm:$0xf]  ;;  %v6603_v30 = vld [vmem:[%s8777_s7 + $0x114] sm:$0xf0] }
 0x583   : > { %v3504_v32 = vadd.f32 %v3496_v2, %v3288_v35  ;;  %4317 = vmatmul.bf16.vlgmr.msra.gmra.mxu2 %v8309_v25  ;;  %v6123_v35 = vor.u32 %v6659_v13, %v6122_v7  ;;  %v5946_v2 = vld [vmem:[%s8777_s7 + $0x168] sm:$0xf]  ;;  %v5787_v27 = vor.u32 %v6575_v15, %v5786_v14  ;;  %v5899_v23 = vor.u32 %v6603_v30, %v5898_v47  ;;  %v6639_v13 = vld [vmem:[%s8777_s7 + $0x234] sm:$0xf0]  ;;  %v6585_v15 = vld [vmem:[%s8777_s7 + $0x8c] sm:$0xf] }
 0x584   : > { %4413 = vmatpush.bf16.msra.mxu2 %v5883_v11  ;;  %v5947_v36 = vor.u32 %v6615_v31, %v5946_v2  ;;  %v6042_v7 = vld [vmem:[%s8777_s7 + $0x228] sm:$0xf]  ;;  %v6679_v14 = vld [vmem:[%s8777_s7 + $0x374] sm:$0xf0]  ;;  %v5996_v2 = vld [vmem:[%s8777_s7 + $0x1d8] sm:$0xf0] }
 0x585   : > { %v3520_v37 = vadd.f32 %v8288_v44, %v3504_v32  ;;  %v6695_v32 = vld [vmem:[%s8777_s7 + $0x3f4] sm:$0xf0]  ;;  %v6043_v31 = vor.u32 %v6639_v13, %v6042_v7  ;;  %v6653_v30 = vld [vmem:[%s8777_s7 + $0x2ac] sm:$0xf]  ;;  %v6092_v13 = vld [vmem:[%s8777_s7 + $0x298] sm:$0xf0] }
 0x586   : > { %v6649_v7 = vld [vmem:[%s8777_s7 + $0x28c] sm:$0xf] }
 0x587   : > { %v3524_v57 = vmax.f32 %v3520_v37, 0.0  ;;  %v3481_v51 = vpop.f32.mrf.mxu1  ;;  %v5770_v37 = vld [vmem:[%s8777_s7 + $0x8] sm:$0xf] }
 0x588   : > { %4414 = vmatpush.bf16.msra.mxu2 %v5867_v54  ;;  %v3498_v48 = vpop.f32.mrf.mxu0  ;;  %v5771_v19 = vor.u32 %v6571_v8, %v5770_v37  ;;  %v6581_v37 = vld [vmem:[%s8777_s7 + $0x6c] sm:$0xf]  ;;  %v5820_v8 = vld [vmem:[%s8777_s7 + $0x78] sm:$0xf0] }
 0x589   : > { %v8339_v49 = vpack.c.bf16 %v3524_v57, %v3524_v57  ;;  %v3499_v46 = vadd.f32 %v3498_v48, %v3479_v9  ;;  %v6611_v57 = vld [vmem:[%s8777_s7 + $0x154] sm:$0xf0]  ;;  %v6090_v48 = vld [vmem:[%s8777_s7 + $0x288] sm:$0xf] }
 0x58a   : > { %v5931_v41 = vor.u32 %v6611_v57, %v5930_v50  ;;  %v6661_v50 = vld [vmem:[%s8777_s7 + $0x2ec] sm:$0xf]  ;;  %v6140_v57 = vld [vmem:[%s8777_s7 + $0x2f8] sm:$0xf0] }
 0x58b   : > { %v3505_v58 = vadd.f32 %v3499_v46, %v3289_v43  ;;  %4330 = vmatmul.bf16.vlgmr.msra.gmra.mxu3 %v8339_v49  ;;  %v6597_v43 = vld [vmem:[%s8777_s7 + $0xec] sm:$0xf]  ;;  %v5884_v46 = vld [vmem:[%s8777_s7 + $0xf8] sm:$0xf0] }
 0x58c   : > { %4415 = vmatpush.bf16.msra.mxu2 %v5851_v45  ;;  %4426 = vmatpush.bf16.msra.mxu3 %v6011_v53  ;;  %v6651_v45 = vld [vmem:[%s8777_s7 + $0x294] sm:$0xf0]  ;;  %v6250_v53 = vld [vmem:[%s8777_s7 + $0x3c8] sm:$0xf] }
 0x58d   : > { %v3521_v6 = vadd.f32 %v8288_v44, %v3505_v58  ;;  %v6091_v12 = vor.u32 %v6651_v45, %v6090_v48  ;;  %v6251_v16 = vor.u32 %v6691_v42, %v6250_v53  ;;  %v6607_v58 = vld [vmem:[%s8777_s7 + $0x134] sm:$0xf0]  ;;  %v5823_v53 = vor.u32 %v6581_v37, %v5820_v8  ;;  %v5900_v8 = vld [vmem:[%s8777_s7 + $0x118] sm:$0xf0] }
 0x58e   : > { %v5915_v3 = vor.u32 %v6607_v58, %v5914_v55  ;;  %v5964_v55 = vld [vmem:[%s8777_s7 + $0x198] sm:$0xf0]  ;;  %v6657_v58 = vld [vmem:[%s8777_s7 + $0x2cc] sm:$0xf] }
 0x58f   : > { %v3525_v63 = vmax.f32 %v3521_v6, 0.0  ;;  %v6593_v6 = vld [vmem:[%s8777_s7 + $0xcc] sm:$0xf] }
 0x590   : > { %4416 = vmatpush.bf16.msra.mxu2 %v5835_v59  ;;  %4427 = vmatpush.bf16.msra.mxu3 %v5995_v28  ;;  %v3500_v40 = vpop.f32.mrf.mxu0  ;;  %v6074_v59 = vld [vmem:[%s8777_s7 + $0x268] sm:$0xf]  ;;  %v5887_v28 = vor.u32 %v6597_v43, %v5884_v46  ;;  %v6671_v46 = vld [vmem:[%s8777_s7 + $0x334] sm:$0xf0] }
 0x591   : > { %v8380_v39 = vpack.c.bf16 %v3525_v63, %v3525_v63  ;;  %v3501_v26 = vadd.f32 %v3500_v40, %v3481_v51  ;;  %v6075_v33 = vor.u32 %v6647_v18, %v6074_v59  ;;  %v6058_v63 = vld [vmem:[%s8777_s7 + $0x248] sm:$0xf]  ;;  %v6643_v51 = vld [vmem:[%s8777_s7 + $0x254] sm:$0xf0]  ;;  %v5871_v40 = vor.u32 %v6593_v6, %v5868_v56  ;;  %v6124_v59 = vld [vmem:[%s8777_s7 + $0x2d8] sm:$0xf0] }
 0x592   : > { %v6059_v17 = vor.u32 %v6643_v51, %v6058_v63  ;;  %v6170_v43 = vld [vmem:[%s8777_s7 + $0x328] sm:$0xf]  ;;  %v6667_v6 = vld [vmem:[%s8777_s7 + $0x314] sm:$0xf0]  ;;  %v6573_v56 = vld [vmem:[%s8777_s7 + $0x2c] sm:$0xf]  ;;  %v6127_v47 = vor.u32 %v6657_v58, %v6124_v59 }
 0x593   : > { %v3506_v0 = vadd.f32 %v3501_v26, %v3290_v20  ;;  %4343 = vmatmul.bf16.vlgmr.msra.gmra.mxu1 %v8380_v39  ;;  %4369 = vmatmul.bf16.vlgmr.msrb.gmra.mxu2 %v8309_v25  ;;  %v5852_v20 = vld [vmem:[%s8777_s7 + $0xb8] sm:$0xf0]  ;;  %v6629_v26 = vld [vmem:[%s8777_s7 + $0x1ec] sm:$0xf]  ;;  %v6154_v18 = vld [vmem:[%s8777_s7 + $0x308] sm:$0xf] }
 0x594   : > { %4417 = vmatpush.bf16.msra.mxu2 %v5819_v21  ;;  %4428 = vmatpush.bf16.msra.mxu3 %v5979_v10  ;;  %v6218_v21 = vld [vmem:[%s8777_s7 + $0x388] sm:$0xf]  ;;  %v6683_v10 = vld [vmem:[%s8777_s7 + $0x394] sm:$0xf0]  ;;  %v6108_v63 = vld [vmem:[%s8777_s7 + $0x2b8] sm:$0xf0] }
 0x595   : > { %v3522_v11 = vadd.f32 %v8288_v44, %v3506_v0  ;;  %4439 = vmatpush.bf16.msra.mxu1 %v6139_v61  ;;  %v6266_v44 = vld [vmem:[%s8777_s7 + $0x3e8] sm:$0xf]  ;;  %v6012_v61 = vld [vmem:[%s8777_s7 + $0x1f8] sm:$0xf0]  ;;  %v6219_v52 = vor.u32 %v6683_v10, %v6218_v21  ;;  %v5855_v0 = vor.u32 %v6589_v24, %v5852_v20  ;;  %v6693_v51 = vld [vmem:[%s8777_s7 + $0x3ec] sm:$0xf]  ;;  %v6155_v21 = vor.u32 %v6667_v6, %v6154_v18 }
 0x596   : > { %v6267_v9 = vor.u32 %v6695_v32, %v6266_v44  ;;  %v6635_v44 = vld [vmem:[%s8777_s7 + $0x214] sm:$0xf0]  ;;  %v6569_v20 = vld [vmem:[%s8777_s7 + $0xc] sm:$0xf]  ;;  %v6188_v59 = vld [vmem:[%s8777_s7 + $0x358] sm:$0xf0] }
 0x597   : > { %v3526_v54 = vmax.f32 %v3522_v11, 0.0  ;;  %v5836_v11 = vld [vmem:[%s8777_s7 + $0x98] sm:$0xf0]  ;;  %v6027_v48 = vor.u32 %v6635_v44, %v6026_v4  ;;  %v6685_v4 = vld [vmem:[%s8777_s7 + $0x3ac] sm:$0xf] }
 0x598   : > { %4418 = vmatpush.bf16.msra.mxu2 %v5803_v1  ;;  %4429 = vmatpush.bf16.msra.mxu3 %v5963_v29  ;;  %v6015_v1 = vor.u32 %v6629_v26, %v6012_v61  ;;  %v6202_v29 = vld [vmem:[%s8777_s7 + $0x368] sm:$0xf]  ;;  %v5839_v32 = vor.u32 %v6585_v15, %v5836_v11  ;;  %v5772_v26 = vld [vmem:[%s8777_s7 + $0x18] sm:$0xf0]  ;;  %v6111_v61 = vor.u32 %v6653_v30, %v6108_v63  ;;  %v6605_v15 = vld [vmem:[%s8777_s7 + $0x12c] sm:$0xf] }
 0x599   : > { %v8430_v5 = vpack.c.bf16 %v3526_v54, %v3526_v54  ;;  %4440 = vmatpush.bf16.msra.mxu1 %v6123_v35  ;;  %v6625_v35 = vld [vmem:[%s8777_s7 + $0x1cc] sm:$0xf]  ;;  %v6203_v34 = vor.u32 %v6679_v14, %v6202_v29  ;;  %v5775_v29 = vor.u32 %v6569_v20, %v5772_v26  ;;  %v6095_v11 = vor.u32 %v6649_v7, %v6092_v13  ;;  %v6236_v44 = vld [vmem:[%s8777_s7 + $0x3b8] sm:$0xf0]  ;;  %v6698_v63 = vld [vmem:[#allocation10 + $0x10] sm:$0xff] }
 0x59a   : > { %v5999_v54 = vor.u32 %v6625_v35, %v5996_v2  ;;  %v5916_v2 = vld [vmem:[%s8777_s7 + $0x138] sm:$0xf0]  ;;  %v6239_v37 = vor.u32 %v6685_v4, %v6236_v44  ;;  %v6673_v58 = vld [vmem:[%s8777_s7 + $0x34c] sm:$0xf]  ;;  %v6706_v20 = vld [vmem:[#allocation10 + $0x50] sm:$0xff] }
 0x59b   : > { %4356 = vmatmul.bf16.vlgmr.msra.gmra.mxu0 %v8430_v5  ;;  %4382 = vmatmul.bf16.vlgmr.msrb.gmra.mxu3 %v8339_v49  ;;  %v6191_v18 = vor.u32 %v6673_v58, %v6188_v59  ;;  %v6711_v30 = vld [vmem:[#allocation10 + $0x78] sm:$0xff]  ;;  %v6718_v26 = vld [vmem:[#allocation10 + $0xb0] sm:$0xff]  ;;  %v6704_v13 = vld [vmem:[#allocation10 + $0x40] sm:$0xff] }
 0x59c   : > { %4419 = vmatpush.bf16.msra.mxu2 %v5787_v27  ;;  %4430 = vmatpush.bf16.msra.mxu3 %v5947_v36  ;;  %v6186_v27 = vld [vmem:[%s8777_s7 + $0x348] sm:$0xf]  ;;  %v6675_v36 = vld [vmem:[%s8777_s7 + $0x354] sm:$0xf0] }
 0x59d   : > { %4441 = vmatpush.bf16.msra.mxu1 %v6107_v62  ;;  %4452 = vmatpush.bf16.msra.mxu0 %v6267_v9  ;;  %v6621_v62 = vld [vmem:[%s8777_s7 + $0x1ac] sm:$0xf]  ;;  %v5980_v9 = vld [vmem:[%s8777_s7 + $0x1b8] sm:$0xf0]  ;;  %v6187_v45 = vor.u32 %v6675_v36, %v6186_v27 }
 0x59e   : > { %v5983_v42 = vor.u32 %v6621_v62, %v5980_v9  ;;  %v6601_v27 = vld [vmem:[%s8777_s7 + $0x10c] sm:$0xf]  ;;  %v6060_v9 = vld [vmem:[%s8777_s7 + $0x258] sm:$0xf0] }
 0x59f   : > { %v6641_v62 = vld [vmem:[%s8777_s7 + $0x24c] sm:$0xf] }
 0x5a0   : > { %4420 = vmatpush.bf16.msra.mxu2 %v5771_v19  ;;  %4431 = vmatpush.bf16.msra.mxu3 %v5931_v41  ;;  %v6577_v19 = vld [vmem:[%s8777_s7 + $0x4c] sm:$0xf]  ;;  %v6143_v41 = vor.u32 %v6661_v50, %v6140_v57  ;;  %v6220_v57 = vld [vmem:[%s8777_s7 + $0x398] sm:$0xf0] }
 0x5a1   : > { %4442 = vmatpush.bf16.msra.mxu1 %v6091_v12  ;;  %4453 = vmatpush.bf16.msra.mxu0 %v6251_v16  ;;  %v5804_v12 = vld [vmem:[%s8777_s7 + $0x58] sm:$0xf0]  ;;  %v6617_v16 = vld [vmem:[%s8777_s7 + $0x18c] sm:$0xf] }
 0x5a2   : > { %v5807_v60 = vor.u32 %v6577_v19, %v5804_v12  ;;  %v5967_v22 = vor.u32 %v6617_v16, %v5964_v55  ;;  %v6681_v50 = vld [vmem:[%s8777_s7 + $0x38c] sm:$0xf]  ;;  %v6028_v55 = vld [vmem:[%s8777_s7 + $0x218] sm:$0xf0] }
 0x5a3   : > { %4395 = vmatmul.bf16.vlgmr.msrb.gmra.mxu1 %v8380_v39  ;;  %4421 = vmatmul.bf16.vlgmr.msra.gmra.mxu2 %v8309_v25  ;;  %v6677_v19 = vld [vmem:[%s8777_s7 + $0x36c] sm:$0xf] }
 0x5a4   : > { %4465 = vmatpush.bf16.msrb.mxu2 %v5887_v28  ;;  %4432 = vmatpush.bf16.msra.mxu3 %v5915_v3  ;;  %v6171_v28 = vor.u32 %v6671_v46, %v6170_v43  ;;  %v5788_v3 = vld [vmem:[%s8777_s7 + $0x38] sm:$0xf0]  ;;  %v6637_v43 = vld [vmem:[%s8777_s7 + $0x22c] sm:$0xf] }
 0x5a5   : > { %4443 = vmatpush.bf16.msra.mxu1 %v6075_v33  ;;  %4454 = vmatpush.bf16.msra.mxu0 %v6235_v38  ;;  %v6613_v33 = vld [vmem:[%s8777_s7 + $0x16c] sm:$0xf]  ;;  %v5948_v38 = vld [vmem:[%s8777_s7 + $0x178] sm:$0xf0]  ;;  %v5791_v10 = vor.u32 %v6573_v56, %v5788_v3 }
 0x5a6   : > { %v5951_v24 = vor.u32 %v6613_v33, %v5948_v38  ;;  %v6044_v46 = vld [vmem:[%s8777_s7 + $0x238] sm:$0xf0]  ;;  %v6633_v16 = vld [vmem:[%s8777_s7 + $0x20c] sm:$0xf]  ;;  %v6700_v33 = vld [vmem:[#allocation10 + $0x20] sm:$0xff] }
 0x5a7   : > { %v6665_v56 = vld [vmem:[%s8777_s7 + $0x30c] sm:$0xf] }
 0x5a8   : > { %4466 = vmatpush.bf16.msrb.mxu2 %v5871_v40  ;;  %4433 = vmatpush.bf16.msra.mxu3 %v5899_v23  ;;  %v6268_v40 = vld [vmem:[%s8777_s7 + $0x3f8] sm:$0xf0]  ;;  %v6699_v38 = vld [vmem:[#allocation10 + $0x18] sm:$0xff] }
 0x5a9   : > { %4444 = vmatpush.bf16.msra.mxu1 %v6059_v17  ;;  %4455 = vmatpush.bf16.msra.mxu0 %v6219_v52  ;;  %v6271_v23 = vor.u32 %v6693_v51, %v6268_v40  ;;  %v6609_v17 = vld [vmem:[%s8777_s7 + $0x14c] sm:$0xf]  ;;  %v5932_v52 = vld [vmem:[%s8777_s7 + $0x158] sm:$0xf0]  ;;  %v6710_v51 = vld [vmem:[#allocation10 + $0x70] sm:$0xff] }
 0x5aa   : > { %v5935_v14 = vor.u32 %v6609_v17, %v5932_v52  ;;  %v6697_v40 = vld [vmem:[#allocation10 + $0x8] sm:$0xff]  ;;  %v8729_v52 = vld [vmem:[%s8778_s8] sm:$0xf] }
 0x5ab   : > { %4408 = vmatmul.bf16.vlgmr.msrb.gmra.mxu0 %v8430_v5  ;;  %4434 = vmatmul.bf16.vlgmr.msra.gmra.mxu3 %v8339_v49  ;;  %v6717_v17 = vld [vmem:[#allocation10 + $0xa8] sm:$0xff]  ;;  %v3661_v7 = vperm.slane %v8729_v52, 0 }
 0x5ac   : > { %4467 = vmatpush.bf16.msrb.mxu2 %v5855_v0  ;;  %4478 = vmatpush.bf16.msrb.mxu3 %v6015_v1  ;;  %v6689_v0 = vld [vmem:[%s8777_s7 + $0x3cc] sm:$0xf]  ;;  %v6252_v1 = vld [vmem:[%s8777_s7 + $0x3d8] sm:$0xf0] }
 0x5ad   : > { %4445 = vmatpush.bf16.msra.mxu1 %v6043_v31  ;;  %4456 = vmatpush.bf16.msra.mxu0 %v6203_v34  ;;  %v6255_v35 = vor.u32 %v6689_v0, %v6252_v1  ;;  %v6645_v31 = vld [vmem:[%s8777_s7 + $0x26c] sm:$0xf]  ;;  %v6076_v34 = vld [vmem:[%s8777_s7 + $0x278] sm:$0xf0]  ;;  %v6716_v0 = vld [vmem:[#allocation10 + $0xa0] sm:$0xff] }
 0x5ae   : > { %v6079_v36 = vor.u32 %v6645_v31, %v6076_v34 }
 0x5b0   : > { %4468 = vmatpush.bf16.msrb.mxu2 %v5839_v32  ;;  %4479 = vmatpush.bf16.msrb.mxu3 %v5999_v54  ;;  %v6703_v32 = vld [vmem:[#allocation10 + $0x38] sm:$0xff]  ;;  %v5919_v54 = vor.u32 %v6605_v15, %v5916_v2  ;;  %v6714_v2 = vld [vmem:[#allocation10 + $0x90] sm:$0xff] }
 0x5b1   : > { %4446 = vmatpush.bf16.msra.mxu1 %v6027_v48  ;;  %4457 = vmatpush.bf16.msra.mxu0 %v6187_v45  ;;  %v6702_v48 = vld [vmem:[#allocation10 + $0x30] sm:$0xff]  ;;  %v5903_v45 = vor.u32 %v6601_v27, %v5900_v8  ;;  %v6713_v27 = vld [vmem:[#allocation10 + $0x88] sm:$0xff] }
 0x5b4   : > { %4469 = vmatpush.bf16.msrb.mxu2 %v5823_v53  ;;  %4480 = vmatpush.bf16.msrb.mxu3 %v5983_v42  ;;  %v6063_v53 = vor.u32 %v6641_v62, %v6060_v9  ;;  %v6223_v42 = vor.u32 %v6681_v50, %v6220_v57  ;;  %v6712_v62 = vld [vmem:[#allocation10 + $0x80] sm:$0xff]  ;;  %v6727_v9 = vld [vmem:[#allocation10 + $0xf8] sm:$0xff] }
 0x5b5   : > { %4491 = vmatpush.bf16.msrb.mxu1 %v6143_v41  ;;  %4458 = vmatpush.bf16.msra.mxu0 %v6171_v28  ;;  %v6047_v41 = vor.u32 %v6637_v43, %v6044_v46  ;;  %v6031_v28 = vor.u32 %v6633_v16, %v6028_v55  ;;  %v6725_v46 = vld [vmem:[#allocation10 + $0xe8] sm:$0xff]  ;;  %v6724_v55 = vld [vmem:[#allocation10 + $0xe0] sm:$0xff] }
 0x5b6   : > { %4447 = vmatmul.bf16.vlgmr.msra.gmra.mxu1 %v8380_v39 }
 0x5b8   : > { %4470 = vmatpush.bf16.msrb.mxu2 %v5807_v60  ;;  %4481 = vmatpush.bf16.msrb.mxu3 %v5967_v22  ;;  %v6669_v60 = vld [vmem:[%s8777_s7 + $0x32c] sm:$0xf]  ;;  %v6172_v22 = vld [vmem:[%s8777_s7 + $0x338] sm:$0xf0] }
 0x5b9   : > { %4492 = vmatpush.bf16.msrb.mxu1 %v6127_v47  ;;  %4459 = vmatpush.bf16.msra.mxu0 %v6155_v21  ;;  %v6175_v6 = vor.u32 %v6669_v60, %v6172_v22  ;;  %v6701_v47 = vld [vmem:[#allocation10 + $0x28] sm:$0xff]  ;;  %v3663_v60 = vperm.slane %v8729_v52, 2 }
 0x5ba   : > { %v6709_v21 = vld [vmem:[#allocation10 + $0x68] sm:$0xff] }
 0x5bc   : > { %4471 = vmatpush.bf16.msrb.mxu2 %v5791_v10  ;;  %4482 = vmatpush.bf16.msrb.mxu3 %v5951_v24  ;;  %v6708_v10 = vld [vmem:[#allocation10 + $0x60] sm:$0xff]  ;;  %v6719_v24 = vld [vmem:[#allocation10 + $0xb8] sm:$0xff] }
 0x5bd   : > { %4493 = vmatpush.bf16.msrb.mxu1 %v6111_v61  ;;  %4504 = vmatpush.bf16.msrb.mxu0 %v6271_v23  ;;  %v6705_v23 = vld [vmem:[#allocation10 + $0x48] sm:$0xff] }
 0x5be   : > { %4460 = vmatmul.bf16.vlgmr.msra.gmra.mxu0 %v8430_v5 }
 0x5c0   : > { %4472 = vmatpush.bf16.msrb.mxu2 %v5775_v29  ;;  %4483 = vmatpush.bf16.msrb.mxu3 %v5935_v14 }
 0x5c1   : > { %4494 = vmatpush.bf16.msrb.mxu1 %v6095_v11  ;;  %4505 = vmatpush.bf16.msrb.mxu0 %v6255_v35  ;;  %v6715_v11 = vld [vmem:[#allocation10 + $0x98] sm:$0xff] }
 0x5c3   : > { %4473 = vmatmul.bf16.vlgmr.msrb.gmra.mxu2 %v8309_v25  ;;  %v6204_v25 = vld [vmem:[%s8777_s7 + $0x378] sm:$0xf0] }
 0x5c4   : > { %4785 = vmatpush.bf16.msra.mxu2 %v6703_v32  ;;  %4484 = vmatpush.bf16.msrb.mxu3 %v5919_v54  ;;  %v6207_v12 = vor.u32 %v6677_v19, %v6204_v25 }
 0x5c5   : > { %4495 = vmatpush.bf16.msrb.mxu1 %v6079_v36  ;;  %4506 = vmatpush.bf16.msrb.mxu0 %v6239_v37  ;;  %v3662_v37 = vperm.slane %v8729_v52, 1 }
 0x5c8   : > { %4786 = vmatpush.bf16.msra.mxu2 %v6702_v48  ;;  %4485 = vmatpush.bf16.msrb.mxu3 %v5903_v45 }
 0x5c9   : > { %4496 = vmatpush.bf16.msrb.mxu1 %v6063_v53  ;;  %4507 = vmatpush.bf16.msrb.mxu0 %v6223_v42  ;;  %v6726_v42 = vld [vmem:[#allocation10 + $0xf0] sm:$0xff] }
 0x5cb   : > { %4486 = vmatmul.bf16.vlgmr.msrb.gmra.mxu3 %v8339_v49  ;;  %v6156_v49 = vld [vmem:[%s8777_s7 + $0x318] sm:$0xf0] }
 0x5cc   : > { %v6159_v3 = vor.u32 %v6665_v56, %v6156_v49  ;;  %4787 = vmatpush.bf16.msra.mxu2 %v6701_v47  ;;  %4798 = vmatpush.bf16.msra.mxu3 %v6711_v30  ;;  %v6722_v49 = vld [vmem:[#allocation10 + $0xd0] sm:$0xff] }
 0x5cd   : > { %4497 = vmatpush.bf16.msrb.mxu1 %v6047_v41  ;;  %4508 = vmatpush.bf16.msrb.mxu0 %v6207_v12 }
 0x5d0   : > { %4788 = vmatpush.bf16.msra.mxu2 %v6700_v33  ;;  %4799 = vmatpush.bf16.msra.mxu3 %v6710_v51 }
 0x5d1   : > { %4498 = vmatpush.bf16.msrb.mxu1 %v6031_v28  ;;  %4509 = vmatpush.bf16.msrb.mxu0 %v6191_v18  ;;  %v6723_v18 = vld [vmem:[#allocation10 + $0xd8] sm:$0xff] }
 0x5d4   : > { %4499 = vmatmul.bf16.vlgmr.msrb.gmra.mxu1 %v8380_v39  ;;  %4789 = vmatpush.bf16.msra.mxu2 %v6699_v38  ;;  %v6696_v39 = vld [vmem:[#allocation10] sm:$0xff]  ;;  %v6721_v38 = vld [vmem:[#allocation10 + $0xc8] sm:$0xff] }
 0x5d5   : > { %4510 = vmatpush.bf16.msrb.mxu0 %v6175_v6  ;;  %4800 = vmatpush.bf16.msra.mxu3 %v6709_v21  ;;  %v6720_v21 = vld [vmem:[#allocation10 + $0xc0] sm:$0xff] }
 0x5d6   : > { %4811 = vmatpush.bf16.msra.mxu1 %v6719_v24 }
 0x5d8   : > { %4790 = vmatpush.bf16.msra.mxu2 %v6698_v63 }
 0x5d9   : > { %4511 = vmatpush.bf16.msrb.mxu0 %v6159_v3  ;;  %4801 = vmatpush.bf16.msra.mxu3 %v6708_v10 }
 0x5da   : > { %4812 = vmatpush.bf16.msra.mxu1 %v6718_v26  ;;  %v3664_v26 = vperm.slane %v8729_v52, 3 }
 0x5dc   : > { %4512 = vmatmul.bf16.vlgmr.msrb.gmra.mxu0 %v8430_v5  ;;  %4791 = vmatpush.bf16.msra.mxu2 %v6697_v40  ;;  %v6707_v5 = vld [vmem:[#allocation10 + $0x58] sm:$0xff] }
 0x5dd   : > { %4802 = vmatpush.bf16.msra.mxu3 %v6707_v5  ;;  %4824 = vmatpush.bf16.msra.mxu0 %v6727_v9 }
 0x5de   : > { %4813 = vmatpush.bf16.msra.mxu1 %v6717_v17 }
 0x5e0   : > { %4792 = vmatpush.bf16.msra.mxu2 %v6696_v39 }
 0x5e1   : > { %4803 = vmatpush.bf16.msra.mxu3 %v6706_v20  ;;  %4825 = vmatpush.bf16.msra.mxu0 %v6726_v42 }
 0x5e2   : > { %4814 = vmatpush.bf16.msra.mxu1 %v6716_v0 }
 0x5e5   : > { %4804 = vmatpush.bf16.msra.mxu3 %v6705_v23  ;;  %4826 = vmatpush.bf16.msra.mxu0 %v6725_v46 }
 0x5e6   : > { %4815 = vmatpush.bf16.msra.mxu1 %v6715_v11 }
 0x5e9   : > { %4805 = vmatpush.bf16.msra.mxu3 %v6704_v13  ;;  %4827 = vmatpush.bf16.msra.mxu0 %v6724_v55 }
 0x5ea   : > { %4816 = vmatpush.bf16.msra.mxu1 %v6714_v2 }
 0x5ed   : > { %4828 = vmatpush.bf16.msra.mxu0 %v6723_v18 }
 0x5ee   : > { %4817 = vmatpush.bf16.msra.mxu1 %v6713_v27 }
 0x5f1   : > { %4829 = vmatpush.bf16.msra.mxu0 %v6722_v49 }
 0x5f2   : > { %4818 = vmatpush.bf16.msra.mxu1 %v6712_v62 }
 0x5f5   : > { %4830 = vmatpush.bf16.msra.mxu0 %v6721_v38 }
 0x5f9   : > { %4831 = vmatpush.bf16.msra.mxu0 %v6720_v21 }
 0x606   : > { %v4318_v61 = vpop.f32.mrf.mxu2 }
 0x607   : > { %v4319_v15 = vadd.f32 %v4318_v61, %v3661_v7 }
 0x60e   : > { %v4320_v1 = vpop.f32.mrf.mxu2  ;;  %v4331_v29 = vpop.f32.mrf.mxu3 }
 0x60f   : > { %v4332_v35 = vadd.f32 %v4331_v29, %v4319_v15 }
 0x610   : > { %v4344_v14 = vpop.f32.mrf.mxu1 }
 0x611   : > { %v4345_v4 = vadd.f32 %v4344_v14, %v4332_v35 }
 0x616   : > { %v4333_v31 = vpop.f32.mrf.mxu3  ;;  %v4370_v34 = vpop.f32.mrf.mxu2 }
 0x617   : > { %v4371_v53 = vadd.f32 %v4370_v34, %v3662_v37 }
 0x618   : > { %v4346_v44 = vpop.f32.mrf.mxu1  ;;  %v4357_v32 = vpop.f32.mrf.mxu0 }
 0x619   : > { %v4358_v54 = vadd.f32 %v4357_v32, %v4345_v4 }
 0x61b   : > { %v4517_v36 = vmax.f32 %v4358_v54, 0.0  ;;  %v6813_v54 = vld [vmem:[%s8780_s10] ss:$0 sm:$0xff] }
 0x61d   : > { %v4521_v8 = vpack.c.bf16 %v4517_v36, %v4517_v36 }
 0x61e   : > { %v4372_v50 = vpop.f32.mrf.mxu2  ;;  %v4383_v57 = vpop.f32.mrf.mxu3 }
 0x61f   : > { %4793 = vmatmul.bf16.vlgmr.msra.gmra.mxu2 %v4521_v8  ;;  %v4384_v43 = vadd.f32 %v4383_v57, %v4371_v53 }
 0x620   : > { %v4359_v48 = vpop.f32.mrf.mxu0  ;;  %v4396_v45 = vpop.f32.mrf.mxu1 }
 0x621   : > { %v4397_v41 = vadd.f32 %v4396_v45, %v4384_v43 }
 0x626   : > { %v4385_v19 = vpop.f32.mrf.mxu3  ;;  %v4422_v25 = vpop.f32.mrf.mxu2 }
 0x627   : > { %v4423_v47 = vadd.f32 %v4422_v25, %v3663_v60 }
 0x628   : > { %v4398_v12 = vpop.f32.mrf.mxu1  ;;  %v4409_v16 = vpop.f32.mrf.mxu0 }
 0x629   : > { %v4410_v58 = vadd.f32 %v4409_v16, %v4397_v41 }
 0x62b   : > { %v4518_v59 = vmax.f32 %v4410_v58, 0.0 }
 0x62d   : > { %v4522_v28 = vpack.c.bf16 %v4518_v59, %v4518_v59 }
 0x62e   : > { %v4424_v22 = vpop.f32.mrf.mxu2  ;;  %v4435_v6 = vpop.f32.mrf.mxu3 }
 0x62f   : > { %4806 = vmatmul.bf16.vlgmr.msra.gmra.mxu3 %v4522_v28  ;;  %v4436_v33 = vadd.f32 %v4435_v6, %v4423_v47 }
 0x630   : > { %v4411_v56 = vpop.f32.mrf.mxu0 }
 0x633   : > { %v4448_v3 = vpop.f32.mrf.mxu1 }
 0x634   : > { %v4449_v63 = vadd.f32 %v4448_v3, %v4436_v33 }
 0x636   : > { %v4437_v30 = vpop.f32.mrf.mxu3 }
 0x63b   : > { %v4450_v51 = vpop.f32.mrf.mxu1  ;;  %v4461_v40 = vpop.f32.mrf.mxu0 }
 0x63c   : > { %v4462_v39 = vadd.f32 %v4461_v40, %v4449_v63 }
 0x63e   : > { %v4519_v10 = vmax.f32 %v4462_v39, 0.0 }
 0x640   : > { %v4523_v5 = vpack.c.bf16 %v4519_v10, %v4519_v10 }
 0x642   : > { %4819 = vmatmul.bf16.vlgmr.msra.gmra.mxu1 %v4523_v5 }
 0x643   : > { %v4463_v24 = vpop.f32.mrf.mxu0 }
 0x646   : > { %v4474_v20 = vpop.f32.mrf.mxu2 }
 0x647   : > { %v4475_v7 = vadd.f32 %v4474_v20, %v3664_v26 }
 0x64e   : > { %v4476_v61 = vpop.f32.mrf.mxu2  ;;  %v4487_v23 = vpop.f32.mrf.mxu3 }
 0x64f   : > { %v4488_v13 = vadd.f32 %v4487_v23, %v4475_v7 }
 0x651   : > { %v4500_v17 = vpop.f32.mrf.mxu1 }
 0x652   : > { %v4501_v1 = vadd.f32 %v4500_v17, %v4488_v13 }
 0x656   : > { %v4489_v0 = vpop.f32.mrf.mxu3 }
 0x659   : > { %v4502_v29 = vpop.f32.mrf.mxu1  ;;  %v4513_v14 = vpop.f32.mrf.mxu0 }
 0x65a   : > { %v4514_v15 = vadd.f32 %v4513_v14, %v4501_v1 }
 0x65c   : > { %v4520_v11 = vmax.f32 %v4514_v15, 0.0 }
 0x65e   : > { %v4524_v35 = vpack.c.bf16 %v4520_v11, %v4520_v11 }
 0x660   : > { %4832 = vmatmul.bf16.vlgmr.msra.gmra.mxu0 %v4524_v35 }
 0x661   : > { %v4515_v2 = vpop.f32.mrf.mxu0 }
 0x6a2   : > { %v4794_v31 = vpop.f32.mrf.mxu2 }
 0x6a3   : > { %v4795_v27 = vadd.f32 %v6813_v54, %v4794_v31 }
 0x6aa   : > { %v4796_v34 = vpop.f32.mrf.mxu2 }
 0x6b2   : > { %v4807_v4 = vpop.f32.mrf.mxu3 }
 0x6b3   : > { %v4808_v36 = vadd.f32 %v4807_v4, %v4795_v27 }
 0x6ba   : > { %v4809_v52 = vpop.f32.mrf.mxu3 }
 0x6bf   : > { %v4820_v44 = vpop.f32.mrf.mxu1 }
 0x6c0   : > { %v4821_v37 = vadd.f32 %v4820_v44, %v4808_v36 }
 0x6c7   : > { %v4822_v32 = vpop.f32.mrf.mxu1 }
 0x6dd   : > { %v4833_v8 = vpop.f32.mrf.mxu0 }
 0x6de   : > { %v4834_v62 = vadd.f32 %v4833_v8, %v4821_v37 }
 0x6e0   : > { %4837 = vst [vmem:[%s447_s15] sm:$0xff] %v4834_v62 }
 0x6e1   : > { %6961 = shalt.err (!%p6958_p8)
}
 0x6e2   : > { %6744 = dma.vmem_to_hbm [thread:$0]  (%p7116_p5), %s4852_s1, 128, %s4854_s17, %s4839_s19  }
 0x6e5   : > { %v4835_v9 = vpop.f32.mrf.mxu0 }
 0x6e6 PF: > { %s8802_s25 = sld [smem:[#allocation19_spill]] }
 0x6e7   : > { %s8803_s30 = sld [smem:[#allocation17_spill]] }
 0x6ec   : > { %p6771_p9 = scmp.ge.s32.totalorder %s8802_s25, 2 }
 0x6ed   : > { %s4865_s14 = sand.u32 1, %s8803_s30  }
 0x6ee   : > { %p6760_p10 = pnand %p6771_p9, %p7120_p6  ;;  %s4866_s22 = scalar_lea.sflag [#allocation6], %s4865_s14 }
 0x6f0   : > { %p6761_p11 = pneg %p6760_p10 }
 0x6f2   : > { %6991 = dma.done.wait (%p6761_p11), %s4866_s22, 128  }
 0x6f3   : > { %6993 = vsyncadd (%p6761_p11), %s4866_s22, 4294967168  ;;  %s8805_s20 = sld [smem:[#allocation20_spill]]  ;;  %s8808_s17 = smov %s7000_s18 }
 0x6f4   : > { %s8806_s24 = sld [smem:[#allocation18_spill]] }
 0x6f5   : > { %s8807_s19 = sld [smem:[#allocation21_spill]] }
 0x6f9   : > { %p24_p12 = scmp.ge.s32.totalorder %s8805_s20, 4  }
 0x6fa   : > { %s8809_s18 = smov %s8806_s24 }
 0x6fb   :  { %26 = sbr.rel (!%p24_p12) target bundleno = 9 (0x9), region = 132 }
 0x700   :  { %4872 = vsyncpa [#allocation5], 1 }
 0x701   :  { %4874 = vsyncpa [#allocation5 + $0x1], 1 }
 0x702   :  { %4875 = vsyncpa [#allocation8], 1 }
 0x703   :  { %4876 = vsyncpa [#allocation11], 1 }
 0x704   :  { %4877 = vsyncpa [#allocation6], 1 }
 0x705   :  { %4879 = vsyncpa [#allocation6 + $0x1], 1 }

</bundles_post_ra>
